<compile_context>
chip_gen: v7x
topology: tpu7x:2x2x1
jax: 0.10.0
libtpu: 0.0.40
codegen_flags: <defaults>
</compile_context>

<pallas_src>
import math
import functools

import jax
import jax.numpy as jnp
from jax.experimental import pallas as pl
from jax.experimental.pallas import tpu as pltpu


CFG = dict(
    vocab_size=256,
    context_length=16,
    embed_dim=32,
    num_heads=4,
    num_layers=2,
    dropout_rate=0.0,   # dropout is identity at p=0 (eval semantics)
    qkv_bias=False,
)


# ----------------------------- in-kernel helpers -----------------------------

def _layernorm(x, scale, shift, eps=1e-5):
    # matches the custom LayerNorm: mean / biased variance over last dim, f32 math
    mean = jnp.mean(x, axis=-1, keepdims=True)
    var = jnp.mean((x - mean) ** 2, axis=-1, keepdims=True)
    return (x - mean) / jnp.sqrt(var + eps) * scale + shift


def _gelu(x):
    # tanh-approximate GELU (as in the GPT-from-scratch FeedForward block)
    return 0.5 * x * (1.0 + jnp.tanh(
        jnp.sqrt(2.0 / jnp.pi) * (x + 0.044715 * x * x * x)))


# ----------------------------- fused Pallas kernel ----------------------------

def _gpt_fused_kernel(tok_ids_ref, pos_ids_ref, tok_emb_ref, pos_emb_ref,
                      ln1s_ref, ln1b_ref, wq_ref, wk_ref, wv_ref, wo_ref, bo_ref,
                      ln2s_ref, ln2b_ref, w1_ref, b1_ref, w2_ref, b2_ref,
                      flns_ref, flnb_ref, wout_ref,
                      o_ref, *, num_layers, num_heads, seq_len):
    BT = tok_ids_ref.shape[0]
    V, D = tok_emb_ref.shape
    C = pos_emb_ref.shape[0]
    T = seq_len
    B = BT // T
    H = num_heads
    Dh = D // H
    G = B * H
    scale = 1.0 / math.sqrt(Dh)

    # ---- fused embedding lookup: one-hot matmuls on the (idle) MXU ----
    tok_ids = tok_ids_ref[...]                                    # (BT, 1) int32
    pos_ids = pos_ids_ref[...]                                    # (BT, 1) int32
    tok_oh = (jax.lax.broadcasted_iota(jnp.int32, (BT, V), 1)
              == tok_ids).astype(jnp.float32)
    pos_oh = (jax.lax.broadcasted_iota(jnp.int32, (BT, C), 1)
              == pos_ids).astype(jnp.float32)
    x2d = (jnp.dot(tok_oh, tok_emb_ref[...], preferred_element_type=jnp.float32)
           + jnp.dot(pos_oh, pos_emb_ref[...], preferred_element_type=jnp.float32))
    # TODO(synk): nn.Dropout with p=0.0 is an identity; omitted.

    # hoisted once for all layers: additive causal mask (no -inf, no per-layer select)
    row = jax.lax.broadcasted_iota(jnp.int32, (T, T), 0)
    col = jax.lax.broadcasted_iota(jnp.int32, (T, T), 1)
    mask_add = jnp.where(col > row, -1e30, 0.0).astype(jnp.float32)   # (T, T)

    for l in range(num_layers):                 # static, fully unrolled (L = 2)
        # ---- attention sub-block: x + MHA(LN1(x)) ----
        xn = _layernorm(x2d, ln1s_ref[l], ln1b_ref[l]).astype(jnp.bfloat16)
        q = jnp.dot(xn, wq_ref[l], preferred_element_type=jnp.float32)   # (BT, D)
        k = jnp.dot(xn, wk_ref[l], preferred_element_type=jnp.float32)
        v = jnp.dot(xn, wv_ref[l], preferred_element_type=jnp.float32)

        def to_heads(t):
            # one explicit transpose per tensor; einsums below need no hidden ones
            return (t.reshape(B, T, H, Dh).transpose(0, 2, 1, 3)
                     .reshape(G, T, Dh).astype(jnp.bfloat16))
        qh, kh, vh = to_heads(q), to_heads(k), to_heads(v)

        s = jnp.einsum("gqd,gkd->gqk", qh, kh,
                       preferred_element_type=jnp.float32) * scale + mask_add
        m = jnp.max(s, axis=-1, keepdims=True)
        e = jnp.exp(s - m)
        p = e * pl.reciprocal(jnp.sum(e, axis=-1, keepdims=True), approx=True)
        ctx = jnp.einsum("gqk,gkd->gqd", p.astype(jnp.bfloat16), vh,
                         preferred_element_type=jnp.float32)              # (G, T, Dh)
        ctx = (ctx.reshape(B, H, T, Dh).transpose(0, 2, 1, 3)
                  .reshape(BT, D)).astype(jnp.bfloat16)
        attn_out = jnp.dot(ctx, wo_ref[l],
                           preferred_element_type=jnp.float32) + bo_ref[l]
        x2d = x2d + attn_out

        # ---- feed-forward sub-block: x + FFN(LN2(x)) ----
        xn2 = _layernorm(x2d, ln2s_ref[l], ln2b_ref[l]).astype(jnp.bfloat16)
        hdn = jnp.dot(xn2, w1_ref[l], preferred_element_type=jnp.float32) + b1_ref[l]
        hdn = _gelu(hdn)                                          # f32 GELU
        ff = jnp.dot(hdn.astype(jnp.bfloat16), w2_ref[l],
                     preferred_element_type=jnp.float32) + b2_ref[l]
        x2d = x2d + ff

    # ---- final LayerNorm + LM head (lane-dense V=256 output, 2-D, unmasked vst) ----
    xn = _layernorm(x2d, flns_ref[...], flnb_ref[...]).astype(jnp.bfloat16)
    o_ref[...] = jnp.dot(xn, wout_ref[...], preferred_element_type=jnp.float32)


# ----------------------------- wrapper -----------------------------------------

def gpt_forward(token_ids, params, cfg):
    B, T = token_ids.shape
    BT = B * T
    D = cfg["embed_dim"]
    V = cfg["vocab_size"]
    C = cfg["context_length"]
    L = cfg["num_layers"]
    H4 = 4 * D

    tok_ids = token_ids.reshape(BT, 1).astype(jnp.int32)
    # trace-time constant (static T, B): no runtime op
    pos_ids = jnp.tile(jnp.arange(T, dtype=jnp.int32), B).reshape(BT, 1)

    full = lambda shape: pl.BlockSpec(shape, lambda i: (0,) * len(shape))
    kernel = functools.partial(_gpt_fused_kernel,
                               num_layers=L, num_heads=cfg["num_heads"],
                               seq_len=T)

    logits2d = pl.pallas_call(
        kernel,
        out_shape=jax.ShapeDtypeStruct((BT, V), jnp.float32),
        grid=(1,),                                                # single step
        in_specs=[
            full((BT, 1)), full((BT, 1)),                         # token / position ids
            full((V, D)), full((C, D)),                           # embedding tables
            full((L, 1, D)), full((L, 1, D)),                     # ln1 scale/shift
            full((L, D, D)), full((L, D, D)), full((L, D, D)),    # Wq, Wk, Wv (bf16)
            full((L, D, D)), full((L, 1, D)),                     # Wo (bf16), bo
            full((L, 1, D)), full((L, 1, D)),                     # ln2 scale/shift
            full((L, D, H4)), full((L, 1, H4)),                   # W1 (bf16), b1
            full((L, H4, D)), full((L, 1, D)),                    # W2 (bf16), b2
            full((1, D)), full((1, D)),                           # final LN
            full((D, V)),                                         # LM head (bf16)
        ],
        out_specs=pl.BlockSpec((BT, V), lambda i: (0, 0)),
        compiler_params=pltpu.CompilerParams(
            dimension_semantics=("arbitrary",)),
    )(tok_ids, pos_ids,
      params["tok_emb"], params["pos_emb"],
      params["ln1_scale"], params["ln1_shift"],
      params["wq"], params["wk"], params["wv"], params["wo"], params["bo"],
      params["ln2_scale"], params["ln2_shift"],
      params["w1"], params["b1"], params["w2"], params["b2"],
      params["final_ln_scale"], params["final_ln_shift"], params["w_out"])

    return logits2d.reshape(B, T, V)


# ----------------------------- parameter init ---------------------------------

def init_params(key, cfg):
    D = cfg["embed_dim"]
    V = cfg["vocab_size"]
    C = cfg["context_length"]
    L = cfg["num_layers"]
    H4 = 4 * D

    def nrm(k, shape, dtype=jnp.float32):
        return (0.02 * jax.random.normal(k, shape, jnp.float32)).astype(dtype)

    keys = jax.random.split(key, 9)
    return dict(
        tok_emb=nrm(keys[0], (V, D)),
        pos_emb=nrm(keys[1], (C, D)),
        # per-layer params stacked along leading L axis (kernel loops over L)
        ln1_scale=jnp.ones((L, 1, D), jnp.float32),
        ln1_shift=jnp.zeros((L, 1, D), jnp.float32),
        wq=nrm(keys[2], (L, D, D), jnp.bfloat16),         # [in, out] (= x @ W.T)
        wk=nrm(keys[3], (L, D, D), jnp.bfloat16),
        wv=nrm(keys[4], (L, D, D), jnp.bfloat16),
        wo=nrm(keys[5], (L, D, D), jnp.bfloat16),
        bo=jnp.zeros((L, 1, D), jnp.float32),
        ln2_scale=jnp.ones((L, 1, D), jnp.float32),
        ln2_shift=jnp.zeros((L, 1, D), jnp.float32),
        w1=nrm(keys[6], (L, D, H4), jnp.bfloat16),
        b1=jnp.zeros((L, 1, H4), jnp.float32),
        w2=nrm(keys[7], (L, H4, D), jnp.bfloat16),
        b2=jnp.zeros((L, 1, D), jnp.float32),
        final_ln_scale=jnp.ones((1, D), jnp.float32),
        final_ln_shift=jnp.zeros((1, D), jnp.float32),
        w_out=nrm(keys[8], (D, V), jnp.bfloat16),         # LM head, bias=False
    )


# ----------------------------- main --------------------------------------------

if __name__ == "__main__":
    cfg = CFG
    key = jax.random.PRNGKey(0)
    pkey, dkey = jax.random.split(key)
    params = init_params(pkey, cfg)

    B, T = 2, 8
    token_ids = jax.random.randint(dkey, (B, T), 0, cfg["vocab_size"],
                                   dtype=jnp.int32)

    fwd = jax.jit(lambda ids: gpt_forward(ids, params, cfg))
    logits = jax.block_until_ready(fwd(token_ids))

    assert logits.shape == (B, T, cfg["vocab_size"])
    assert logits.dtype == jnp.float32
    assert bool(jnp.all(jnp.isfinite(logits)))
    print("KERNEL_OK")
</pallas_src>

<mosaic_0001>
module attributes {stable_mosaic.version = 11 : i64} {
  func.func @_gpt_fused_kernel(%arg0: i32, %arg1: memref<16x1xi32, #tpu.memory_space<vmem>>, %arg2: memref<16x1xi32, #tpu.memory_space<vmem>>, %arg3: memref<256x32xf32, #tpu.memory_space<vmem>>, %arg4: memref<16x32xf32, #tpu.memory_space<vmem>>, %arg5: memref<2x1x32xf32, #tpu.memory_space<vmem>>, %arg6: memref<2x1x32xf32, #tpu.memory_space<vmem>>, %arg7: memref<2x32x32xbf16, #tpu.memory_space<vmem>>, %arg8: memref<2x32x32xbf16, #tpu.memory_space<vmem>>, %arg9: memref<2x32x32xbf16, #tpu.memory_space<vmem>>, %arg10: memref<2x32x32xbf16, #tpu.memory_space<vmem>>, %arg11: memref<2x1x32xf32, #tpu.memory_space<vmem>>, %arg12: memref<2x1x32xf32, #tpu.memory_space<vmem>>, %arg13: memref<2x1x32xf32, #tpu.memory_space<vmem>>, %arg14: memref<2x32x128xbf16, #tpu.memory_space<vmem>>, %arg15: memref<2x1x128xf32, #tpu.memory_space<vmem>>, %arg16: memref<2x128x32xbf16, #tpu.memory_space<vmem>>, %arg17: memref<2x1x32xf32, #tpu.memory_space<vmem>>, %arg18: memref<1x32xf32, #tpu.memory_space<vmem>>, %arg19: memref<1x32xf32, #tpu.memory_space<vmem>>, %arg20: memref<32x256xbf16, #tpu.memory_space<vmem>>, %arg21: memref<16x256xf32, #tpu.memory_space<vmem>>) attributes {dimension_semantics = [#tpu.dimension_semantics<arbitrary>], iteration_bounds = array<i64: 1>, scalar_prefetch = 0 : i64, scratch_operands = 0 : i64, tpu.core_type = #tpu.core_type<tc>, window_params = [{pipeline_mode = #tpu.pipeline_mode<synchronous>, transform_indices = @transform_0, window_bounds = array<i64: 16, 1>}, {pipeline_mode = #tpu.pipeline_mode<synchronous>, transform_indices = @transform_1, window_bounds = array<i64: 16, 1>}, {pipeline_mode = #tpu.pipeline_mode<synchronous>, transform_indices = @transform_2, window_bounds = array<i64: 256, 32>}, {pipeline_mode = #tpu.pipeline_mode<synchronous>, transform_indices = @transform_3, window_bounds = array<i64: 16, 32>}, {pipeline_mode = #tpu.pipeline_mode<synchronous>, transform_indices = @transform_4, window_bounds = array<i64: 2, 1, 32>}, {pipeline_mode = #tpu.pipeline_mode<synchronous>, transform_indices = @transform_5, window_bounds = array<i64: 2, 1, 32>}, {pipeline_mode = #tpu.pipeline_mode<synchronous>, transform_indices = @transform_6, window_bounds = array<i64: 2, 32, 32>}, {pipeline_mode = #tpu.pipeline_mode<synchronous>, transform_indices = @transform_7, window_bounds = array<i64: 2, 32, 32>}, {pipeline_mode = #tpu.pipeline_mode<synchronous>, transform_indices = @transform_8, window_bounds = array<i64: 2, 32, 32>}, {pipeline_mode = #tpu.pipeline_mode<synchronous>, transform_indices = @transform_9, window_bounds = array<i64: 2, 32, 32>}, {pipeline_mode = #tpu.pipeline_mode<synchronous>, transform_indices = @transform_10, window_bounds = array<i64: 2, 1, 32>}, {pipeline_mode = #tpu.pipeline_mode<synchronous>, transform_indices = @transform_11, window_bounds = array<i64: 2, 1, 32>}, {pipeline_mode = #tpu.pipeline_mode<synchronous>, transform_indices = @transform_12, window_bounds = array<i64: 2, 1, 32>}, {pipeline_mode = #tpu.pipeline_mode<synchronous>, transform_indices = @transform_13, window_bounds = array<i64: 2, 32, 128>}, {pipeline_mode = #tpu.pipeline_mode<synchronous>, transform_indices = @transform_14, window_bounds = array<i64: 2, 1, 128>}, {pipeline_mode = #tpu.pipeline_mode<synchronous>, transform_indices = @transform_15, window_bounds = array<i64: 2, 128, 32>}, {pipeline_mode = #tpu.pipeline_mode<synchronous>, transform_indices = @transform_16, window_bounds = array<i64: 2, 1, 32>}, {pipeline_mode = #tpu.pipeline_mode<synchronous>, transform_indices = @transform_17, window_bounds = array<i64: 1, 32>}, {pipeline_mode = #tpu.pipeline_mode<synchronous>, transform_indices = @transform_18, window_bounds = array<i64: 1, 32>}, {pipeline_mode = #tpu.pipeline_mode<synchronous>, transform_indices = @transform_19, window_bounds = array<i64: 32, 256>}, {pipeline_mode = #tpu.pipeline_mode<synchronous>, transform_indices = @transform_20, window_bounds = array<i64: 16, 256>}]} {
    %c0 = arith.constant 0 : index
    %c0_0 = arith.constant 0 : index
    %0 = vector.load %arg1[%c0, %c0_0] : memref<16x1xi32, #tpu.memory_space<vmem>>, vector<16x1xi32>
    %c0_1 = arith.constant 0 : index
    %c0_2 = arith.constant 0 : index
    %1 = vector.load %arg2[%c0_1, %c0_2] : memref<16x1xi32, #tpu.memory_space<vmem>>, vector<16x1xi32>
    %2 = tpu.iota {dimensions = array<i32: 1>} : vector<16x256xi32>
    %3 = vector.broadcast %0 : vector<16x1xi32> to vector<16x256xi32>
    %4 = arith.cmpi eq, %2, %3 : vector<16x256xi32>
    %5 = arith.extui %4 : vector<16x256xi1> to vector<16x256xi32>
    %6 = arith.sitofp %5 : vector<16x256xi32> to vector<16x256xf32>
    %7 = tpu.iota {dimensions = array<i32: 1>} : vector<16x16xi32>
    %8 = vector.broadcast %1 : vector<16x1xi32> to vector<16x16xi32>
    %9 = arith.cmpi eq, %7, %8 : vector<16x16xi32>
    %10 = arith.extui %9 : vector<16x16xi1> to vector<16x16xi32>
    %11 = arith.sitofp %10 : vector<16x16xi32> to vector<16x16xf32>
    %c0_3 = arith.constant 0 : index
    %c0_4 = arith.constant 0 : index
    %12 = vector.load %arg3[%c0_3, %c0_4] : memref<256x32xf32, #tpu.memory_space<vmem>>, vector<256x32xf32>
    %cst = arith.constant dense<0.000000e+00> : vector<16x32xf32>
    %13 = tpu.matmul %6, %12, %cst {dimension_numbers = #tpu.dot_dimension_numbers<[1], [0], [0], [1], [0, 0, 1, 1], [], []>} : vector<16x256xf32>, vector<256x32xf32>, vector<16x32xf32> -> vector<16x32xf32>
    %c0_5 = arith.constant 0 : index
    %c0_6 = arith.constant 0 : index
    %14 = vector.load %arg4[%c0_5, %c0_6] : memref<16x32xf32, #tpu.memory_space<vmem>>, vector<16x32xf32>
    %cst_7 = arith.constant dense<0.000000e+00> : vector<16x32xf32>
    %15 = tpu.matmul %11, %14, %cst_7 {dimension_numbers = #tpu.dot_dimension_numbers<[1], [0], [0], [1], [0, 0, 1, 1], [], []>} : vector<16x16xf32>, vector<16x32xf32>, vector<16x32xf32> -> vector<16x32xf32>
    %16 = arith.addf %13, %15 : vector<16x32xf32>
    %17 = tpu.iota {dimensions = array<i32: 0>} : vector<8x8xi32>
    %18 = tpu.iota {dimensions = array<i32: 1>} : vector<8x8xi32>
    %19 = arith.cmpi sgt, %18, %17 : vector<8x8xi32>
    %cst_8 = arith.constant -1.000000e+30 : f32
    %cst_9 = arith.constant 0.000000e+00 : f32
    %20 = vector.broadcast %cst_8 : f32 to vector<8x8xf32>
    %21 = vector.broadcast %cst_9 : f32 to vector<8x8xf32>
    %22 = arith.select %19, %20, %21 : vector<8x8xi1>, vector<8x8xf32>
    %c0_10 = arith.constant 0 : index
    %c0_11 = arith.constant 0 : index
    %c0_12 = arith.constant 0 : index
    %23 = vector.load %arg5[%c0_10, %c0_11, %c0_12] : memref<2x1x32xf32, #tpu.memory_space<vmem>>, vector<1x1x32xf32>
    %24 = vector.shape_cast %23 : vector<1x1x32xf32> to vector<1x32xf32>
    %c0_13 = arith.constant 0 : index
    %c0_14 = arith.constant 0 : index
    %c0_15 = arith.constant 0 : index
    %25 = vector.load %arg6[%c0_13, %c0_14, %c0_15] : memref<2x1x32xf32, #tpu.memory_space<vmem>>, vector<1x1x32xf32>
    %26 = vector.shape_cast %25 : vector<1x1x32xf32> to vector<1x32xf32>
    %cst_16 = arith.constant dense<0.000000e+00> : vector<16xf32>
    %27 = vector.multi_reduction <add>, %16, %cst_16 [1] : vector<16x32xf32> to vector<16xf32>
    %28 = vector.shape_cast %27 : vector<16xf32> to vector<16x1xf32>
    %cst_17 = arith.constant 3.200000e+01 : f32
    %29 = vector.broadcast %cst_17 : f32 to vector<16x1xf32>
    %30 = arith.divf %28, %29 : vector<16x1xf32>
    %31 = vector.broadcast %30 : vector<16x1xf32> to vector<16x32xf32>
    %32 = arith.subf %16, %31 : vector<16x32xf32>
    %33 = arith.mulf %32, %32 : vector<16x32xf32>
    %cst_18 = arith.constant dense<0.000000e+00> : vector<16xf32>
    %34 = vector.multi_reduction <add>, %33, %cst_18 [1] : vector<16x32xf32> to vector<16xf32>
    %35 = vector.shape_cast %34 : vector<16xf32> to vector<16x1xf32>
    %cst_19 = arith.constant 3.200000e+01 : f32
    %36 = vector.broadcast %cst_19 : f32 to vector<16x1xf32>
    %37 = arith.divf %35, %36 : vector<16x1xf32>
    %38 = vector.broadcast %30 : vector<16x1xf32> to vector<16x32xf32>
    %39 = arith.subf %16, %38 : vector<16x32xf32>
    %cst_20 = arith.constant 9.99999974E-6 : f32
    %40 = vector.broadcast %cst_20 : f32 to vector<16x1xf32>
    %41 = arith.addf %37, %40 : vector<16x1xf32>
    %42 = math.sqrt %41 : vector<16x1xf32>
    %43 = vector.broadcast %42 : vector<16x1xf32> to vector<16x32xf32>
    %44 = arith.divf %39, %43 : vector<16x32xf32>
    %45 = vector.broadcast %24 : vector<1x32xf32> to vector<16x32xf32>
    %46 = arith.mulf %44, %45 : vector<16x32xf32>
    %47 = vector.broadcast %26 : vector<1x32xf32> to vector<16x32xf32>
    %48 = arith.addf %46, %47 : vector<16x32xf32>
    %49 = arith.truncf %48 : vector<16x32xf32> to vector<16x32xbf16>
    %c0_21 = arith.constant 0 : index
    %c0_22 = arith.constant 0 : index
    %c0_23 = arith.constant 0 : index
    %50 = vector.load %arg7[%c0_21, %c0_22, %c0_23] : memref<2x32x32xbf16, #tpu.memory_space<vmem>>, vector<1x32x32xbf16>
    %51 = vector.shape_cast %50 : vector<1x32x32xbf16> to vector<32x32xbf16>
    %cst_24 = arith.constant dense<0.000000e+00> : vector<16x32xf32>
    %52 = tpu.matmul %49, %51, %cst_24 {dimension_numbers = #tpu.dot_dimension_numbers<[1], [0], [0], [1], [0, 0, 1, 1], [], []>} : vector<16x32xbf16>, vector<32x32xbf16>, vector<16x32xf32> -> vector<16x32xf32>
    %c0_25 = arith.constant 0 : index
    %c0_26 = arith.constant 0 : index
    %c0_27 = arith.constant 0 : index
    %53 = vector.load %arg8[%c0_25, %c0_26, %c0_27] : memref<2x32x32xbf16, #tpu.memory_space<vmem>>, vector<1x32x32xbf16>
    %54 = vector.shape_cast %53 : vector<1x32x32xbf16> to vector<32x32xbf16>
    %cst_28 = arith.constant dense<0.000000e+00> : vector<16x32xf32>
    %55 = tpu.matmul %49, %54, %cst_28 {dimension_numbers = #tpu.dot_dimension_numbers<[1], [0], [0], [1], [0, 0, 1, 1], [], []>} : vector<16x32xbf16>, vector<32x32xbf16>, vector<16x32xf32> -> vector<16x32xf32>
    %c0_29 = arith.constant 0 : index
    %c0_30 = arith.constant 0 : index
    %c0_31 = arith.constant 0 : index
    %56 = vector.load %arg9[%c0_29, %c0_30, %c0_31] : memref<2x32x32xbf16, #tpu.memory_space<vmem>>, vector<1x32x32xbf16>
    %57 = vector.shape_cast %56 : vector<1x32x32xbf16> to vector<32x32xbf16>
    %cst_32 = arith.constant dense<0.000000e+00> : vector<16x32xf32>
    %58 = tpu.matmul %49, %57, %cst_32 {dimension_numbers = #tpu.dot_dimension_numbers<[1], [0], [0], [1], [0, 0, 1, 1], [], []>} : vector<16x32xbf16>, vector<32x32xbf16>, vector<16x32xf32> -> vector<16x32xf32>
    %59 = vector.shape_cast %52 : vector<16x32xf32> to vector<2x8x4x8xf32>
    %60 = tpu.transpose %59, [0, 2, 1, 3] : vector<2x8x4x8xf32> -> vector<2x4x8x8xf32>
    %61 = vector.shape_cast %60 : vector<2x4x8x8xf32> to vector<8x8x8xf32>
    %62 = arith.truncf %61 : vector<8x8x8xf32> to vector<8x8x8xbf16>
    %63 = vector.shape_cast %55 : vector<16x32xf32> to vector<2x8x4x8xf32>
    %64 = tpu.transpose %63, [0, 2, 1, 3] : vector<2x8x4x8xf32> -> vector<2x4x8x8xf32>
    %65 = vector.shape_cast %64 : vector<2x4x8x8xf32> to vector<8x8x8xf32>
    %66 = arith.truncf %65 : vector<8x8x8xf32> to vector<8x8x8xbf16>
    %67 = vector.shape_cast %58 : vector<16x32xf32> to vector<2x8x4x8xf32>
    %68 = tpu.transpose %67, [0, 2, 1, 3] : vector<2x8x4x8xf32> -> vector<2x4x8x8xf32>
    %69 = vector.shape_cast %68 : vector<2x4x8x8xf32> to vector<8x8x8xf32>
    %70 = arith.truncf %69 : vector<8x8x8xf32> to vector<8x8x8xbf16>
    "tpu.trace_start"() <{level = 10 : i32, message = "gqd,gkd->gqk"}> : () -> ()
    %cst_33 = arith.constant dense<0.000000e+00> : vector<8x8x8xf32>
    %71 = tpu.matmul %62, %66, %cst_33 {dimension_numbers = #tpu.dot_dimension_numbers<[2], [2], [1], [1], [0, 0, 0, 1, 1, 1], [0], [0]>} : vector<8x8x8xbf16>, vector<8x8x8xbf16>, vector<8x8x8xf32> -> vector<8x8x8xf32>
    "tpu.trace_stop"() : () -> ()
    %cst_34 = arith.constant 0.353553385 : f32
    %72 = vector.broadcast %cst_34 : f32 to vector<8x8x8xf32>
    %73 = arith.mulf %71, %72 : vector<8x8x8xf32>
    %74 = vector.shape_cast %22 : vector<8x8xf32> to vector<1x8x8xf32>
    %75 = vector.broadcast %74 : vector<1x8x8xf32> to vector<8x8x8xf32>
    %76 = arith.addf %73, %75 : vector<8x8x8xf32>
    %cst_35 = arith.constant dense<0xFF800000> : vector<8x8xf32>
    %77 = vector.multi_reduction <maximumf>, %76, %cst_35 [2] : vector<8x8x8xf32> to vector<8x8xf32>
    %78 = vector.shape_cast %77 : vector<8x8xf32> to vector<8x8x1xf32>
    %79 = vector.broadcast %78 : vector<8x8x1xf32> to vector<8x8x8xf32>
    %80 = arith.subf %76, %79 : vector<8x8x8xf32>
    %81 = math.exp %80 : vector<8x8x8xf32>
    %cst_36 = arith.constant dense<0.000000e+00> : vector<8x8xf32>
    %82 = vector.multi_reduction <add>, %81, %cst_36 [2] : vector<8x8x8xf32> to vector<8x8xf32>
    %83 = vector.shape_cast %82 : vector<8x8xf32> to vector<8x8x1xf32>
    %84 = tpu.reciprocal %83 {approx = true} : vector<8x8x1xf32> -> vector<8x8x1xf32>
    %85 = vector.broadcast %84 : vector<8x8x1xf32> to vector<8x8x8xf32>
    %86 = arith.mulf %81, %85 : vector<8x8x8xf32>
    %87 = arith.truncf %86 : vector<8x8x8xf32> to vector<8x8x8xbf16>
    "tpu.trace_start"() <{level = 10 : i32, message = "gqk,gkd->gqd"}> : () -> ()
    %cst_37 = arith.constant dense<0.000000e+00> : vector<8x8x8xf32>
    %88 = tpu.matmul %87, %70, %cst_37 {dimension_numbers = #tpu.dot_dimension_numbers<[2], [1], [1], [2], [0, 0, 0, 1, 1, 2], [0], [0]>} : vector<8x8x8xbf16>, vector<8x8x8xbf16>, vector<8x8x8xf32> -> vector<8x8x8xf32>
    "tpu.trace_stop"() : () -> ()
    %89 = vector.shape_cast %88 : vector<8x8x8xf32> to vector<2x4x8x8xf32>
    %90 = tpu.transpose %89, [0, 2, 1, 3] : vector<2x4x8x8xf32> -> vector<2x8x4x8xf32>
    %91 = vector.shape_cast %90 : vector<2x8x4x8xf32> to vector<16x32xf32>
    %92 = arith.truncf %91 : vector<16x32xf32> to vector<16x32xbf16>
    %c0_38 = arith.constant 0 : index
    %c0_39 = arith.constant 0 : index
    %c0_40 = arith.constant 0 : index
    %93 = vector.load %arg10[%c0_38, %c0_39, %c0_40] : memref<2x32x32xbf16, #tpu.memory_space<vmem>>, vector<1x32x32xbf16>
    %94 = vector.shape_cast %93 : vector<1x32x32xbf16> to vector<32x32xbf16>
    %cst_41 = arith.constant dense<0.000000e+00> : vector<16x32xf32>
    %95 = tpu.matmul %92, %94, %cst_41 {dimension_numbers = #tpu.dot_dimension_numbers<[1], [0], [0], [1], [0, 0, 1, 1], [], []>} : vector<16x32xbf16>, vector<32x32xbf16>, vector<16x32xf32> -> vector<16x32xf32>
    %c0_42 = arith.constant 0 : index
    %c0_43 = arith.constant 0 : index
    %c0_44 = arith.constant 0 : index
    %96 = vector.load %arg11[%c0_42, %c0_43, %c0_44] : memref<2x1x32xf32, #tpu.memory_space<vmem>>, vector<1x1x32xf32>
    %97 = vector.shape_cast %96 : vector<1x1x32xf32> to vector<1x32xf32>
    %98 = vector.broadcast %97 : vector<1x32xf32> to vector<16x32xf32>
    %99 = arith.addf %95, %98 : vector<16x32xf32>
    %100 = arith.addf %16, %99 : vector<16x32xf32>
    %c0_45 = arith.constant 0 : index
    %c0_46 = arith.constant 0 : index
    %c0_47 = arith.constant 0 : index
    %101 = vector.load %arg12[%c0_45, %c0_46, %c0_47] : memref<2x1x32xf32, #tpu.memory_space<vmem>>, vector<1x1x32xf32>
    %102 = vector.shape_cast %101 : vector<1x1x32xf32> to vector<1x32xf32>
    %c0_48 = arith.constant 0 : index
    %c0_49 = arith.constant 0 : index
    %c0_50 = arith.constant 0 : index
    %103 = vector.load %arg13[%c0_48, %c0_49, %c0_50] : memref<2x1x32xf32, #tpu.memory_space<vmem>>, vector<1x1x32xf32>
    %104 = vector.shape_cast %103 : vector<1x1x32xf32> to vector<1x32xf32>
    %cst_51 = arith.constant dense<0.000000e+00> : vector<16xf32>
    %105 = vector.multi_reduction <add>, %100, %cst_51 [1] : vector<16x32xf32> to vector<16xf32>
    %106 = vector.shape_cast %105 : vector<16xf32> to vector<16x1xf32>
    %cst_52 = arith.constant 3.200000e+01 : f32
    %107 = vector.broadcast %cst_52 : f32 to vector<16x1xf32>
    %108 = arith.divf %106, %107 : vector<16x1xf32>
    %109 = vector.broadcast %108 : vector<16x1xf32> to vector<16x32xf32>
    %110 = arith.subf %100, %109 : vector<16x32xf32>
    %111 = arith.mulf %110, %110 : vector<16x32xf32>
    %cst_53 = arith.constant dense<0.000000e+00> : vector<16xf32>
    %112 = vector.multi_reduction <add>, %111, %cst_53 [1] : vector<16x32xf32> to vector<16xf32>
    %113 = vector.shape_cast %112 : vector<16xf32> to vector<16x1xf32>
    %cst_54 = arith.constant 3.200000e+01 : f32
    %114 = vector.broadcast %cst_54 : f32 to vector<16x1xf32>
    %115 = arith.divf %113, %114 : vector<16x1xf32>
    %116 = vector.broadcast %108 : vector<16x1xf32> to vector<16x32xf32>
    %117 = arith.subf %100, %116 : vector<16x32xf32>
    %cst_55 = arith.constant 9.99999974E-6 : f32
    %118 = vector.broadcast %cst_55 : f32 to vector<16x1xf32>
    %119 = arith.addf %115, %118 : vector<16x1xf32>
    %120 = math.sqrt %119 : vector<16x1xf32>
    %121 = vector.broadcast %120 : vector<16x1xf32> to vector<16x32xf32>
    %122 = arith.divf %117, %121 : vector<16x32xf32>
    %123 = vector.broadcast %102 : vector<1x32xf32> to vector<16x32xf32>
    %124 = arith.mulf %122, %123 : vector<16x32xf32>
    %125 = vector.broadcast %104 : vector<1x32xf32> to vector<16x32xf32>
    %126 = arith.addf %124, %125 : vector<16x32xf32>
    %127 = arith.truncf %126 : vector<16x32xf32> to vector<16x32xbf16>
    %c0_56 = arith.constant 0 : index
    %c0_57 = arith.constant 0 : index
    %c0_58 = arith.constant 0 : index
    %128 = vector.load %arg14[%c0_56, %c0_57, %c0_58] : memref<2x32x128xbf16, #tpu.memory_space<vmem>>, vector<1x32x128xbf16>
    %129 = vector.shape_cast %128 : vector<1x32x128xbf16> to vector<32x128xbf16>
    %cst_59 = arith.constant dense<0.000000e+00> : vector<16x128xf32>
    %130 = tpu.matmul %127, %129, %cst_59 {dimension_numbers = #tpu.dot_dimension_numbers<[1], [0], [0], [1], [0, 0, 1, 1], [], []>} : vector<16x32xbf16>, vector<32x128xbf16>, vector<16x128xf32> -> vector<16x128xf32>
    %c0_60 = arith.constant 0 : index
    %c0_61 = arith.constant 0 : index
    %c0_62 = arith.constant 0 : index
    %131 = vector.load %arg15[%c0_60, %c0_61, %c0_62] : memref<2x1x128xf32, #tpu.memory_space<vmem>>, vector<1x1x128xf32>
    %132 = vector.shape_cast %131 : vector<1x1x128xf32> to vector<1x128xf32>
    %133 = vector.broadcast %132 : vector<1x128xf32> to vector<16x128xf32>
    %134 = arith.addf %130, %133 : vector<16x128xf32>
    %cst_63 = arith.constant 5.000000e-01 : f32
    %135 = vector.broadcast %cst_63 : f32 to vector<16x128xf32>
    %136 = arith.mulf %135, %134 : vector<16x128xf32>
    %cst_64 = arith.constant 0.636619746 : f32
    %137 = math.sqrt %cst_64 : f32
    %cst_65 = arith.constant 4.471500e-02 : f32
    %138 = vector.broadcast %cst_65 : f32 to vector<16x128xf32>
    %139 = arith.mulf %138, %134 : vector<16x128xf32>
    %140 = arith.mulf %139, %134 : vector<16x128xf32>
    %141 = arith.mulf %140, %134 : vector<16x128xf32>
    %142 = arith.addf %134, %141 : vector<16x128xf32>
    %143 = vector.broadcast %137 : f32 to vector<16x128xf32>
    %144 = arith.mulf %143, %142 : vector<16x128xf32>
    %145 = math.tanh %144 : vector<16x128xf32>
    %cst_66 = arith.constant 1.000000e+00 : f32
    %146 = vector.broadcast %cst_66 : f32 to vector<16x128xf32>
    %147 = arith.addf %146, %145 : vector<16x128xf32>
    %148 = arith.mulf %136, %147 : vector<16x128xf32>
    %149 = arith.truncf %148 : vector<16x128xf32> to vector<16x128xbf16>
    %c0_67 = arith.constant 0 : index
    %c0_68 = arith.constant 0 : index
    %c0_69 = arith.constant 0 : index
    %150 = vector.load %arg16[%c0_67, %c0_68, %c0_69] : memref<2x128x32xbf16, #tpu.memory_space<vmem>>, vector<1x128x32xbf16>
    %151 = vector.shape_cast %150 : vector<1x128x32xbf16> to vector<128x32xbf16>
    %cst_70 = arith.constant dense<0.000000e+00> : vector<16x32xf32>
    %152 = tpu.matmul %149, %151, %cst_70 {dimension_numbers = #tpu.dot_dimension_numbers<[1], [0], [0], [1], [0, 0, 1, 1], [], []>} : vector<16x128xbf16>, vector<128x32xbf16>, vector<16x32xf32> -> vector<16x32xf32>
    %c0_71 = arith.constant 0 : index
    %c0_72 = arith.constant 0 : index
    %c0_73 = arith.constant 0 : index
    %153 = vector.load %arg17[%c0_71, %c0_72, %c0_73] : memref<2x1x32xf32, #tpu.memory_space<vmem>>, vector<1x1x32xf32>
    %154 = vector.shape_cast %153 : vector<1x1x32xf32> to vector<1x32xf32>
    %155 = vector.broadcast %154 : vector<1x32xf32> to vector<16x32xf32>
    %156 = arith.addf %152, %155 : vector<16x32xf32>
    %157 = arith.addf %100, %156 : vector<16x32xf32>
    %c1 = arith.constant 1 : index
    %c0_74 = arith.constant 0 : index
    %c0_75 = arith.constant 0 : index
    %158 = vector.load %arg5[%c1, %c0_74, %c0_75] : memref<2x1x32xf32, #tpu.memory_space<vmem>>, vector<1x1x32xf32>
    %159 = vector.shape_cast %158 : vector<1x1x32xf32> to vector<1x32xf32>
    %c1_76 = arith.constant 1 : index
    %c0_77 = arith.constant 0 : index
    %c0_78 = arith.constant 0 : index
    %160 = vector.load %arg6[%c1_76, %c0_77, %c0_78] : memref<2x1x32xf32, #tpu.memory_space<vmem>>, vector<1x1x32xf32>
    %161 = vector.shape_cast %160 : vector<1x1x32xf32> to vector<1x32xf32>
    %cst_79 = arith.constant dense<0.000000e+00> : vector<16xf32>
    %162 = vector.multi_reduction <add>, %157, %cst_79 [1] : vector<16x32xf32> to vector<16xf32>
    %163 = vector.shape_cast %162 : vector<16xf32> to vector<16x1xf32>
    %cst_80 = arith.constant 3.200000e+01 : f32
    %164 = vector.broadcast %cst_80 : f32 to vector<16x1xf32>
    %165 = arith.divf %163, %164 : vector<16x1xf32>
    %166 = vector.broadcast %165 : vector<16x1xf32> to vector<16x32xf32>
    %167 = arith.subf %157, %166 : vector<16x32xf32>
    %168 = arith.mulf %167, %167 : vector<16x32xf32>
    %cst_81 = arith.constant dense<0.000000e+00> : vector<16xf32>
    %169 = vector.multi_reduction <add>, %168, %cst_81 [1] : vector<16x32xf32> to vector<16xf32>
    %170 = vector.shape_cast %169 : vector<16xf32> to vector<16x1xf32>
    %cst_82 = arith.constant 3.200000e+01 : f32
    %171 = vector.broadcast %cst_82 : f32 to vector<16x1xf32>
    %172 = arith.divf %170, %171 : vector<16x1xf32>
    %173 = vector.broadcast %165 : vector<16x1xf32> to vector<16x32xf32>
    %174 = arith.subf %157, %173 : vector<16x32xf32>
    %cst_83 = arith.constant 9.99999974E-6 : f32
    %175 = vector.broadcast %cst_83 : f32 to vector<16x1xf32>
    %176 = arith.addf %172, %175 : vector<16x1xf32>
    %177 = math.sqrt %176 : vector<16x1xf32>
    %178 = vector.broadcast %177 : vector<16x1xf32> to vector<16x32xf32>
    %179 = arith.divf %174, %178 : vector<16x32xf32>
    %180 = vector.broadcast %159 : vector<1x32xf32> to vector<16x32xf32>
    %181 = arith.mulf %179, %180 : vector<16x32xf32>
    %182 = vector.broadcast %161 : vector<1x32xf32> to vector<16x32xf32>
    %183 = arith.addf %181, %182 : vector<16x32xf32>
    %184 = arith.truncf %183 : vector<16x32xf32> to vector<16x32xbf16>
    %c1_84 = arith.constant 1 : index
    %c0_85 = arith.constant 0 : index
    %c0_86 = arith.constant 0 : index
    %185 = vector.load %arg7[%c1_84, %c0_85, %c0_86] : memref<2x32x32xbf16, #tpu.memory_space<vmem>>, vector<1x32x32xbf16>
    %186 = vector.shape_cast %185 : vector<1x32x32xbf16> to vector<32x32xbf16>
    %cst_87 = arith.constant dense<0.000000e+00> : vector<16x32xf32>
    %187 = tpu.matmul %184, %186, %cst_87 {dimension_numbers = #tpu.dot_dimension_numbers<[1], [0], [0], [1], [0, 0, 1, 1], [], []>} : vector<16x32xbf16>, vector<32x32xbf16>, vector<16x32xf32> -> vector<16x32xf32>
    %c1_88 = arith.constant 1 : index
    %c0_89 = arith.constant 0 : index
    %c0_90 = arith.constant 0 : index
    %188 = vector.load %arg8[%c1_88, %c0_89, %c0_90] : memref<2x32x32xbf16, #tpu.memory_space<vmem>>, vector<1x32x32xbf16>
    %189 = vector.shape_cast %188 : vector<1x32x32xbf16> to vector<32x32xbf16>
    %cst_91 = arith.constant dense<0.000000e+00> : vector<16x32xf32>
    %190 = tpu.matmul %184, %189, %cst_91 {dimension_numbers = #tpu.dot_dimension_numbers<[1], [0], [0], [1], [0, 0, 1, 1], [], []>} : vector<16x32xbf16>, vector<32x32xbf16>, vector<16x32xf32> -> vector<16x32xf32>
    %c1_92 = arith.constant 1 : index
    %c0_93 = arith.constant 0 : index
    %c0_94 = arith.constant 0 : index
    %191 = vector.load %arg9[%c1_92, %c0_93, %c0_94] : memref<2x32x32xbf16, #tpu.memory_space<vmem>>, vector<1x32x32xbf16>
    %192 = vector.shape_cast %191 : vector<1x32x32xbf16> to vector<32x32xbf16>
    %cst_95 = arith.constant dense<0.000000e+00> : vector<16x32xf32>
    %193 = tpu.matmul %184, %192, %cst_95 {dimension_numbers = #tpu.dot_dimension_numbers<[1], [0], [0], [1], [0, 0, 1, 1], [], []>} : vector<16x32xbf16>, vector<32x32xbf16>, vector<16x32xf32> -> vector<16x32xf32>
    %194 = vector.shape_cast %187 : vector<16x32xf32> to vector<2x8x4x8xf32>
    %195 = tpu.transpose %194, [0, 2, 1, 3] : vector<2x8x4x8xf32> -> vector<2x4x8x8xf32>
    %196 = vector.shape_cast %195 : vector<2x4x8x8xf32> to vector<8x8x8xf32>
    %197 = arith.truncf %196 : vector<8x8x8xf32> to vector<8x8x8xbf16>
    %198 = vector.shape_cast %190 : vector<16x32xf32> to vector<2x8x4x8xf32>
    %199 = tpu.transpose %198, [0, 2, 1, 3] : vector<2x8x4x8xf32> -> vector<2x4x8x8xf32>
    %200 = vector.shape_cast %199 : vector<2x4x8x8xf32> to vector<8x8x8xf32>
    %201 = arith.truncf %200 : vector<8x8x8xf32> to vector<8x8x8xbf16>
    %202 = vector.shape_cast %193 : vector<16x32xf32> to vector<2x8x4x8xf32>
    %203 = tpu.transpose %202, [0, 2, 1, 3] : vector<2x8x4x8xf32> -> vector<2x4x8x8xf32>
    %204 = vector.shape_cast %203 : vector<2x4x8x8xf32> to vector<8x8x8xf32>
    %205 = arith.truncf %204 : vector<8x8x8xf32> to vector<8x8x8xbf16>
    "tpu.trace_start"() <{level = 10 : i32, message = "gqd,gkd->gqk"}> : () -> ()
    %cst_96 = arith.constant dense<0.000000e+00> : vector<8x8x8xf32>
    %206 = tpu.matmul %197, %201, %cst_96 {dimension_numbers = #tpu.dot_dimension_numbers<[2], [2], [1], [1], [0, 0, 0, 1, 1, 1], [0], [0]>} : vector<8x8x8xbf16>, vector<8x8x8xbf16>, vector<8x8x8xf32> -> vector<8x8x8xf32>
    "tpu.trace_stop"() : () -> ()
    %cst_97 = arith.constant 0.353553385 : f32
    %207 = vector.broadcast %cst_97 : f32 to vector<8x8x8xf32>
    %208 = arith.mulf %206, %207 : vector<8x8x8xf32>
    %209 = vector.shape_cast %22 : vector<8x8xf32> to vector<1x8x8xf32>
    %210 = vector.broadcast %209 : vector<1x8x8xf32> to vector<8x8x8xf32>
    %211 = arith.addf %208, %210 : vector<8x8x8xf32>
    %cst_98 = arith.constant dense<0xFF800000> : vector<8x8xf32>
    %212 = vector.multi_reduction <maximumf>, %211, %cst_98 [2] : vector<8x8x8xf32> to vector<8x8xf32>
    %213 = vector.shape_cast %212 : vector<8x8xf32> to vector<8x8x1xf32>
    %214 = vector.broadcast %213 : vector<8x8x1xf32> to vector<8x8x8xf32>
    %215 = arith.subf %211, %214 : vector<8x8x8xf32>
    %216 = math.exp %215 : vector<8x8x8xf32>
    %cst_99 = arith.constant dense<0.000000e+00> : vector<8x8xf32>
    %217 = vector.multi_reduction <add>, %216, %cst_99 [2] : vector<8x8x8xf32> to vector<8x8xf32>
    %218 = vector.shape_cast %217 : vector<8x8xf32> to vector<8x8x1xf32>
    %219 = tpu.reciprocal %218 {approx = true} : vector<8x8x1xf32> -> vector<8x8x1xf32>
    %220 = vector.broadcast %219 : vector<8x8x1xf32> to vector<8x8x8xf32>
    %221 = arith.mulf %216, %220 : vector<8x8x8xf32>
    %222 = arith.truncf %221 : vector<8x8x8xf32> to vector<8x8x8xbf16>
    "tpu.trace_start"() <{level = 10 : i32, message = "gqk,gkd->gqd"}> : () -> ()
    %cst_100 = arith.constant dense<0.000000e+00> : vector<8x8x8xf32>
    %223 = tpu.matmul %222, %205, %cst_100 {dimension_numbers = #tpu.dot_dimension_numbers<[2], [1], [1], [2], [0, 0, 0, 1, 1, 2], [0], [0]>} : vector<8x8x8xbf16>, vector<8x8x8xbf16>, vector<8x8x8xf32> -> vector<8x8x8xf32>
    "tpu.trace_stop"() : () -> ()
    %224 = vector.shape_cast %223 : vector<8x8x8xf32> to vector<2x4x8x8xf32>
    %225 = tpu.transpose %224, [0, 2, 1, 3] : vector<2x4x8x8xf32> -> vector<2x8x4x8xf32>
    %226 = vector.shape_cast %225 : vector<2x8x4x8xf32> to vector<16x32xf32>
    %227 = arith.truncf %226 : vector<16x32xf32> to vector<16x32xbf16>
    %c1_101 = arith.constant 1 : index
    %c0_102 = arith.constant 0 : index
    %c0_103 = arith.constant 0 : index
    %228 = vector.load %arg10[%c1_101, %c0_102, %c0_103] : memref<2x32x32xbf16, #tpu.memory_space<vmem>>, vector<1x32x32xbf16>
    %229 = vector.shape_cast %228 : vector<1x32x32xbf16> to vector<32x32xbf16>
    %cst_104 = arith.constant dense<0.000000e+00> : vector<16x32xf32>
    %230 = tpu.matmul %227, %229, %cst_104 {dimension_numbers = #tpu.dot_dimension_numbers<[1], [0], [0], [1], [0, 0, 1, 1], [], []>} : vector<16x32xbf16>, vector<32x32xbf16>, vector<16x32xf32> -> vector<16x32xf32>
    %c1_105 = arith.constant 1 : index
    %c0_106 = arith.constant 0 : index
    %c0_107 = arith.constant 0 : index
    %231 = vector.load %arg11[%c1_105, %c0_106, %c0_107] : memref<2x1x32xf32, #tpu.memory_space<vmem>>, vector<1x1x32xf32>
    %232 = vector.shape_cast %231 : vector<1x1x32xf32> to vector<1x32xf32>
    %233 = vector.broadcast %232 : vector<1x32xf32> to vector<16x32xf32>
    %234 = arith.addf %230, %233 : vector<16x32xf32>
    %235 = arith.addf %157, %234 : vector<16x32xf32>
    %c1_108 = arith.constant 1 : index
    %c0_109 = arith.constant 0 : index
    %c0_110 = arith.constant 0 : index
    %236 = vector.load %arg12[%c1_108, %c0_109, %c0_110] : memref<2x1x32xf32, #tpu.memory_space<vmem>>, vector<1x1x32xf32>
    %237 = vector.shape_cast %236 : vector<1x1x32xf32> to vector<1x32xf32>
    %c1_111 = arith.constant 1 : index
    %c0_112 = arith.constant 0 : index
    %c0_113 = arith.constant 0 : index
    %238 = vector.load %arg13[%c1_111, %c0_112, %c0_113] : memref<2x1x32xf32, #tpu.memory_space<vmem>>, vector<1x1x32xf32>
    %239 = vector.shape_cast %238 : vector<1x1x32xf32> to vector<1x32xf32>
    %cst_114 = arith.constant dense<0.000000e+00> : vector<16xf32>
    %240 = vector.multi_reduction <add>, %235, %cst_114 [1] : vector<16x32xf32> to vector<16xf32>
    %241 = vector.shape_cast %240 : vector<16xf32> to vector<16x1xf32>
    %cst_115 = arith.constant 3.200000e+01 : f32
    %242 = vector.broadcast %cst_115 : f32 to vector<16x1xf32>
    %243 = arith.divf %241, %242 : vector<16x1xf32>
    %244 = vector.broadcast %243 : vector<16x1xf32> to vector<16x32xf32>
    %245 = arith.subf %235, %244 : vector<16x32xf32>
    %246 = arith.mulf %245, %245 : vector<16x32xf32>
    %cst_116 = arith.constant dense<0.000000e+00> : vector<16xf32>
    %247 = vector.multi_reduction <add>, %246, %cst_116 [1] : vector<16x32xf32> to vector<16xf32>
    %248 = vector.shape_cast %247 : vector<16xf32> to vector<16x1xf32>
    %cst_117 = arith.constant 3.200000e+01 : f32
    %249 = vector.broadcast %cst_117 : f32 to vector<16x1xf32>
    %250 = arith.divf %248, %249 : vector<16x1xf32>
    %251 = vector.broadcast %243 : vector<16x1xf32> to vector<16x32xf32>
    %252 = arith.subf %235, %251 : vector<16x32xf32>
    %cst_118 = arith.constant 9.99999974E-6 : f32
    %253 = vector.broadcast %cst_118 : f32 to vector<16x1xf32>
    %254 = arith.addf %250, %253 : vector<16x1xf32>
    %255 = math.sqrt %254 : vector<16x1xf32>
    %256 = vector.broadcast %255 : vector<16x1xf32> to vector<16x32xf32>
    %257 = arith.divf %252, %256 : vector<16x32xf32>
    %258 = vector.broadcast %237 : vector<1x32xf32> to vector<16x32xf32>
    %259 = arith.mulf %257, %258 : vector<16x32xf32>
    %260 = vector.broadcast %239 : vector<1x32xf32> to vector<16x32xf32>
    %261 = arith.addf %259, %260 : vector<16x32xf32>
    %262 = arith.truncf %261 : vector<16x32xf32> to vector<16x32xbf16>
    %c1_119 = arith.constant 1 : index
    %c0_120 = arith.constant 0 : index
    %c0_121 = arith.constant 0 : index
    %263 = vector.load %arg14[%c1_119, %c0_120, %c0_121] : memref<2x32x128xbf16, #tpu.memory_space<vmem>>, vector<1x32x128xbf16>
    %264 = vector.shape_cast %263 : vector<1x32x128xbf16> to vector<32x128xbf16>
    %cst_122 = arith.constant dense<0.000000e+00> : vector<16x128xf32>
    %265 = tpu.matmul %262, %264, %cst_122 {dimension_numbers = #tpu.dot_dimension_numbers<[1], [0], [0], [1], [0, 0, 1, 1], [], []>} : vector<16x32xbf16>, vector<32x128xbf16>, vector<16x128xf32> -> vector<16x128xf32>
    %c1_123 = arith.constant 1 : index
    %c0_124 = arith.constant 0 : index
    %c0_125 = arith.constant 0 : index
    %266 = vector.load %arg15[%c1_123, %c0_124, %c0_125] : memref<2x1x128xf32, #tpu.memory_space<vmem>>, vector<1x1x128xf32>
    %267 = vector.shape_cast %266 : vector<1x1x128xf32> to vector<1x128xf32>
    %268 = vector.broadcast %267 : vector<1x128xf32> to vector<16x128xf32>
    %269 = arith.addf %265, %268 : vector<16x128xf32>
    %cst_126 = arith.constant 5.000000e-01 : f32
    %270 = vector.broadcast %cst_126 : f32 to vector<16x128xf32>
    %271 = arith.mulf %270, %269 : vector<16x128xf32>
    %cst_127 = arith.constant 0.636619746 : f32
    %272 = math.sqrt %cst_127 : f32
    %cst_128 = arith.constant 4.471500e-02 : f32
    %273 = vector.broadcast %cst_128 : f32 to vector<16x128xf32>
    %274 = arith.mulf %273, %269 : vector<16x128xf32>
    %275 = arith.mulf %274, %269 : vector<16x128xf32>
    %276 = arith.mulf %275, %269 : vector<16x128xf32>
    %277 = arith.addf %269, %276 : vector<16x128xf32>
    %278 = vector.broadcast %272 : f32 to vector<16x128xf32>
    %279 = arith.mulf %278, %277 : vector<16x128xf32>
    %280 = math.tanh %279 : vector<16x128xf32>
    %cst_129 = arith.constant 1.000000e+00 : f32
    %281 = vector.broadcast %cst_129 : f32 to vector<16x128xf32>
    %282 = arith.addf %281, %280 : vector<16x128xf32>
    %283 = arith.mulf %271, %282 : vector<16x128xf32>
    %284 = arith.truncf %283 : vector<16x128xf32> to vector<16x128xbf16>
    %c1_130 = arith.constant 1 : index
    %c0_131 = arith.constant 0 : index
    %c0_132 = arith.constant 0 : index
    %285 = vector.load %arg16[%c1_130, %c0_131, %c0_132] : memref<2x128x32xbf16, #tpu.memory_space<vmem>>, vector<1x128x32xbf16>
    %286 = vector.shape_cast %285 : vector<1x128x32xbf16> to vector<128x32xbf16>
    %cst_133 = arith.constant dense<0.000000e+00> : vector<16x32xf32>
    %287 = tpu.matmul %284, %286, %cst_133 {dimension_numbers = #tpu.dot_dimension_numbers<[1], [0], [0], [1], [0, 0, 1, 1], [], []>} : vector<16x128xbf16>, vector<128x32xbf16>, vector<16x32xf32> -> vector<16x32xf32>
    %c1_134 = arith.constant 1 : index
    %c0_135 = arith.constant 0 : index
    %c0_136 = arith.constant 0 : index
    %288 = vector.load %arg17[%c1_134, %c0_135, %c0_136] : memref<2x1x32xf32, #tpu.memory_space<vmem>>, vector<1x1x32xf32>
    %289 = vector.shape_cast %288 : vector<1x1x32xf32> to vector<1x32xf32>
    %290 = vector.broadcast %289 : vector<1x32xf32> to vector<16x32xf32>
    %291 = arith.addf %287, %290 : vector<16x32xf32>
    %292 = arith.addf %235, %291 : vector<16x32xf32>
    %c0_137 = arith.constant 0 : index
    %c0_138 = arith.constant 0 : index
    %293 = vector.load %arg18[%c0_137, %c0_138] : memref<1x32xf32, #tpu.memory_space<vmem>>, vector<1x32xf32>
    %c0_139 = arith.constant 0 : index
    %c0_140 = arith.constant 0 : index
    %294 = vector.load %arg19[%c0_139, %c0_140] : memref<1x32xf32, #tpu.memory_space<vmem>>, vector<1x32xf32>
    %cst_141 = arith.constant dense<0.000000e+00> : vector<16xf32>
    %295 = vector.multi_reduction <add>, %292, %cst_141 [1] : vector<16x32xf32> to vector<16xf32>
    %296 = vector.shape_cast %295 : vector<16xf32> to vector<16x1xf32>
    %cst_142 = arith.constant 3.200000e+01 : f32
    %297 = vector.broadcast %cst_142 : f32 to vector<16x1xf32>
    %298 = arith.divf %296, %297 : vector<16x1xf32>
    %299 = vector.broadcast %298 : vector<16x1xf32> to vector<16x32xf32>
    %300 = arith.subf %292, %299 : vector<16x32xf32>
    %301 = arith.mulf %300, %300 : vector<16x32xf32>
    %cst_143 = arith.constant dense<0.000000e+00> : vector<16xf32>
    %302 = vector.multi_reduction <add>, %301, %cst_143 [1] : vector<16x32xf32> to vector<16xf32>
    %303 = vector.shape_cast %302 : vector<16xf32> to vector<16x1xf32>
    %cst_144 = arith.constant 3.200000e+01 : f32
    %304 = vector.broadcast %cst_144 : f32 to vector<16x1xf32>
    %305 = arith.divf %303, %304 : vector<16x1xf32>
    %306 = vector.broadcast %298 : vector<16x1xf32> to vector<16x32xf32>
    %307 = arith.subf %292, %306 : vector<16x32xf32>
    %cst_145 = arith.constant 9.99999974E-6 : f32
    %308 = vector.broadcast %cst_145 : f32 to vector<16x1xf32>
    %309 = arith.addf %305, %308 : vector<16x1xf32>
    %310 = math.sqrt %309 : vector<16x1xf32>
    %311 = vector.broadcast %310 : vector<16x1xf32> to vector<16x32xf32>
    %312 = arith.divf %307, %311 : vector<16x32xf32>
    %313 = vector.broadcast %293 : vector<1x32xf32> to vector<16x32xf32>
    %314 = arith.mulf %312, %313 : vector<16x32xf32>
    %315 = vector.broadcast %294 : vector<1x32xf32> to vector<16x32xf32>
    %316 = arith.addf %314, %315 : vector<16x32xf32>
    %317 = arith.truncf %316 : vector<16x32xf32> to vector<16x32xbf16>
    %c0_146 = arith.constant 0 : index
    %c0_147 = arith.constant 0 : index
    %318 = vector.load %arg20[%c0_146, %c0_147] : memref<32x256xbf16, #tpu.memory_space<vmem>>, vector<32x256xbf16>
    %cst_148 = arith.constant dense<0.000000e+00> : vector<16x256xf32>
    %319 = tpu.matmul %317, %318, %cst_148 {dimension_numbers = #tpu.dot_dimension_numbers<[1], [0], [0], [1], [0, 0, 1, 1], [], []>} : vector<16x32xbf16>, vector<32x256xbf16>, vector<16x256xf32> -> vector<16x256xf32>
    %c0_149 = arith.constant 0 : index
    %c0_150 = arith.constant 0 : index
    %320 = vector.load %arg21[%c0_149, %c0_150] : memref<16x256xf32, #tpu.memory_space<vmem>>, vector<16x256xf32>
    tpu.vector_store %arg21[%c0_149, %c0_150], %319 {strides = array<i32>} : memref<16x256xf32, #tpu.memory_space<vmem>>, vector<16x256xf32>,
    return
  }
  func.func @transform_0(%arg0: i32) -> (i32, i32) {
    %c0_i32 = arith.constant 0 : i32
    %c0_i32_0 = arith.constant 0 : i32
    %c0_i32_1 = arith.constant 0 : i32
    return %c0_i32, %c0_i32_0 : i32, i32
  }
  func.func @transform_1(%arg0: i32) -> (i32, i32) {
    %c0_i32 = arith.constant 0 : i32
    %c0_i32_0 = arith.constant 0 : i32
    %c0_i32_1 = arith.constant 0 : i32
    return %c0_i32, %c0_i32_0 : i32, i32
  }
  func.func @transform_2(%arg0: i32) -> (i32, i32) {
    %c0_i32 = arith.constant 0 : i32
    %c0_i32_0 = arith.constant 0 : i32
    %c0_i32_1 = arith.constant 0 : i32
    return %c0_i32, %c0_i32_0 : i32, i32
  }
  func.func @transform_3(%arg0: i32) -> (i32, i32) {
    %c0_i32 = arith.constant 0 : i32
    %c0_i32_0 = arith.constant 0 : i32
    %c0_i32_1 = arith.constant 0 : i32
    return %c0_i32, %c0_i32_0 : i32, i32
  }
  func.func @transform_4(%arg0: i32) -> (i32, i32, i32) {
    %c0_i32 = arith.constant 0 : i32
    %c0_i32_0 = arith.constant 0 : i32
    %c0_i32_1 = arith.constant 0 : i32
    %c0_i32_2 = arith.constant 0 : i32
    return %c0_i32, %c0_i32_0, %c0_i32_1 : i32, i32, i32
  }
  func.func @transform_5(%arg0: i32) -> (i32, i32, i32) {
    %c0_i32 = arith.constant 0 : i32
    %c0_i32_0 = arith.constant 0 : i32
    %c0_i32_1 = arith.constant 0 : i32
    %c0_i32_2 = arith.constant 0 : i32
    return %c0_i32, %c0_i32_0, %c0_i32_1 : i32, i32, i32
  }
  func.func @transform_6(%arg0: i32) -> (i32, i32, i32) {
    %c0_i32 = arith.constant 0 : i32
    %c0_i32_0 = arith.constant 0 : i32
    %c0_i32_1 = arith.constant 0 : i32
    %c0_i32_2 = arith.constant 0 : i32
    return %c0_i32, %c0_i32_0, %c0_i32_1 : i32, i32, i32
  }
  func.func @transform_7(%arg0: i32) -> (i32, i32, i32) {
    %c0_i32 = arith.constant 0 : i32
    %c0_i32_0 = arith.constant 0 : i32
    %c0_i32_1 = arith.constant 0 : i32
    %c0_i32_2 = arith.constant 0 : i32
    return %c0_i32, %c0_i32_0, %c0_i32_1 : i32, i32, i32
  }
  func.func @transform_8(%arg0: i32) -> (i32, i32, i32) {
    %c0_i32 = arith.constant 0 : i32
    %c0_i32_0 = arith.constant 0 : i32
    %c0_i32_1 = arith.constant 0 : i32
    %c0_i32_2 = arith.constant 0 : i32
    return %c0_i32, %c0_i32_0, %c0_i32_1 : i32, i32, i32
  }
  func.func @transform_9(%arg0: i32) -> (i32, i32, i32) {
    %c0_i32 = arith.constant 0 : i32
    %c0_i32_0 = arith.constant 0 : i32
    %c0_i32_1 = arith.constant 0 : i32
    %c0_i32_2 = arith.constant 0 : i32
    return %c0_i32, %c0_i32_0, %c0_i32_1 : i32, i32, i32
  }
  func.func @transform_10(%arg0: i32) -> (i32, i32, i32) {
    %c0_i32 = arith.constant 0 : i32
    %c0_i32_0 = arith.constant 0 : i32
    %c0_i32_1 = arith.constant 0 : i32
    %c0_i32_2 = arith.constant 0 : i32
    return %c0_i32, %c0_i32_0, %c0_i32_1 : i32, i32, i32
  }
  func.func @transform_11(%arg0: i32) -> (i32, i32, i32) {
    %c0_i32 = arith.constant 0 : i32
    %c0_i32_0 = arith.constant 0 : i32
    %c0_i32_1 = arith.constant 0 : i32
    %c0_i32_2 = arith.constant 0 : i32
    return %c0_i32, %c0_i32_0, %c0_i32_1 : i32, i32, i32
  }
  func.func @transform_12(%arg0: i32) -> (i32, i32, i32) {
    %c0_i32 = arith.constant 0 : i32
    %c0_i32_0 = arith.constant 0 : i32
    %c0_i32_1 = arith.constant 0 : i32
    %c0_i32_2 = arith.constant 0 : i32
    return %c0_i32, %c0_i32_0, %c0_i32_1 : i32, i32, i32
  }
  func.func @transform_13(%arg0: i32) -> (i32, i32, i32) {
    %c0_i32 = arith.constant 0 : i32
    %c0_i32_0 = arith.constant 0 : i32
    %c0_i32_1 = arith.constant 0 : i32
    %c0_i32_2 = arith.constant 0 : i32
    return %c0_i32, %c0_i32_0, %c0_i32_1 : i32, i32, i32
  }
  func.func @transform_14(%arg0: i32) -> (i32, i32, i32) {
    %c0_i32 = arith.constant 0 : i32
    %c0_i32_0 = arith.constant 0 : i32
    %c0_i32_1 = arith.constant 0 : i32
    %c0_i32_2 = arith.constant 0 : i32
    return %c0_i32, %c0_i32_0, %c0_i32_1 : i32, i32, i32
  }
  func.func @transform_15(%arg0: i32) -> (i32, i32, i32) {
    %c0_i32 = arith.constant 0 : i32
    %c0_i32_0 = arith.constant 0 : i32
    %c0_i32_1 = arith.constant 0 : i32
    %c0_i32_2 = arith.constant 0 : i32
    return %c0_i32, %c0_i32_0, %c0_i32_1 : i32, i32, i32
  }
  func.func @transform_16(%arg0: i32) -> (i32, i32, i32) {
    %c0_i32 = arith.constant 0 : i32
    %c0_i32_0 = arith.constant 0 : i32
    %c0_i32_1 = arith.constant 0 : i32
    %c0_i32_2 = arith.constant 0 : i32
    return %c0_i32, %c0_i32_0, %c0_i32_1 : i32, i32, i32
  }
  func.func @transform_17(%arg0: i32) -> (i32, i32) {
    %c0_i32 = arith.constant 0 : i32
    %c0_i32_0 = arith.constant 0 : i32
    %c0_i32_1 = arith.constant 0 : i32
    return %c0_i32, %c0_i32_0 : i32, i32
  }
  func.func @transform_18(%arg0: i32) -> (i32, i32) {
    %c0_i32 = arith.constant 0 : i32
    %c0_i32_0 = arith.constant 0 : i32
    %c0_i32_1 = arith.constant 0 : i32
    return %c0_i32, %c0_i32_0 : i32, i32
  }
  func.func @transform_19(%arg0: i32) -> (i32, i32) {
    %c0_i32 = arith.constant 0 : i32
    %c0_i32_0 = arith.constant 0 : i32
    %c0_i32_1 = arith.constant 0 : i32
    return %c0_i32, %c0_i32_0 : i32, i32
  }
  func.func @transform_20(%arg0: i32) -> (i32, i32) {
    %c0_i32 = arith.constant 0 : i32
    %c0_i32_0 = arith.constant 0 : i32
    %c0_i32_1 = arith.constant 0 : i32
    return %c0_i32, %c0_i32_0 : i32, i32
  }
}

</mosaic_0001>

<bundles_post_ra>
// kernel: tile.0
= control target key start
LH: loop header
LB: loop body
LE: loop exit
PB: predicated region body
PF: predicated region fallthrough
CT: control target
= control target key end

     0   :  { %s66_s8 = smov 125   ;;  %vm7_vm0 = vcmask 7168   ;;  %s67_s11 = smov 126   ;;  %s117_s0 = inlined_call_operand.vmem [shape: s32[2,8], index: 0, kind: input, shape index: {}]   ;;  %s118_s1 = inlined_call_operand.vmem [shape: s32[16,1], index: 1, kind: output, shape index: {}]  }
   0x1   :  { %v4_v0 = vld [vmem:[%s117_s0] sm:$0x3]  ;;  %s65_s0 = smov 127   ;;  %s68_s12 = smov 124  }
   0x2   :  { %5 = vst [vmem:[#allocation0] sm:$0x3] %v4_v0  ;;  %s69_s13 = smov 123   ;;  %s70_s14 = smov 122  }
   0x3   :  { %s71_s15 = smov 121  }
   0x9   :  { %v9_v1 = vld [vmem:[#allocation0] sm:$0x3]  }
   0xa   :  { %v21_v2 = vld [vmem:[#allocation0] sm:$0x3]   ;;  %10 = vrot.lane.b32.xlu0 %v9_v1, %s65_s0 }
   0xb   :  { %22 = vrot.lane.b32.xlu1 %v21_v2, %s66_s8  ;;  %v15_v3 = vld [vmem:[#allocation0] sm:$0x3]  }
   0xc   :  { %v27_v4 = vld [vmem:[#allocation0] sm:$0x3]  }
   0xd   :  { %v6_v5 = vld [vmem:[#allocation0] sm:$0x3]  }
   0xe   :  { %8 = vst.msk [vmem:[%s118_s1] ss:$8 sm:$0x3] %vm7_vm0, %v6_v5   ;;  %16 = vrot.lane.b32.xlu0 %v15_v3, %s67_s11  ;;  %v33_v6 = vld [vmem:[#allocation0] sm:$0x3]  }
   0xf   :  { %28 = vrot.lane.b32.xlu1 %v27_v4, %s68_s12  ;;  %v39_v7 = vld [vmem:[#allocation0] sm:$0x3]  }
  0x10   :  { %v45_v8 = vld [vmem:[#allocation0] sm:$0x3]  }
  0x12   :  { %34 = vrot.lane.b32.xlu0 %v33_v6, %s69_s13 }
  0x13   :  { %40 = vrot.lane.b32.xlu1 %v39_v7, %s70_s14 }
  0x16   :  { %46 = vrot.lane.b32.xlu0 %v45_v8, %s71_s15 }
  0x7c   :  { %v11_v9 = vpop.permute.xlu0 %10  }
  0x7d   :  { %v23_v10 = vpop.permute.xlu1 %22   ;;  %51 = vst.msk [vmem:[%s118_s1 + $0x1] ss:$8 sm:$0x3] %vm7_vm0, %v11_v9  }
  0x7e   :  { %53 = vst.msk [vmem:[%s118_s1 + $0x3] ss:$8 sm:$0x3] %vm7_vm0, %v23_v10  }
  0x80   :  { %v17_v11 = vpop.permute.xlu0 %16  }
  0x81   :  { %v29_v12 = vpop.permute.xlu1 %28   ;;  %52 = vst.msk [vmem:[%s118_s1 + $0x2] ss:$8 sm:$0x3] %vm7_vm0, %v17_v11  }
  0x82   :  { %54 = vst.msk [vmem:[%s118_s1 + $0x4] ss:$8 sm:$0x3] %vm7_vm0, %v29_v12  }
  0x84   :  { %v35_v13 = vpop.permute.xlu0 %34  }
  0x85   :  { %v41_v14 = vpop.permute.xlu1 %40   ;;  %55 = vst.msk [vmem:[%s118_s1 + $0x5] ss:$8 sm:$0x3] %vm7_vm0, %v35_v13  }
  0x86   :  { %56 = vst.msk [vmem:[%s118_s1 + $0x6] ss:$8 sm:$0x3] %vm7_vm0, %v41_v14  }
  0x88   :  { %v47_v15 = vpop.permute.xlu0 %46  }
  0x89   :  { %57 = vst.msk [vmem:[%s118_s1 + $0x7] ss:$8 sm:$0x3] %vm7_vm0, %v47_v15  }

// kernel: _lambda_.1
= control target key start
LH: loop header
LB: loop body
LE: loop exit
PB: predicated region body
PF: predicated region fallthrough
CT: control target
= control target key end

     0   :  { %s8053_s0 = inlined_call_operand.vmem [shape: s32[16,1], index: 0, kind: input, shape index: {}]   ;;  %s8054_s1 = inlined_call_operand.vmem [shape: s32[16,1], index: 1, kind: input, shape index: {}]   ;;  %s8055_s2 = inlined_call_operand.hbm [shape: f32[256,32], index: 2, kind: input, shape index: {}]   ;;  %s8056_s3 = inlined_call_operand.vmem [shape: f32[16,32], index: 3, kind: input, shape index: {}]   ;;  %s8057_s4 = inlined_call_operand.vmem [shape: f32[2,1,32], index: 4, kind: input, shape index: {}, may-alias: {4,11}]   ;;  %s8058_s5 = inlined_call_operand.vmem [shape: f32[2,1,32], index: 5, kind: input, shape index: {}, may-alias: {5,10,12,16}]   ;;  %s8059_s6 = inlined_call_operand.hbm [shape: bf16[2,32,32], index: 6, kind: input, shape index: {}]   ;;  %s8060_s7 = inlined_call_operand.hbm [shape: bf16[2,32,32], index: 7, kind: input, shape index: {}]   ;;  %s8061_s8 = inlined_call_operand.hbm [shape: bf16[2,32,32], index: 8, kind: input, shape index: {}]   ;;  %s8062_s9 = inlined_call_operand.hbm [shape: bf16[2,32,32], index: 9, kind: input, shape index: {}]   ;;  %s8063_s10 = inlined_call_operand.vmem [shape: f32[2,1,32], index: 10, kind: input, shape index: {}, may-alias: {5,10,12,16}]   ;;  %s8064_s11 = inlined_call_operand.vmem [shape: f32[2,1,32], index: 11, kind: input, shape index: {}, may-alias: {4,11}]   ;;  %s8065_s12 = inlined_call_operand.vmem [shape: f32[2,1,32], index: 12, kind: input, shape index: {}, may-alias: {5,10,12,16}]   ;;  %s8066_s13 = inlined_call_operand.vmem [shape: bf16[2,32,128], index: 13, kind: input, shape index: {}]   ;;  %s8067_s14 = inlined_call_operand.vmem [shape: f32[2,1,128], index: 14, kind: input, shape index: {}]   ;;  %s8068_s15 = inlined_call_operand.vmem [shape: bf16[2,128,32], index: 15, kind: input, shape index: {}]   ;;  %s8069_s16 = inlined_call_operand.vmem [shape: f32[2,1,32], index: 16, kind: input, shape index: {}, may-alias: {5,10,12,16}]   ;;  %s8070_s17 = inlined_call_operand.vmem [shape: f32[1,32], index: 17, kind: input, shape index: {}]   ;;  %s8071_s18 = inlined_call_operand.vmem [shape: f32[1,32], index: 18, kind: input, shape index: {}]   ;;  %s8072_s19 = inlined_call_operand.vmem [shape: bf16[32,256], index: 19, kind: input, shape index: {}]   ;;  %s8073_s20 = inlined_call_operand.hbm [shape: f32[16,256], index: 20, kind: output, shape index: {}]  }
   0x1   :  { %8082 = sst [smem:[#allocation16_spill]] %s8053_s0 }
   0x2   :  { %8083 = sst [smem:[#allocation17_spill]] %s8054_s1 }
   0x3   :  { %8084 = sst [smem:[#allocation18_spill]] %s8055_s2 }
   0x4   :  { %8085 = sst [smem:[#allocation19_spill]] %s8056_s3 }
   0x5   :  { %8086 = sst [smem:[#allocation20_spill]] %s8057_s4 }
   0x6   :  { %8087 = sst [smem:[#allocation21_spill]] %s8073_s20 }
   0x7   :  { %25 = vsyncpa [#allocation3], 0 }
   0x8   :  { %26 = vsyncpa [#allocation6], 0 }
   0x9   :  { %27 = vsyncpa [#allocation9], 0 }
   0xa   :  { %28 = vsyncpa [#allocation4], 0  ;;  %s6788_s1 = smov [#allocation5]   ;;  %s6648_s2 = scalar_lea.hbm %s8059_s6, 512 }
   0xb   :  { %s56_s22 = sshll.u32 %s6788_s1, 4  ;;  %p6649_p0 = scmp.ne.s32.totalorder %s8059_s6, %s6648_s2  ;;  %s57_s22 = int_to_ptr.vmem [resolvable:$true] %s56_s22 }
   0xc   :  { %p6652_p1 = scmp.lt.u32.totalorder %s6648_s2, %s8059_s6 }
   0xe   :  { %p6654_p2 = pnand %p6652_p1, %p6649_p0 }
  0x10   :  { %6657 = shalt.err (!%p6654_p2)
}
  0x11   :  { %s6658_s28 = scalar_lea.vmem %s57_s22, 512  ;;  %p6663_p4 = scmp.lt.s32.totalorder %s57_s22, %s57_s22 }
  0x12   :  { %p6659_p3 = scmp.ne.s32.totalorder %s57_s22, %s6658_s28  ;;  %p6664_p5 = scmp.lt.s32.totalorder %s6658_s28, %s6658_s28 }
  0x14   :  { %p6665_p6 = por %p6664_p5, %p6663_p4 }
  0x16   :  { %p6666_p7 = pnand %p6665_p6, %p6659_p3 }
  0x18   :  { %6669 = shalt.err (!%p6666_p7)
}
  0x19   :  { %s8080_s4 = smov 64   ;;  %s6790_s29 = smov 4  }
  0x1a   :  { %62 = dma.hbm_to_vmem [thread:$0]  %s8059_s6, 512, %s57_s22, [#allocation6], %s8080_s4, %s8080_s4, %s6790_s29  }
  0x1b   :  { %s6791_s21 = smov [#allocation8]   ;;  %s6792_s23 = smov [#allocation2]  }
  0x1c   :  { %s80_s1 = sshll.u32 %s6791_s21, 4  ;;  %s38_s24 = sshll.u32 %s6792_s23, 4  ;;  %s81_s1 = int_to_ptr.vmem [resolvable:$true] %s80_s1  ;;  %s39_s24 = int_to_ptr.vmem [resolvable:$true] %s38_s24 }
  0x1d   :  { %s6670_s3 = scalar_lea.hbm %s8061_s8, 512 }
  0x1e   :  { %p6671_p8 = scmp.ne.s32.totalorder %s8061_s8, %s6670_s3  ;;  %p6674_p9 = scmp.lt.u32.totalorder %s6670_s3, %s8061_s8 }
  0x20   :  { %p6676_p10 = pnand %p6674_p9, %p6671_p8 }
  0x22   :  { %6679 = shalt.err (!%p6676_p10)
}
  0x23   :  { %s6680_s6 = scalar_lea.vmem %s81_s1, 512  ;;  %p6685_p12 = scmp.lt.s32.totalorder %s81_s1, %s81_s1 }
  0x24   :  { %p6681_p11 = scmp.ne.s32.totalorder %s81_s1, %s6680_s6  ;;  %p6686_p13 = scmp.lt.s32.totalorder %s6680_s6, %s6680_s6 }
  0x26   :  { %p6687_p0 = por %p6686_p13, %p6685_p12 }
  0x28   :  { %p6688_p1 = pnand %p6687_p0, %p6681_p11 }
  0x2a   :  { %6691 = shalt.err (!%p6688_p1)
}
  0x2b   :  { %86 = dma.hbm_to_vmem [thread:$0]  %s8061_s8, 512, %s81_s1, [#allocation9], %s8080_s4, %s8080_s4, %s6790_s29  }
  0x2c   :  { %s8088_s21 = sld [smem:[#allocation18_spill]] }
  0x32   :  { %s6692_s23 = scalar_lea.hbm %s8088_s21, 4096 }
  0x33   :  { %p6693_p2 = scmp.ne.s32.totalorder %s8088_s21, %s6692_s23  ;;  %p6696_p3 = scmp.lt.u32.totalorder %s6692_s23, %s8088_s21 }
  0x35   :  { %p6698_p4 = pnand %p6696_p3, %p6693_p2 }
  0x37   :  { %6701 = shalt.err (!%p6698_p4)
}
  0x38   :  { %s6702_s27 = scalar_lea.vmem %s39_s24, 4096  ;;  %p6707_p6 = scmp.lt.s32.totalorder %s39_s24, %s39_s24 }
  0x39   :  { %p6703_p5 = scmp.ne.s32.totalorder %s39_s24, %s6702_s27  ;;  %p6708_p7 = scmp.lt.s32.totalorder %s6702_s27, %s6702_s27 }
  0x3b   :  { %p6709_p8 = por %p6708_p7, %p6707_p6 }
  0x3d   :  { %p6710_p9 = pnand %p6709_p8, %p6703_p5 }
  0x3f   :  { %6713 = shalt.err (!%p6710_p9)
}
  0x40   :  { %s6793_s8 = smov 128   ;;  %s6794_s1 = smov 8  }
  0x41   :  { %44 = dma.hbm_to_vmem [thread:$0]  %s8088_s21, 4096, %s39_s24, [#allocation3], %s6793_s8, %s6793_s8, %s6794_s1  }
  0x42   :  { %s6795_s22 = smov [#allocation7]   ;;  %s6796_s0 = smov [#allocation10]  }
  0x43   :  { %s68_s30 = sshll.u32 %s6795_s22, 4  ;;  %s92_s20 = sshll.u32 %s6796_s0, 4  ;;  %s69_s30 = int_to_ptr.vmem [resolvable:$true] %s68_s30  ;;  %s93_s20 = int_to_ptr.vmem [resolvable:$true] %s92_s20 }
  0x44   :  { %s6714_s25 = scalar_lea.hbm %s8060_s7, 512 }
  0x45   :  { %p6715_p10 = scmp.ne.s32.totalorder %s8060_s7, %s6714_s25  ;;  %p6718_p11 = scmp.lt.u32.totalorder %s6714_s25, %s8060_s7 }
  0x47   :  { %p6720_p12 = pnand %p6718_p11, %p6715_p10 }
  0x49   :  { %6723 = shalt.err (!%p6720_p12)
}
  0x4a   :  { %s6724_s24 = scalar_lea.vmem %s69_s30, 512  ;;  %p6729_p0 = scmp.lt.s32.totalorder %s69_s30, %s69_s30 }
  0x4b   :  { %p6725_p13 = scmp.ne.s32.totalorder %s69_s30, %s6724_s24  ;;  %p6730_p1 = scmp.lt.s32.totalorder %s6724_s24, %s6724_s24 }
  0x4d   :  { %p6731_p2 = por %p6730_p1, %p6729_p0 }
  0x4f   :  { %p6732_p3 = pnand %p6731_p2, %p6725_p13 }
  0x51   :  { %6735 = shalt.err (!%p6732_p3)
}
  0x52   :  { %s8089_s21 = smov 64   ;;  %s6736_s22 = scalar_lea.hbm %s8062_s9, 512 }
  0x53   :  { %74 = dma.hbm_to_vmem [thread:$0]  %s8060_s7, 512, %s69_s30, [#allocation6], %s8089_s21, %s8089_s21, %s6790_s29  }
  0x54   :  { %p6737_p4 = scmp.ne.s32.totalorder %s8062_s9, %s6736_s22  ;;  %p6740_p5 = scmp.lt.u32.totalorder %s6736_s22, %s8062_s9 }
  0x56   :  { %p6742_p6 = pnand %p6740_p5, %p6737_p4 }
  0x58   :  { %6745 = shalt.err (!%p6742_p6)
}
  0x59   :  { %s6746_s3 = scalar_lea.vmem %s93_s20, 512  ;;  %p6751_p8 = scmp.lt.s32.totalorder %s93_s20, %s93_s20 }
  0x5a   :  { %p6747_p7 = scmp.ne.s32.totalorder %s93_s20, %s6746_s3  ;;  %p6752_p9 = scmp.lt.s32.totalorder %s6746_s3, %s6746_s3 }
  0x5c   :  { %p6753_p10 = por %p6752_p9, %p6751_p8 }
  0x5e   :  { %p6754_p11 = pnand %p6753_p10, %p6747_p7 }
  0x60   :  { %6757 = shalt.err (!%p6754_p11)
}
  0x61   :  { %98 = dma.hbm_to_vmem [thread:$0]  %s8062_s9, 512, %s93_s20, [#allocation9], %s8089_s21, %s8089_s21, %s6790_s29  }
  0x62   :  { %6780 = dma.done.wait [#allocation3], 4096  }
  0x63   :  { %6781 = vsyncadd [#allocation3], 4294963200 }
  0x64   :  { %6782 = dma.done.wait [#allocation6], 1024  }
  0x65   :  { %6783 = vsyncadd [#allocation6], 4294966272 }
  0x66   :  { %6784 = dma.done.wait [#allocation9], 1024  }
  0x67   :  { %6785 = vsyncadd [#allocation9], 4294966272  ;;  %v6797_v0 = vmov 0   ;;  %s8090_s24 = sld [smem:[#allocation17_spill]]  ;;  %s8091_s6 = sld [smem:[#allocation16_spill]]  ;;  %v188_v5 = vld [vmem:[#allocation2 + $0x80] sm:$0xff]  ;;  %v139_v57 = vlaneseq }
  0x68   :  { %6463 = vset.pattern.permute.xlu1 %v6797_v0  ;;  %6462 = vset.pattern.permute.xlu0 %v6797_v0  ;;  %v189_v6 = vld [vmem:[#allocation2 + $0x88] sm:$0xff]  ;;  %v172_v8 = vld [vmem:[#allocation2] sm:$0xff]  ;;  %v190_v10 = vld [vmem:[#allocation2 + $0x90] sm:$0xff]  ;;  %s8092_s0 = sld [smem:[#allocation19_spill]]  ;;  %v6798_v41 = vmov 0.0   ;;  %vm206_vm0 = vcmask 130048  }
  0x69   :  { %v6408_v7 = vpack.c.bf16 %v189_v6, %v188_v5  ;;  %v173_v9 = vld [vmem:[#allocation2 + $0x8] sm:$0xff]  ;;  %v191_v12 = vld [vmem:[#allocation2 + $0x98] sm:$0xff]  ;;  %v174_v13 = vld [vmem:[#allocation2 + $0x10] sm:$0xff]  ;;  %v7011_v58 = vand.u32 127, %v139_v57  ;;  %v6799_v62 = vmov 1.0   ;;  %vm369_vm7 = vcmask 261120  }
  0x6a   :  { %v6410_v11 = vpack.c.bf16 %v173_v9, %v172_v8  ;;  %v175_v14 = vld [vmem:[#allocation2 + $0x18] sm:$0xff]  ;;  %v6412_v15 = vpack.c.bf16 %v191_v12, %v190_v10  ;;  %v192_v16 = vld [vmem:[#allocation2 + $0xa0] sm:$0xff]  ;;  %v193_v17 = vld [vmem:[#allocation2 + $0xa8] sm:$0xff]  ;;  %vm6800_vm8 = vmmov 0   ;;  %s8093_s7 = sld [smem:[#allocation20_spill]]  ;;  %s6801_s27 = smov 112  }
  0x6b   :  { %6409 = vmatprep.subr.bf16.mxu1 %v6408_v7  ;;  %v6414_v18 = vpack.c.bf16 %v175_v14, %v174_v13  ;;  %v6416_v19 = vpack.c.bf16 %v193_v17, %v192_v16  ;;  %v176_v20 = vld [vmem:[#allocation2 + $0x20] sm:$0xff]  ;;  %v177_v21 = vld [vmem:[#allocation2 + $0x28] sm:$0xff]  ;;  %v194_v22 = vld [vmem:[#allocation2 + $0xb0] sm:$0xff]  ;;  %v141_v59 = vadd.s32 128, %v7011_v58  ;;  %s6803_s8 = smov 104   ;;  %vm1502_vm13 = vcmask 64512  }
  0x6c   :  { %6411 = vmatpush3.bf16.msra.mxu1 %v6410_v11  ;;  %v195_v23 = vld [vmem:[#allocation2 + $0xb8] sm:$0xff]  ;;  %v6418_v24 = vpack.c.bf16 %v177_v21, %v176_v20  ;;  %v178_v25 = vld [vmem:[#allocation2 + $0x30] sm:$0xff]  ;;  %v196_v28 = vld [vmem:[#allocation2 + $0xc0] sm:$0xff]  ;;  %vm1986_vm15 = vcmask 1043456   ;;  %s6806_s28 = smov 16  }
  0x6d   :  { %v137_v1 = vld [vmem:[%s8090_s24] sm:$0xff]  ;;  %v138_v3 = vld [vmem:[%s8090_s24 + $0x8] sm:$0xff]  ;;  %6413 = vmatprep.subr.bf16.mxu1 %v6412_v15  ;;  %v6420_v26 = vpack.c.bf16 %v195_v23, %v194_v22  ;;  %v179_v27 = vld [vmem:[#allocation2 + $0x38] sm:$0xff]  ;;  %s6802_s24 = smov 120  }
  0x6e   :  { %v135_v2 = vld [vmem:[%s8091_s6] sm:$0xff]  ;;  %161 = vperm.xlu1 %6463, %v137_v1   ;;  %v136_v4 = vld [vmem:[%s8091_s6 + $0x8] sm:$0xff]  ;;  %v6422_v35 = vpack.c.bf16 %v179_v27, %v178_v25  ;;  %v198_v36 = vld [vmem:[#allocation2 + $0xd0] sm:$0xff]  ;;  %s6807_s6 = smov 24  }
  0x6f   :  { %143 = vperm.xlu0 %6462, %v135_v2   ;;  %v197_v29 = vld [vmem:[#allocation2 + $0xc8] sm:$0xff]  ;;  %v204_v30 = vld [vmem:[%s8092_s0] sm:$0xff]  ;;  %v199_v37 = vld [vmem:[#allocation2 + $0xd8] sm:$0xff] }
  0x70   :  { %6415 = vmatpush3.bf16.msra.mxu1 %v6414_v18  ;;  %v205_v31 = vld [vmem:[%s8092_s0 + $0x8] sm:$0xff]  ;;  %v180_v32 = vld [vmem:[#allocation2 + $0x40] sm:$0xff]  ;;  %v6424_v38 = vpack.c.bf16 %v197_v29, %v196_v28  ;;  %v182_v39 = vld [vmem:[#allocation2 + $0x50] sm:$0xff]  ;;  %v6428_v45 = vpack.c.bf16 %v199_v37, %v198_v36 }
  0x71   :  { %6417 = vmatprep.subr.bf16.mxu1 %v6416_v19  ;;  %v181_v33 = vld [vmem:[#allocation2 + $0x48] sm:$0xff]  ;;  %v6404_v34 = vpack.c.bf16 %v205_v31, %v204_v30  ;;  %v183_v40 = vld [vmem:[#allocation2 + $0x58] sm:$0xff]  ;;  %v200_v43 = vld [vmem:[#allocation2 + $0xe0] sm:$0xff] }
  0x72   :  { %164 = vperm.xlu1 %6463, %v138_v3   ;;  %v6426_v42 = vpack.c.bf16 %v181_v33, %v180_v32  ;;  %v201_v44 = vld [vmem:[#allocation2 + $0xe8] sm:$0xff]  ;;  %v184_v46 = vld [vmem:[#allocation2 + $0x60] sm:$0xff]  ;;  %v6430_v48 = vpack.c.bf16 %v183_v40, %v182_v39  ;;  %v202_v49 = vld [vmem:[#allocation2 + $0xf0] sm:$0xff] }
  0x73   :  { %146 = vperm.xlu0 %6462, %v136_v4   ;;  %6405 = vmatprep.subr.bf16.mxu0 %v6404_v34  ;;  %v185_v47 = vld [vmem:[#allocation2 + $0x68] sm:$0xff]  ;;  %v203_v50 = vld [vmem:[#allocation2 + $0xf8] sm:$0xff]  ;;  %v6432_v51 = vpack.c.bf16 %v201_v44, %v200_v43  ;;  %v186_v52 = vld [vmem:[#allocation2 + $0x70] sm:$0xff] }
  0x74   :  { %6419 = vmatpush3.bf16.msra.mxu1 %v6418_v24  ;;  %6407 = vmatpush3.bf16.msra.mxu0 %v6404_v34  ;;  %v187_v53 = vld [vmem:[#allocation2 + $0x78] sm:$0xff]  ;;  %v6434_v54 = vpack.c.bf16 %v185_v47, %v184_v46  ;;  %v6436_v55 = vpack.c.bf16 %v203_v50, %v202_v49  ;;  %v6495_v27 = vld [vmem:[#allocation5 + $0x8] sm:$0xff]   ;;  %v5773_v47 = vld [vmem:[%s8093_s7] ss:$0 sm:$0xff] }
  0x75   :  { %6421 = vmatprep.subr.bf16.mxu1 %v6420_v26  ;;  %6092 = vmatprep.subr.bf16.mxu0 %v6798_v41  ;;  %v6438_v56 = vpack.c.bf16 %v187_v53, %v186_v52  ;;  %v6494_v26 = vld [vmem:[#allocation5] sm:$0xff]  }
  0x78   :  { %6423 = vmatpush3.bf16.msra.mxu1 %v6422_v35 }
  0x79   :  { %6425 = vmatprep.subr.bf16.mxu1 %v6424_v38 }
  0x7c   :  { %6427 = vmatpush3.bf16.msra.mxu1 %v6426_v42 }
  0x7d   :  { %6429 = vmatprep.subr.bf16.mxu1 %v6428_v45 }
  0x80   :  { %6431 = vmatpush3.bf16.msra.mxu1 %v6430_v48 }
  0x81   :  { %6433 = vmatprep.subr.bf16.mxu1 %v6432_v51  ;;  %v5774_v51 = vld [vmem:[%s8058_s5] ss:$0 sm:$0xff] }
  0x84   :  { %6435 = vmatpush3.bf16.msra.mxu1 %v6434_v54 }
  0x85   :  { %6437 = vmatprep.subr.bf16.mxu1 %v6436_v55  ;;  %v6496_v55 = vld [vmem:[#allocation7] sm:$0xff]  }
  0x88   :  { %6439 = vmatpush3.bf16.msra.mxu1 %v6438_v56 }
  0x89   :  { %6134 = vmatprep.subr.bf16.mxu1 %v6798_v41 }
  0xed   :  { %v162_v60 = vpop.permute.xlu1 %161 }
  0xee   :  { %v144_v61 = vpop.permute.xlu0 %143  ;;  %vm166_vm1 = vcmp.eq.s32.totalorder %v7011_v58, %v162_v60  ;;  %v6498_v60 = vld [vmem:[#allocation8] sm:$0xff]  }
  0xef   :  { %vm149_vm2 = vcmp.eq.s32.totalorder %v141_v59, %v144_v61  ;;  %vm148_vm3 = vcmp.eq.s32.totalorder %v7011_v58, %v144_v61  ;;  %v5765_v63 = vsel %vm166_vm1, 1.0, %v6798_v41  ;;  %v6499_v61 = vld [vmem:[#allocation8 + $0x8] sm:$0xff]   ;;  %vm2652_vm1 = vcmask 195584  }
  0xf0   :  { %5769 = vmatprep.mubr.msk.f32.mxu1 %vm149_vm2, %v6799_v62  ;;  %6089 = vmatprep.mubr.msk.f32.mxu0 %vm206_vm0, %v5765_v63 }
  0xf1   :  { %5770 = vmatmul.mubr.msk.f32.vlgmr.msra.gmra.mrb[0].mxu1 %vm148_vm3, %v6799_v62  ;;  %v165_v1 = vpop.permute.xlu1 %164 }
  0xf2   :  { %v147_v2 = vpop.permute.xlu0 %146  ;;  %vm167_vm4 = vcmp.eq.s32.totalorder %v7011_v58, %v165_v1 }
  0xf3   :  { %vm150_vm5 = vcmp.eq.s32.totalorder %v7011_v58, %v147_v2  ;;  %vm151_vm6 = vcmp.eq.s32.totalorder %v141_v59, %v147_v2  ;;  %v5766_v3 = vsel %vm167_vm4, 1.0, %v6798_v41  ;;  %v6497_v59 = vld [vmem:[#allocation7 + $0x8] sm:$0xff]  }
  0xf4   :  { %5771 = vmatprep.mubr.msk.f32.mxu1 %vm151_vm6, %v6799_v62  ;;  %6090 = vmatmul.mubr.msk.f32.vlgmr.msra.gmra.mrb[0].mxu0 %vm206_vm0, %v5766_v3 }
  0xf5   :  { %5772 = vmatmul.mubr.msk.f32.gmra.mrb[2].mxu1 %vm150_vm5, %v6799_v62  ;;  %6096 = vmatprep.mubr.msk.bf16.mxu0 %vm6800_vm8, %v6798_v41 }
  0xf6   :  { %6136 = vmatprep.mubr.msk.bf16.mxu1 %vm6800_vm8, %v6798_v41  ;;  %6093 = vmatpush3.bf16.msra.mxu0 %v6494_v26 }
  0xf7   :  { %6094 = vmatprep.subr.bf16.mxu0 %v6798_v41 }
  0xfa   :  { %6095 = vmatpush3.bf16.msra.mxu0 %v6495_v27 }
  0xfb   :  { %6100 = vmatprep.subr.bf16.mxu0 %v6798_v41 }
 0x1c4   :  { %v5967_v4 = vpop.f32.mrb[0].mxu1 }
 0x1c5   :  { %v5968_v5 = vpop.f32.mrb[1].mxu1 }
 0x1c6   :  { %v5969_v6 = vadd.f32 %v5968_v5, %v5967_v4 }
 0x1c7   :  { %v6091_v7 = vpop.f32.mrb[0].mxu0 }
 0x1c8   :  { %v5970_v8 = vpop.f32.mrb[2].mxu1  ;;  %v279_v9 = vpop.f32.mrb[1].mxu0 }
 0x1c9   :  { %v5971_v10 = vpop.f32.mrb[3].mxu1  ;;  %v7022_v11 = vadd.f32 %v5969_v6, %v279_v9 }
 0x1ca   :  { %v5972_v12 = vadd.f32 %v5971_v10, %v5970_v8 }
 0x1cb   :  { %v370_v14 = vsel %vm369_vm7, %v7022_v11, 0.0 }
 0x1cc   :  { %v7024_v13 = vadd.f32 %v6091_v7, %v5972_v12  ;;  %371 = vadd.xlane.f32.xlu0 %v370_v14  ;;  %v6804_v12 = vmov 1983009808  }
 0x1cd   :  { %v625_v14 = vunpack.c.l.s4 %v6804_v12 }
 0x1ce   :  { %v373_v15 = vsel %vm369_vm7, %v7024_v13, 0.0 }
 0x1cf   :  { %374 = vadd.xlane.f32.xlu1 %v373_v15  ;;  %v6805_v15 = vmov 1934713408  }
 0x259   :  { %v372_v16 = vpop.xlane.xlu0 %371 }
 0x25a   :  { %v377_v17 = vmul.f32 0.03125, %v372_v16  ;;  %v657_v16 = vunpack.c.l.s4 %v6805_v15 }
 0x25c   :  { %v375_v18 = vpop.xlane.xlu1 %374  ;;  %v379_v19 = vsub.f32 %v7022_v11, %v377_v17  ;;  %v7093_v17 = vshrl.u32 %v139_v57, 7 }
 0x25d   :  { %v378_v20 = vmul.f32 0.03125, %v375_v18  ;;  %v626_v18 = vunpack.c.0.s8 %v625_v14 }
 0x25e   :  { %v381_v22 = vmul.f32 %v379_v19, %v379_v19  ;;  %vm365_vm14 = vcmp.gt.s32.totalorder %v7011_v58, %v7093_v17 }
 0x25f   :  { %v380_v21 = vsub.f32 %v7024_v13, %v378_v20 }
 0x260   :  { %v383_v23 = vsel %vm369_vm7, %v381_v22, 0.0  ;;  %v7096_v22 = vsub.s32 %v626_v18, %v7093_v17 }
 0x261   :  { %v382_v24 = vmul.f32 %v380_v21, %v380_v21  ;;  %384 = vadd.xlane.f32.xlu0 %v383_v23 }
 0x263   :  { %v386_v25 = vsel %vm369_vm7, %v382_v24, 0.0 }
 0x265   :  { %387 = vadd.xlane.f32.xlu0 %v386_v25 }
 0x2ee   :  { %v385_v28 = vpop.xlane.xlu0 %384 }
 0x2ef   :  { %v389_v29 = vmul.f32 0.03125, %v385_v28 }
 0x2f1   :  { %v391_v30 = vadd.f32 1e-05, %v389_v29 }
 0x2f2   :  { %v388_v31 = vpop.xlane.xlu0 %387 }
 0x2f3   :  { %6536 = vrsqrt.f32 %v391_v30  ;;  %v390_v32 = vmul.f32 0.03125, %v388_v31  ;;  %vm395_vm9 = vcmp.eq.f32.partialorder %v391_v30, inf  ;;  %v398_v36 = vand.u32 2147483648, %v391_v30 }
 0x2f4   :  { %vm397_vm10 = vcmp.eq.f32.partialorder %v391_v30, 0.0 }
 0x2f5   :  { %v392_v33 = vadd.f32 1e-05, %v390_v32 }
 0x2f7   :  { %6538 = vrsqrt.f32 %v392_v33  ;;  %vm402_vm11 = vcmp.eq.f32.partialorder %v392_v33, inf  ;;  %v405_v42 = vand.u32 2147483648, %v392_v33  ;;  %vm404_vm12 = vcmp.eq.f32.partialorder %v392_v33, 0.0 }
 0x2fd   :  { %v6537_v34 = vpop.eup %6536 }
 0x2fe   :  { %v394_v35 = vmul.f32 %v6537_v34, %v391_v30 }
 0x300   :  { %v396_v37 = vsel %vm395_vm9, %v391_v30, %v394_v35 }
 0x301   :  { %v399_v38 = vsel %vm397_vm10, %v398_v36, %v396_v37  ;;  %v6539_v39 = vpop.eup %6538 }
 0x302   :  { %6540 = vrcp.f32 %v399_v38  ;;  %v401_v40 = vmul.f32 %v6539_v39, %v392_v33 }
 0x304   :  { %v403_v43 = vsel %vm402_vm11, %v392_v33, %v401_v40 }
 0x305   :  { %v406_v44 = vsel %vm404_vm12, %v405_v42, %v403_v43 }
 0x306   :  { %6542 = vrcp.f32 %v406_v44 }
 0x30c   :  { %v6541_v45 = vpop.eup %6540 }
 0x30d   :  { %v408_v46 = vmul.f32 %v6541_v45, %v379_v19 }
 0x30f   :  { %v417_v50 = vmul.f32 %v5773_v47, %v408_v46 }
 0x310   :  { %v6543_v48 = vpop.eup %6542 }
 0x311   :  { %v410_v49 = vmul.f32 %v6543_v48, %v380_v21  ;;  %v425_v53 = vadd.f32 %v5774_v51, %v417_v50  ;;  %v658_v21 = vunpack.c.0.s8 %v657_v16 }
 0x313   :  { %v418_v52 = vmul.f32 %v5773_v47, %v410_v49  ;;  %v7099_v29 = vsub.s32 %v658_v21, %v7093_v17 }
 0x315   :  { %v426_v54 = vadd.f32 %v5774_v51, %v418_v52 }
 0x317   :  { %v427_v56 = vpack.c.bf16 %v426_v54, %v425_v53 }
 0x319   :  { %6097 = vmatmul.mubr.msk.bf16.vlgmr.msra.gmra.mrb[4].mxu0 %vm369_vm7, %v427_v56 }
 0x31a   :  { %6101 = vmatpush3.bf16.msra.mxu0 %v6496_v55  ;;  %6104 = vmatprep.mubr.msk.bf16.mxu0 %vm6800_vm8, %v6798_v41 }
 0x31b   :  { %6102 = vmatprep.subr.bf16.mxu0 %v6798_v41 }
 0x31e   :  { %6103 = vmatpush3.bf16.msra.mxu0 %v6497_v59 }
 0x31f   :  { %6108 = vmatprep.subr.bf16.mxu0 %v6798_v41 }
 0x321   :  { %6105 = vmatmul.mubr.msk.bf16.vlgmr.msra.gmra.mrb[8].mxu0 %vm369_vm7, %v427_v56 }
 0x322   :  { %6109 = vmatpush3.bf16.msra.mxu0 %v6498_v60  ;;  %6112 = vmatprep.mubr.msk.bf16.mxu0 %vm6800_vm8, %v6798_v41 }
 0x323   :  { %6110 = vmatprep.subr.bf16.mxu0 %v6798_v41 }
 0x326   :  { %6111 = vmatpush3.bf16.msra.mxu0 %v6499_v61 }
 0x327   :  { %6116 = vmatprep.subr.bf16.mxu0 %v6798_v41 }
 0x329   :  { %6113 = vmatmul.mubr.msk.bf16.vlgmr.msra.gmra.mrb[12].mxu0 %vm369_vm7, %v427_v56 }
 0x32a   :  { %6118 = vmatprep.mubr.msk.bf16.mxu0 %vm6800_vm8, %v6798_v41 }
 0x3ec   :  { %v7059_v62 = vpop.f32.mrb[4].mxu0 }
 0x3ed   :  { %v6098_v63 = vpop.f32.mrb[5].mxu0 }
 0x3ee   :  { %v7061_v1 = vpop.f32.mrb[6].mxu0 }
 0x3ef   :  { %v6099_v2 = vpop.f32.mrb[7].mxu0 }
 0x3f4   :  { %v538_v3 = vpop.f32.mrb[8].mxu0 }
 0x3f5   :  { %910 = vrot.lane.b32.xlu0 %v538_v3, %s6801_s27  ;;  %904 = vrot.lane.b32.xlu1 %v538_v3, %s6802_s24  ;;  %v6106_v4 = vpop.f32.mrb[9].mxu0 }
 0x3f6   :  { %v7065_v5 = vpop.f32.mrb[10].mxu0 }
 0x3f7   :  { %v6107_v6 = vpop.f32.mrb[11].mxu0 }
 0x3f9   :  { %610 = vrot.lane.b32.xlu0 %v7059_v62, %s6801_s27  ;;  %916 = vrot.lane.b32.xlu1 %v538_v3, %s6803_s8 }
 0x3fc   :  { %v7070_v7 = vpop.f32.mrb[12].mxu0 }
 0x3fd   :  { %604 = vrot.lane.b32.xlu1 %v7059_v62, %s6802_s24  ;;  %906 = vrot.lane.b32.xlu0 %v7065_v5, %s6802_s24  ;;  %v6114_v8 = vpop.f32.mrb[13].mxu0 }
 0x3fe   :  { %v7076_v9 = vpop.f32.mrb[14].mxu0 }
 0x3ff   :  { %v6115_v10 = vpop.f32.mrb[15].mxu0 }
 0x401   :  { %616 = vrot.lane.b32.xlu1 %v7059_v62, %s6803_s8  ;;  %918 = vrot.lane.b32.xlu0 %v7065_v5, %s6803_s8 }
 0x405   :  { %912 = vrot.lane.b32.xlu1 %v7065_v5, %s6801_s27  ;;  %612 = vrot.lane.b32.xlu0 %v7061_v1, %s6801_s27 }
 0x409   :  { %606 = vrot.lane.b32.xlu1 %v7061_v1, %s6802_s24 }
 0x40d   :  { %618 = vrot.lane.b32.xlu1 %v7061_v1, %s6803_s8 }
 0x411   :  { %1204 = vrot.lane.b32.xlu1 %v7070_v7, %s6802_s24 }
 0x467   :  { %v911_v19 = vpop.permute.xlu0 %910  ;;  %v905_v20 = vpop.permute.xlu1 %904 }
 0x468   :  { %v922_v23 = vcombine.low %v538_v3, %v911_v19  ;;  %v923_v24 = vcombine.high %v538_v3, %v911_v19 }
 0x46a   :  { %v930_v30 = vrot.slane %v922_v23, %v7096_v22  ;;  %v937_v57 = vrot.slane %v923_v24, %v7096_v22 }
 0x46b   :  { %v611_v25 = vpop.permute.xlu0 %610  ;;  %v917_v26 = vpop.permute.xlu1 %916 }
 0x46c   :  { %v938_v27 = vcombine.low %v905_v20, %v917_v26  ;;  %v939_v28 = vcombine.high %v905_v20, %v917_v26  ;;  %v622_v39 = vcombine.low %v7059_v62, %v611_v25  ;;  %v623_v40 = vcombine.high %v7059_v62, %v611_v25 }
 0x46e   :  { %v946_v31 = vrot.slane %v938_v27, %v7096_v22  ;;  %v953_v32 = vrot.slane %v939_v28, %v7096_v22  ;;  %v630_v55 = vrot.slane %v622_v39, %v7096_v22  ;;  %v637_v56 = vrot.slane %v623_v40, %v7096_v22 }
 0x46f   :  { %v605_v33 = vpop.permute.xlu1 %604  ;;  %v907_v34 = vpop.permute.xlu0 %906 }
 0x470   :  { %v954_v35 = vcombine.low %v930_v30, %v946_v31  ;;  %v955_v36 = vcombine.high %v930_v30, %v946_v31  ;;  %v970_v37 = vcombine.low %v937_v57, %v953_v32  ;;  %v971_v38 = vcombine.high %v937_v57, %v953_v32 }
 0x472   :  { %v962_v42 = vrot.slane %v954_v35, %v7099_v29  ;;  %v969_v43 = vrot.slane %v955_v36, %v7099_v29  ;;  %v978_v44 = vrot.slane %v970_v37, %v7099_v29  ;;  %v985_v45 = vrot.slane %v971_v38, %v7099_v29 }
 0x473   :  { %v617_v46 = vpop.permute.xlu1 %616  ;;  %v919_v47 = vpop.permute.xlu0 %918 }
 0x474   :  { %v1058_v48 = vcombine.low %v962_v42, %v969_v43  ;;  %v5788_v49 = vcombine.high %v962_v42, %v969_v43  ;;  %v1074_v50 = vcombine.low %v978_v44, %v985_v45  ;;  %v638_v51 = vcombine.low %v605_v33, %v617_v46 }
 0x475   :  { %v639_v52 = vcombine.high %v605_v33, %v617_v46  ;;  %v1006_v53 = vcombine.low %v907_v34, %v919_v47  ;;  %v1007_v54 = vcombine.high %v907_v34, %v919_v47  ;;  %v5789_v60 = vcombine.high %v978_v44, %v985_v45 }
 0x476   :  { %v7114_v59 = vrot.slane %v1058_v48, %v7096_v22  ;;  %v7117_v61 = vrot.slane %v5788_v49, %v7096_v22  ;;  %v7120_v62 = vrot.slane %v1074_v50, %v7096_v22  ;;  %v646_v63 = vrot.slane %v638_v51, %v7096_v22 }
 0x477   :  { %v653_v2 = vrot.slane %v639_v52, %v7096_v22  ;;  %v913_v3 = vpop.permute.xlu1 %912  ;;  %v613_v4 = vpop.permute.xlu0 %612  ;;  %v1014_v6 = vrot.slane %v1006_v53, %v7096_v22  ;;  %v1021_v8 = vrot.slane %v1007_v54, %v7096_v22  ;;  %v1089_v44 = vrot.slane %v5789_v60, %v7096_v22 }
 0x478   :  { %v990_v10 = vcombine.low %v7065_v5, %v913_v3  ;;  %v991_v12 = vcombine.high %v7065_v5, %v913_v3  ;;  %v654_v14 = vcombine.low %v630_v55, %v646_v63  ;;  %v655_v15 = vcombine.high %v630_v55, %v646_v63 }
 0x479   :  { %v670_v16 = vcombine.low %v637_v56, %v653_v2  ;;  %v671_v18 = vcombine.high %v637_v56, %v653_v2  ;;  %v690_v21 = vcombine.low %v7061_v1, %v613_v4  ;;  %v691_v23 = vcombine.high %v7061_v1, %v613_v4 }
 0x47a   :  { %v998_v19 = vrot.slane %v990_v10, %v7096_v22  ;;  %v1005_v20 = vrot.slane %v991_v12, %v7096_v22  ;;  %v662_v24 = vrot.slane %v654_v14, %v7099_v29  ;;  %v669_v25 = vrot.slane %v655_v15, %v7099_v29 }
 0x47b   :  { %v678_v26 = vrot.slane %v670_v16, %v7099_v29  ;;  %v685_v5 = vrot.slane %v671_v18, %v7099_v29  ;;  %v607_v27 = vpop.permute.xlu1 %606  ;;  %v698_v51 = vrot.slane %v690_v21, %v7096_v22  ;;  %v705_v52 = vrot.slane %v691_v23, %v7096_v22 }
 0x47c   :  { %v1022_v28 = vcombine.low %v998_v19, %v1014_v6  ;;  %v1023_v30 = vcombine.high %v998_v19, %v1014_v6  ;;  %v1038_v57 = vcombine.low %v1005_v20, %v1021_v8  ;;  %v1039_v31 = vcombine.high %v1005_v20, %v1021_v8 }
 0x47d   :  { %v758_v32 = vcombine.low %v662_v24, %v669_v25  ;;  %v5784_v33 = vcombine.high %v662_v24, %v669_v25  ;;  %v774_v34 = vcombine.low %v678_v26, %v685_v5  ;;  %v5785_v35 = vcombine.high %v678_v26, %v685_v5 }
 0x47e   :  { %v1030_v36 = vrot.slane %v1022_v28, %v7099_v29  ;;  %v1037_v1 = vrot.slane %v1023_v30, %v7099_v29  ;;  %v1046_v37 = vrot.slane %v1038_v57, %v7099_v29  ;;  %v1053_v38 = vrot.slane %v1039_v31, %v7099_v29 }
 0x47f   :  { %v765_v39 = vrot.slane %v758_v32, %v7096_v22  ;;  %v773_v40 = vrot.slane %v5784_v33, %v7096_v22  ;;  %v781_v42 = vrot.slane %v774_v34, %v7096_v22  ;;  %v789_v43 = vrot.slane %v5785_v35, %v7096_v22  ;;  %v619_v48 = vpop.permute.xlu1 %618 }
 0x480   :  { %v1126_v45 = vcombine.low %v1030_v36, %v1037_v1  ;;  %v5790_v46 = vcombine.high %v1030_v36, %v1037_v1  ;;  %v1142_v47 = vcombine.low %v1046_v37, %v1053_v38  ;;  %v5791_v56 = vcombine.high %v1046_v37, %v1053_v38 }
 0x481   :  { %v791_v49 = vcombine.high %v765_v39, %v773_v40  ;;  %v807_v50 = vcombine.high %v781_v42, %v789_v43  ;;  %v790_v53 = vcombine.low %v765_v39, %v773_v40  ;;  %v806_v54 = vcombine.low %v781_v42, %v789_v43 }
 0x482   :  { %v7148_v55 = vrot.slane %v1126_v45, %v7096_v22  ;;  %v7151_v63 = vrot.slane %v5790_v46, %v7096_v22  ;;  %v7154_v60 = vrot.slane %v1142_v47, %v7096_v22  ;;  %v706_v2 = vcombine.low %v607_v27, %v619_v48 }
 0x483   :  { %v707_v3 = vcombine.high %v607_v27, %v619_v48  ;;  %v1090_v4 = vcombine.low %v7114_v59, %v7117_v61  ;;  %v1106_v6 = vcombine.low %v7120_v62, %v1089_v44  ;;  %v1091_v8 = vcombine.high %v7114_v59, %v7117_v61 }
 0x484   :  { %v1107_v10 = vcombine.high %v7120_v62, %v1089_v44  ;;  %v7163_v12 = vrot.slane %v791_v49, %v7099_v29  ;;  %v7166_v14 = vrot.slane %v807_v50, %v7099_v29  ;;  %v714_v15 = vrot.slane %v706_v2, %v7096_v22 }
 0x485   :  { %v721_v16 = vrot.slane %v707_v3, %v7096_v22  ;;  %v1098_v18 = vrot.slane %v1090_v4, %v7099_v29  ;;  %v1114_v19 = vrot.slane %v1106_v6, %v7099_v29  ;;  %v1105_v20 = vrot.slane %v1091_v8, %v7099_v29 }
 0x486   :  { %v1121_v59 = vrot.slane %v1107_v10, %v7099_v29  ;;  %v722_v61 = vcombine.low %v698_v51, %v714_v15  ;;  %v723_v62 = vcombine.high %v698_v51, %v714_v15  ;;  %v798_v26 = vrot.slane %v790_v53, %v7099_v29 }
 0x487   :  { %v738_v21 = vcombine.low %v705_v52, %v721_v16  ;;  %v739_v23 = vcombine.high %v705_v52, %v721_v16  ;;  %v1122_v24 = vcombine.low %v1098_v18, %v1114_v19  ;;  %v814_v5 = vrot.slane %v806_v54, %v7099_v29 }
 0x488   :  { %v1125_v25 = vcombine.high %v1105_v20, %v1121_v59  ;;  %v730_v27 = vrot.slane %v722_v61, %v7099_v29  ;;  %v737_v28 = vrot.slane %v723_v62, %v7099_v29  ;;  %v825_v31 = vcombine.high %v7163_v12, %v7166_v14 }
 0x489   :  { %v746_v30 = vrot.slane %v738_v21, %v7099_v29  ;;  %v753_v57 = vrot.slane %v739_v23, %v7099_v29  ;;  %v1157_v32 = vrot.slane %v5791_v56, %v7096_v22  ;;  %v1194_v33 = vpack.c.bf16 %v1122_v24, %v1122_v24 }
 0x48a   :  { %v1197_v34 = vpack.c.bf16 %v1125_v25, %v1125_v25  ;;  %v826_v35 = vcombine.low %v730_v27, %v737_v28  ;;  %v5786_v36 = vcombine.high %v730_v27, %v737_v28  ;;  %v822_v40 = vcombine.low %v798_v26, %v814_v5 }
 0x48b   :  { %v842_v1 = vcombine.low %v746_v30, %v753_v57  ;;  %v5787_v37 = vcombine.high %v746_v30, %v753_v57  ;;  %v1507_v38 = vsel %vm1502_vm13, %v1194_v33, 0  ;;  %v1123_v42 = vcombine.high %v1098_v18, %v1114_v19 }
 0x48c   :  { %v1645_v39 = vsel %vm1502_vm13, %v1197_v34, 0  ;;  %v833_v43 = vrot.slane %v826_v35, %v7096_v22  ;;  %v841_v44 = vrot.slane %v5786_v36, %v7096_v22  ;;  %6117 = vmatpush3.bf16.xpose.msra.mxu0 %v1507_v38  ;;  %v1158_v47 = vcombine.low %v7148_v55, %v7151_v63 }
 0x48d   :  { %v849_v45 = vrot.slane %v842_v1, %v7096_v22  ;;  %v857_v46 = vrot.slane %v5787_v37, %v7096_v22  ;;  %6135 = vmatpush3.bf16.xpose.msra.mxu1 %v1645_v39  ;;  %6122 = vmatprep.subr.bf16.mxu0 %v6798_v41  ;;  %v1174_v48 = vcombine.low %v7154_v60, %v1157_v32  ;;  %v7246_v39 = vsel %vm365_vm14, -1e+30, %v6798_v41 }
 0x48e   :  { %v858_v49 = vcombine.low %v833_v43, %v841_v44  ;;  %6146 = vmatprep.subr.bf16.mxu1 %v6798_v41  ;;  %v894_v51 = vpack.c.bf16 %v822_v40, %v822_v40  ;;  %v1195_v52 = vpack.c.bf16 %v1123_v42, %v1123_v42  ;;  %v1166_v53 = vrot.slane %v1158_v47, %v7099_v29 }
 0x48f   :  { %v874_v50 = vcombine.low %v849_v45, %v857_v46  ;;  %v1182_v54 = vrot.slane %v1174_v48, %v7099_v29  ;;  %v897_v56 = vpack.c.bf16 %v825_v31, %v825_v31  ;;  %v1159_v2 = vcombine.high %v7148_v55, %v7151_v63 }
 0x490   :  { %v1175_v3 = vcombine.high %v7154_v60, %v1157_v32  ;;  %v866_v6 = vrot.slane %v858_v49, %v7099_v29  ;;  %v1553_v16 = vsel %vm1502_vm13, %v1195_v52, 0  ;;  %v1124_v19 = vcombine.low %v1105_v20, %v1121_v59 }
 0x491   :  { %v1191_v4 = vcombine.high %v1166_v53, %v1182_v54  ;;  %v882_v8 = vrot.slane %v874_v50, %v7099_v29  ;;  %v1173_v10 = vrot.slane %v1159_v2, %v7099_v29  ;;  %v823_v63 = vcombine.high %v798_v26, %v814_v5 }
 0x492   :  { %v1189_v15 = vrot.slane %v1175_v3, %v7099_v29  ;;  %v859_v62 = vcombine.high %v833_v43, %v841_v44  ;;  %v875_v21 = vcombine.high %v849_v45, %v857_v46  ;;  %v1196_v20 = vpack.c.bf16 %v1124_v19, %v1124_v19 }
 0x493   :  { %6119 = vmatmul.mubr.msk.bf16.vlgmr.msra.gmra.mrb[16].mxu0 %vm1502_vm13, %v894_v51  ;;  %v1199_v18 = vpack.c.bf16 %v1191_v4, %v1191_v4  ;;  %v891_v60 = vcombine.high %v866_v6, %v882_v8  ;;  %v895_v59 = vpack.c.bf16 %v823_v63, %v823_v63  ;;  %v1190_v26 = vcombine.low %v1166_v53, %v1182_v54 }
 0x494   :  { %6137 = vmatmul.mubr.msk.bf16.vlgmr.msra.gmra.mrb[4].mxu1 %vm1502_vm13, %v897_v56  ;;  %6123 = vmatpush3.bf16.xpose.msra.mxu0 %v1553_v16  ;;  %v1193_v61 = vcombine.high %v1173_v10, %v1189_v15  ;;  %v1599_v25 = vsel %vm1502_vm13, %v1196_v20, 0  ;;  %v873_v5 = vrot.slane %v859_v62, %v7099_v29  ;;  %v889_v27 = vrot.slane %v875_v21, %v7099_v29 }
 0x495   :  { %v1737_v55 = vsel %vm1502_vm13, %v1199_v18, 0  ;;  %6124 = vmatprep.mubr.msk.bf16.mxu0 %vm6800_vm8, %v6798_v41  ;;  %6128 = vmatprep.subr.bf16.mxu0 %v6798_v41  ;;  %v899_v23 = vpack.c.bf16 %v891_v60, %v891_v60  ;;  %v824_v30 = vcombine.low %v7163_v12, %v7166_v14  ;;  %v1198_v57 = vpack.c.bf16 %v1190_v26, %v1190_v26 }
 0x496   :  { %6147 = vmatpush3.bf16.xpose.msra.mxu1 %v1737_v55  ;;  %6148 = vmatprep.mubr.msk.bf16.mxu1 %vm6800_vm8, %v6798_v41  ;;  %v1201_v24 = vpack.c.bf16 %v1193_v61, %v1193_v61  ;;  %v893_v31 = vcombine.high %v873_v5, %v889_v27  ;;  %v1192_v35 = vcombine.low %v1173_v10, %v1189_v15 }
 0x497   :  { %6158 = vmatprep.subr.bf16.mxu1 %v6798_v41  ;;  %v896_v32 = vpack.c.bf16 %v824_v30, %v824_v30  ;;  %v1691_v33 = vsel %vm1502_vm13, %v1198_v57, 0  ;;  %v890_v12 = vcombine.low %v866_v6, %v882_v8  ;;  %v892_v37 = vcombine.low %v873_v5, %v889_v27 }
 0x498   :  { %v1829_v28 = vsel %vm1502_vm13, %v1201_v24, 0  ;;  %v901_v34 = vpack.c.bf16 %v893_v31, %v893_v31  ;;  %v1200_v14 = vpack.c.bf16 %v1192_v35, %v1192_v35 }
 0x499   :  { %v898_v36 = vpack.c.bf16 %v890_v12, %v890_v12  ;;  %v900_v38 = vpack.c.bf16 %v892_v37, %v892_v37 }
 0x49a   :  { %v1783_v1 = vsel %vm1502_vm13, %v1200_v14, 0 }
 0x49b   :  { %6125 = vmatmul.mubr.msk.bf16.vlgmr.msra.gmra.mrb[20].mxu0 %vm1502_vm13, %v895_v59 }
 0x49c   :  { %6129 = vmatpush3.bf16.xpose.msra.mxu0 %v1599_v25  ;;  %6130 = vmatprep.mubr.msk.bf16.mxu0 %vm6800_vm8, %v6798_v41 }
 0x49d   :  { %6149 = vmatmul.mubr.msk.bf16.vlgmr.msra.gmra.mrb[8].mxu1 %vm1502_vm13, %v899_v23  ;;  %6140 = vmatprep.subr.bf16.mxu0 %v6798_v41 }
 0x49e   :  { %6159 = vmatpush3.bf16.xpose.msra.mxu1 %v1829_v28  ;;  %6160 = vmatprep.mubr.msk.bf16.mxu1 %vm6800_vm8, %v6798_v41 }
 0x49f   :  { %6170 = vmatprep.subr.bf16.mxu1 %v6798_v41 }
 0x4a3   :  { %6131 = vmatmul.mubr.msk.bf16.vlgmr.msra.gmra.mrb[24].mxu0 %vm1502_vm13, %v896_v32 }
 0x4a4   :  { %6141 = vmatpush3.bf16.xpose.msra.mxu0 %v1691_v33  ;;  %6142 = vmatprep.mubr.msk.bf16.mxu0 %vm6800_vm8, %v6798_v41 }
 0x4a5   :  { %6161 = vmatmul.mubr.msk.bf16.vlgmr.msra.gmra.mrb[12].mxu1 %vm1502_vm13, %v901_v34  ;;  %6152 = vmatprep.subr.bf16.mxu0 %v6798_v41 }
 0x4a6   :  { %6172 = vmatprep.mubr.msk.bf16.mxu1 %vm6800_vm8, %v6798_v41 }
 0x4ab   :  { %6143 = vmatmul.mubr.msk.bf16.vlgmr.msra.gmra.mrb[28].mxu0 %vm1502_vm13, %v898_v36 }
 0x4ac   :  { %6153 = vmatpush3.bf16.xpose.msra.mxu0 %v1783_v1  ;;  %6154 = vmatprep.mubr.msk.bf16.mxu0 %vm6800_vm8, %v6798_v41 }
 0x4ad   :  { %6164 = vmatprep.subr.bf16.mxu0 %v6798_v41 }
 0x4b3   :  { %6155 = vmatmul.mubr.msk.bf16.vlgmr.msra.gmra.mrb[32].mxu0 %vm1502_vm13, %v900_v38 }
 0x4b4   :  { %6166 = vmatprep.mubr.msk.bf16.mxu0 %vm6800_vm8, %v6798_v41 }
 0x566   :  { %v1543_v40 = vpop.f32.mrb[16].mxu0 }
 0x567   :  { %v1871_v42 = vmul.f32 0.35355338, %v1543_v40  ;;  %v1681_v43 = vpop.f32.mrb[4].mxu1  ;;  %v6120_v44 = vpop.f32.mrb[17].mxu0 }
 0x568   :  { %v1874_v45 = vmul.f32 0.35355338, %v1681_v43  ;;  %v6138_v46 = vpop.f32.mrb[5].mxu1  ;;  %v1546_v47 = vpop.f32.mrb[18].mxu0 }
 0x569   :  { %v1684_v48 = vpop.f32.mrb[6].mxu1  ;;  %v6121_v49 = vpop.f32.mrb[19].mxu0  ;;  %v1879_v50 = vadd.f32 %v1871_v42, %v7246_v39 }
 0x56a   :  { %v6139_v51 = vpop.f32.mrb[7].mxu1  ;;  %v1882_v53 = vadd.f32 %v1874_v45, %v7246_v39  ;;  %v1205_v45 = vpop.permute.xlu1 %1204 }
 0x56b   :  { %v1887_v52 = vsel %vm1502_vm13, %v1879_v50, -inf }
 0x56c   :  { %1888 = vmax.xlane.f32.xlu0 %v1887_v52  ;;  %v1896_v56 = vsel %vm1502_vm13, %v1882_v53, -inf }
 0x56e   :  { %v1589_v58 = vpop.f32.mrb[20].mxu0 }
 0x56f   :  { %v1872_v17 = vmul.f32 0.35355338, %v1589_v58  ;;  %v6126_v54 = vpop.f32.mrb[21].mxu0 }
 0x570   :  { %1897 = vmax.xlane.f32.xlu0 %v1896_v56  ;;  %v1592_v2 = vpop.f32.mrb[22].mxu0  ;;  %v1773_v3 = vpop.f32.mrb[8].mxu1 }
 0x571   :  { %v6127_v4 = vpop.f32.mrb[23].mxu0  ;;  %v1876_v6 = vmul.f32 0.35355338, %v1773_v3  ;;  %v6150_v8 = vpop.f32.mrb[9].mxu1  ;;  %v1880_v10 = vadd.f32 %v1872_v17, %v7246_v39 }
 0x572   :  { %v1776_v15 = vpop.f32.mrb[10].mxu1 }
 0x573   :  { %v1890_v16 = vsel %vm1502_vm13, %v1880_v10, -inf  ;;  %v6151_v18 = vpop.f32.mrb[11].mxu1  ;;  %v1884_v19 = vadd.f32 %v1876_v6, %v7246_v39 }
 0x574   :  { %1891 = vmax.xlane.f32.xlu1 %v1890_v16 }
 0x575   :  { %v1902_v55 = vsel %vm1502_vm13, %v1884_v19, -inf }
 0x576   :  { %v1635_v63 = vpop.f32.mrb[24].mxu0  ;;  %1903 = vmax.xlane.f32.xlu0 %v1902_v55 }
 0x577   :  { %v1873_v60 = vmul.f32 0.35355338, %v1635_v63  ;;  %v6132_v61 = vpop.f32.mrb[25].mxu0 }
 0x578   :  { %v1638_v62 = vpop.f32.mrb[26].mxu0  ;;  %v1865_v21 = vpop.f32.mrb[12].mxu1 }
 0x579   :  { %v6133_v20 = vpop.f32.mrb[27].mxu0  ;;  %v1878_v59 = vmul.f32 0.35355338, %v1865_v21  ;;  %v6162_v23 = vpop.f32.mrb[13].mxu1  ;;  %v1881_v24 = vadd.f32 %v1873_v60, %v7246_v39 }
 0x57a   :  { %v1868_v25 = vpop.f32.mrb[14].mxu1 }
 0x57b   :  { %v1893_v26 = vsel %vm1502_vm13, %v1881_v24, -inf  ;;  %v6163_v5 = vpop.f32.mrb[15].mxu1  ;;  %v7259_v27 = vadd.f32 %v1878_v59, %v7246_v39 }
 0x57c   :  { %1894 = vmax.xlane.f32.xlu0 %v1893_v26 }
 0x57d   :  { %v1908_v28 = vsel %vm1502_vm13, %v7259_v27, -inf }
 0x57e   :  { %v1727_v30 = vpop.f32.mrb[28].mxu0 }
 0x57f   :  { %v1875_v57 = vmul.f32 0.35355338, %v1727_v30  ;;  %v6144_v31 = vpop.f32.mrb[29].mxu0 }
 0x580   :  { %1909 = vmax.xlane.f32.xlu0 %v1908_v28  ;;  %v1730_v32 = vpop.f32.mrb[30].mxu0 }
 0x581   :  { %v6145_v33 = vpop.f32.mrb[31].mxu0  ;;  %v1883_v34 = vadd.f32 %v1875_v57, %v7246_v39 }
 0x583   :  { %v1899_v35 = vsel %vm1502_vm13, %v1883_v34, -inf }
 0x584   :  { %1900 = vmax.xlane.f32.xlu1 %v1899_v35 }
 0x586   :  { %v1819_v12 = vpop.f32.mrb[32].mxu0 }
 0x587   :  { %v1877_v14 = vmul.f32 0.35355338, %v1819_v12  ;;  %v6156_v36 = vpop.f32.mrb[33].mxu0 }
 0x588   :  { %v1822_v1 = vpop.f32.mrb[34].mxu0 }
 0x589   :  { %v6157_v37 = vpop.f32.mrb[35].mxu0  ;;  %v7266_v38 = vadd.f32 %v1877_v14, %v7246_v39 }
 0x58b   :  { %v1905_v40 = vsel %vm1502_vm13, %v7266_v38, -inf }
 0x58c   :  { %1906 = vmax.xlane.f32.xlu1 %v1905_v40 }
 0x596   :  { %1210 = vrot.lane.b32.xlu0 %v7070_v7, %s6801_s27 }
 0x59d   :  { %1216 = vrot.lane.b32.xlu1 %v7070_v7, %s6803_s8 }
 0x5f9   :  { %v1889_v42 = vpop.xlane.xlu0 %1888 }
 0x5fa   :  { %v1911_v43 = vsub.f32 %v1879_v50, %v1889_v42 }
 0x5fc   :  { %v1919_v44 = vmul.f32 1.442695, %v1911_v43 }
 0x5fd   :  { %v1898_v46 = vpop.xlane.xlu0 %1897 }
 0x5fe   :  { %6544 = vpow2.f32 %v1919_v44  ;;  %v1914_v47 = vsub.f32 %v1882_v53, %v1898_v46 }
 0x600   :  { %v1925_v48 = vmul.f32 1.442695, %v1914_v47 }
 0x601   :  { %v1892_v49 = vpop.xlane.xlu1 %1891 }
 0x602   :  { %6546 = vpow2.f32 %v1925_v48  ;;  %v1912_v51 = vsub.f32 %v1880_v10, %v1892_v49 }
 0x603   :  { %v1904_v52 = vpop.xlane.xlu0 %1903 }
 0x604   :  { %v1921_v58 = vmul.f32 1.442695, %v1912_v51  ;;  %v1916_v17 = vsub.f32 %v1884_v19, %v1904_v52 }
 0x606   :  { %6548 = vpow2.f32 %v1921_v58  ;;  %v1929_v54 = vmul.f32 1.442695, %v1916_v17 }
 0x608   :  { %v7274_v56 = vpop.eup %6544  ;;  %6550 = vpow2.f32 %v1929_v54 }
 0x609   :  { %v1895_v2 = vpop.xlane.xlu0 %1894  ;;  %v1935_v50 = vsel %vm1502_vm13, %v7274_v56, 0.0 }
 0x60a   :  { %v1913_v3 = vsub.f32 %v1881_v24, %v1895_v2  ;;  %1936 = vadd.xlane.f32.xlu1 %v1935_v50 }
 0x60c   :  { %v7278_v4 = vpop.eup %6546  ;;  %v1923_v53 = vmul.f32 1.442695, %v1913_v3 }
 0x60d   :  { %v1944_v6 = vsel %vm1502_vm13, %v7278_v4, 0.0  ;;  %v7288_v19 = vpop.xlane.xlu0 %1909 }
 0x60e   :  { %6552 = vpow2.f32 %v1923_v53  ;;  %1945 = vadd.xlane.f32.xlu0 %v1944_v6 }
 0x610   :  { %v7282_v8 = vpop.eup %6548 }
 0x611   :  { %v1901_v10 = vpop.xlane.xlu1 %1900  ;;  %v1938_v15 = vsel %vm1502_vm13, %v7282_v8, 0.0  ;;  %v1211_v61 = vpop.permute.xlu0 %1210 }
 0x612   :  { %v7286_v16 = vpop.eup %6550  ;;  %v1915_v18 = vsub.f32 %v1883_v34, %v1901_v10  ;;  %1939 = vadd.xlane.f32.xlu0 %v1938_v15  ;;  %v1222_v20 = vcombine.low %v7070_v7, %v1211_v61  ;;  %v1223_v59 = vcombine.high %v7070_v7, %v1211_v61 }
 0x613   :  { %v1950_v55 = vsel %vm1502_vm13, %v7286_v16, 0.0 }
 0x614   :  { %v1927_v63 = vmul.f32 1.442695, %v1915_v18  ;;  %1951 = vadd.xlane.f32.xlu1 %v1950_v55  ;;  %v1230_v5 = vrot.slane %v1222_v20, %v7096_v22  ;;  %v1237_v28 = vrot.slane %v1223_v59, %v7096_v22  ;;  %v1918_v55 = vsub.f32 %v7259_v27, %v7288_v19 }
 0x616   :  { %6554 = vpow2.f32 %v1927_v63  ;;  %v1933_v63 = vmul.f32 1.442695, %v1918_v55 }
 0x618   :  { %v7292_v60 = vpop.eup %6552  ;;  %6556 = vpow2.f32 %v1933_v63 }
 0x619   :  { %v1907_v62 = vpop.xlane.xlu1 %1906  ;;  %v1941_v21 = vsel %vm1502_vm13, %v7292_v60, 0.0 }
 0x61a   :  { %1942 = vadd.xlane.f32.xlu1 %v1941_v21  ;;  %v1917_v61 = vsub.f32 %v7266_v38, %v1907_v62 }
 0x61c   :  { %v1931_v21 = vmul.f32 1.442695, %v1917_v61 }
 0x61d   :  { %v1217_v23 = vpop.permute.xlu1 %1216 }
 0x61e   :  { %v1238_v24 = vcombine.low %v1205_v45, %v1217_v23  ;;  %v1239_v25 = vcombine.high %v1205_v45, %v1217_v23  ;;  %6558 = vpow2.f32 %v1931_v21 }
 0x620   :  { %v7298_v26 = vpop.eup %6554  ;;  %v1246_v30 = vrot.slane %v1238_v24, %v7096_v22  ;;  %v1253_v57 = vrot.slane %v1239_v25, %v7096_v22 }
 0x621   :  { %v1947_v31 = vsel %vm1502_vm13, %v7298_v26, 0.0 }
 0x622   :  { %v1254_v32 = vcombine.low %v1230_v5, %v1246_v30  ;;  %v1255_v33 = vcombine.high %v1230_v5, %v1246_v30  ;;  %v1270_v34 = vcombine.low %v1237_v28, %v1253_v57  ;;  %v1271_v7 = vcombine.high %v1237_v28, %v1253_v57  ;;  %1948 = vadd.xlane.f32.xlu0 %v1947_v31  ;;  %v7331_v20 = vpop.eup %6556 }
 0x623   :  { %v1956_v59 = vsel %vm1502_vm13, %v7331_v20, 0.0 }
 0x624   :  { %v1262_v35 = vrot.slane %v1254_v32, %v7099_v29  ;;  %v1269_v12 = vrot.slane %v1255_v33, %v7099_v29  ;;  %v1278_v14 = vrot.slane %v1270_v34, %v7099_v29  ;;  %v1285_v36 = vrot.slane %v1271_v7, %v7099_v29 }
 0x626   :  { %v1358_v1 = vcombine.low %v1262_v35, %v1269_v12  ;;  %v5792_v37 = vcombine.high %v1262_v35, %v1269_v12  ;;  %v1374_v40 = vcombine.low %v1278_v14, %v1285_v36  ;;  %v5793_v42 = vcombine.high %v1278_v14, %v1285_v36 }
 0x628   :  { %v1365_v43 = vrot.slane %v1358_v1, %v7096_v22  ;;  %v1373_v44 = vrot.slane %v5792_v37, %v7096_v22  ;;  %v1381_v45 = vrot.slane %v1374_v40, %v7096_v22  ;;  %v1389_v46 = vrot.slane %v5793_v42, %v7096_v22  ;;  %v7335_v23 = vpop.eup %6558 }
 0x629   :  { %v1953_v24 = vsel %vm1502_vm13, %v7335_v23, 0.0 }
 0x62a   :  { %v1390_v47 = vcombine.low %v1365_v43, %v1373_v44  ;;  %v1406_v48 = vcombine.low %v1381_v45, %v1389_v46  ;;  %v1391_v49 = vcombine.high %v1365_v43, %v1373_v44  ;;  %v1407_v51 = vcombine.high %v1381_v45, %v1389_v46 }
 0x62b   :  { %1212 = vrot.lane.b32.xlu1 %v7076_v9, %s6801_s27 }
 0x62c   :  { %v1398_v52 = vrot.slane %v1390_v47, %v7099_v29  ;;  %v1414_v58 = vrot.slane %v1406_v48, %v7099_v29  ;;  %v1405_v17 = vrot.slane %v1391_v49, %v7099_v29  ;;  %v1421_v54 = vrot.slane %v1407_v51, %v7099_v29 }
 0x62e   :  { %v1422_v2 = vcombine.low %v1398_v52, %v1414_v58  ;;  %v1423_v50 = vcombine.high %v1398_v52, %v1414_v58  ;;  %v1424_v3 = vcombine.low %v1405_v17, %v1421_v54  ;;  %v1425_v53 = vcombine.high %v1405_v17, %v1421_v54 }
 0x62f   :  { %1218 = vrot.lane.b32.xlu1 %v7076_v9, %s6803_s8 }
 0x630   :  { %v1494_v6 = vpack.c.bf16 %v1422_v2, %v1422_v2  ;;  %v1495_v10 = vpack.c.bf16 %v1423_v50, %v1423_v50  ;;  %v1496_v28 = vpack.c.bf16 %v1424_v3, %v1424_v3  ;;  %v1497_v34 = vpack.c.bf16 %v1425_v53, %v1425_v53 }
 0x632   :  { %v1988_v15 = vsel %vm1986_vm15, %v1494_v6, 0  ;;  %v2034_v18 = vsel %vm1986_vm15, %v1495_v10, 0  ;;  %v2080_v57 = vsel %vm1986_vm15, %v1496_v28, 0  ;;  %v2126_v14 = vsel %vm1986_vm15, %v1497_v34, 0 }
 0x633   :  { %6165 = vmatpush3.bf16.msra.mxu0 %v1988_v15  ;;  %6171 = vmatpush3.bf16.msra.mxu1 %v2034_v18 }
 0x634   :  { %6176 = vmatprep.subr.bf16.mxu0 %v6798_v41  ;;  %6182 = vmatprep.subr.bf16.mxu1 %v6798_v41 }
 0x638   :  { %1206 = vrot.lane.b32.xlu0 %v7076_v9, %s6802_s24 }
 0x653   :  { %1957 = vadd.xlane.f32.xlu1 %v1956_v59 }
 0x657   :  { %1954 = vadd.xlane.f32.xlu0 %v1953_v24 }
 0x697   :  { %v1937_v25 = vpop.xlane.xlu1 %1936 }
 0x698   :  { %6560 = vrcp.f32 %v1937_v25 }
 0x69b   :  { %v1946_v27 = vpop.xlane.xlu0 %1945 }
 0x69f   :  { %v1940_v19 = vpop.xlane.xlu0 %1939 }
 0x6a0   :  { %6562 = vrcp.f32 %v1940_v19 }
 0x6a1   :  { %v1952_v38 = vpop.xlane.xlu1 %1951  ;;  %6564 = vrcp.f32 %v1946_v27 }
 0x6a2   :  { %v6561_v62 = vpop.eup %6560 }
 0x6a3   :  { %v1967_v5 = vmul.f32 %v6561_v62, %v7274_v56 }
 0x6a5   :  { %v1975_v30 = vpack.c.bf16 %v1967_v5, %v1967_v5 }
 0x6a7   :  { %6167 = vmatmul.mubr.msk.bf16.vlgmr.msra.gmra.mrb[36].mxu0 %vm1502_vm13, %v1975_v30  ;;  %v1943_v31 = vpop.xlane.xlu1 %1942 }
 0x6a8   :  { %6177 = vmatpush3.bf16.msra.mxu0 %v2080_v57  ;;  %6566 = vrcp.f32 %v1943_v31  ;;  %6178 = vmatprep.mubr.msk.bf16.mxu0 %vm6800_vm8, %v6798_v41 }
 0x6a9   :  { %6188 = vmatprep.subr.bf16.mxu0 %v6798_v41  ;;  %6568 = vrcp.f32 %v1952_v38 }
 0x6aa   :  { %v6563_v32 = vpop.eup %6562 }
 0x6ab   :  { %v1968_v33 = vmul.f32 %v6563_v32, %v7282_v8  ;;  %v1213_v56 = vpop.permute.xlu1 %1212  ;;  %v6565_v35 = vpop.eup %6564 }
 0x6ac   :  { %v1970_v36 = vmul.f32 %v6565_v35, %v7278_v4  ;;  %v1290_v8 = vcombine.low %v7076_v9, %v1213_v56  ;;  %v1291_v37 = vcombine.high %v7076_v9, %v1213_v56 }
 0x6ad   :  { %v1976_v7 = vpack.c.bf16 %v1968_v33, %v1968_v33 }
 0x6ae   :  { %v1978_v47 = vpack.c.bf16 %v1970_v36, %v1970_v36  ;;  %v1298_v48 = vrot.slane %v1290_v8, %v7096_v22  ;;  %v1305_v49 = vrot.slane %v1291_v37, %v7096_v22 }
 0x6af   :  { %v1949_v12 = vpop.xlane.xlu0 %1948  ;;  %6173 = vmatmul.mubr.msk.bf16.vlgmr.msra.gmra.mrb[16].mxu1 %vm1502_vm13, %v1976_v7  ;;  %v1219_v42 = vpop.permute.xlu1 %1218 }
 0x6b0   :  { %6183 = vmatpush3.bf16.msra.mxu1 %v2126_v14  ;;  %6184 = vmatprep.mubr.msk.bf16.mxu1 %vm6800_vm8, %v6798_v41  ;;  %6570 = vrcp.f32 %v1949_v12 }
 0x6b1   :  { %6194 = vmatprep.subr.bf16.mxu1 %v6798_v41 }
 0x6b2   :  { %v6567_v1 = vpop.eup %6566 }
 0x6b3   :  { %v1969_v40 = vmul.f32 %v6567_v1, %v7292_v60  ;;  %v1207_v43 = vpop.permute.xlu0 %1206  ;;  %v6569_v25 = vpop.eup %6568 }
 0x6b4   :  { %v1306_v44 = vcombine.low %v1207_v43, %v1219_v42  ;;  %v1307_v45 = vcombine.high %v1207_v43, %v1219_v42  ;;  %v1972_v32 = vmul.f32 %v6569_v25, %v7286_v16 }
 0x6b5   :  { %v1977_v46 = vpack.c.bf16 %v1969_v40, %v1969_v40 }
 0x6b6   :  { %v1314_v4 = vrot.slane %v1306_v44, %v7096_v22  ;;  %v1321_v51 = vrot.slane %v1307_v45, %v7096_v22  ;;  %v1980_v1 = vpack.c.bf16 %v1972_v32, %v1972_v32 }
 0x6b7   :  { %6179 = vmatmul.mubr.msk.bf16.vlgmr.msra.gmra.mrb[40].mxu0 %vm1502_vm13, %v1977_v46  ;;  %6185 = vmatmul.mubr.msk.bf16.vlgmr.msra.gmra.mrb[20].mxu1 %vm1502_vm13, %v1978_v47 }
 0x6b8   :  { %v1322_v9 = vcombine.low %v1298_v48, %v1314_v4  ;;  %v1323_v60 = vcombine.high %v1298_v48, %v1314_v4  ;;  %v1338_v52 = vcombine.low %v1305_v49, %v1321_v51  ;;  %v1339_v58 = vcombine.high %v1305_v49, %v1321_v51  ;;  %6190 = vmatprep.mubr.msk.bf16.mxu0 %vm6800_vm8, %v6798_v41 }
 0x6b9   :  { %6196 = vmatprep.mubr.msk.bf16.mxu1 %vm6800_vm8, %v6798_v41 }
 0x6ba   :  { %v1330_v17 = vrot.slane %v1322_v9, %v7099_v29  ;;  %v1337_v54 = vrot.slane %v1323_v60, %v7099_v29  ;;  %v1346_v2 = vrot.slane %v1338_v52, %v7099_v29  ;;  %v1353_v50 = vrot.slane %v1339_v58, %v7099_v29  ;;  %v6571_v5 = vpop.eup %6570 }
 0x6bb   :  { %v1971_v33 = vmul.f32 %v6571_v5, %v7298_v26 }
 0x6bc   :  { %v1426_v3 = vcombine.low %v1330_v17, %v1337_v54  ;;  %v5794_v53 = vcombine.high %v1330_v17, %v1337_v54  ;;  %v1442_v6 = vcombine.low %v1346_v2, %v1353_v50  ;;  %v5795_v10 = vcombine.high %v1346_v2, %v1353_v50 }
 0x6bd   :  { %v1979_v36 = vpack.c.bf16 %v1971_v33, %v1971_v33 }
 0x6be   :  { %v1433_v15 = vrot.slane %v1426_v3, %v7096_v22  ;;  %v1441_v18 = vrot.slane %v5794_v53, %v7096_v22  ;;  %v1449_v55 = vrot.slane %v1442_v6, %v7096_v22  ;;  %v1457_v63 = vrot.slane %v5795_v10, %v7096_v22 }
 0x6c0   :  { %v1458_v61 = vcombine.low %v1433_v15, %v1441_v18  ;;  %v1474_v21 = vcombine.low %v1449_v55, %v1457_v63  ;;  %v1459_v59 = vcombine.high %v1433_v15, %v1441_v18  ;;  %v1475_v24 = vcombine.high %v1449_v55, %v1457_v63 }
 0x6c2   :  { %v1466_v27 = vrot.slane %v1458_v61, %v7099_v29  ;;  %v1482_v19 = vrot.slane %v1474_v21, %v7099_v29  ;;  %v1473_v38 = vrot.slane %v1459_v59, %v7099_v29  ;;  %v1489_v62 = vrot.slane %v1475_v24, %v7099_v29 }
 0x6c4   :  { %v1490_v28 = vcombine.low %v1466_v27, %v1482_v19  ;;  %v1491_v30 = vcombine.high %v1466_v27, %v1482_v19  ;;  %v1492_v57 = vcombine.low %v1473_v38, %v1489_v62  ;;  %v1493_v31 = vcombine.high %v1473_v38, %v1489_v62 }
 0x6c6   :  { %v1498_v34 = vpack.c.bf16 %v1490_v28, %v1490_v28  ;;  %v1499_v56 = vpack.c.bf16 %v1491_v30, %v1491_v30  ;;  %v1500_v12 = vpack.c.bf16 %v1492_v57, %v1492_v57  ;;  %v1501_v14 = vpack.c.bf16 %v1493_v31, %v1493_v31 }
 0x6c8   :  { %v2172_v7 = vsel %vm1986_vm15, %v1498_v34, 0  ;;  %v2218_v35 = vsel %vm1986_vm15, %v1499_v56, 0  ;;  %v2264_v16 = vsel %vm1986_vm15, %v1500_v12, 0  ;;  %v2310_v26 = vsel %vm1986_vm15, %v1501_v14, 0 }
 0x6c9   :  { %6189 = vmatpush3.bf16.msra.mxu0 %v2172_v7  ;;  %6195 = vmatpush3.bf16.msra.mxu1 %v2218_v35 }
 0x6ca   :  { %6200 = vmatprep.subr.bf16.mxu0 %v6798_v41  ;;  %6206 = vmatprep.subr.bf16.mxu1 %v6798_v41 }
 0x6cc   :  { %6191 = vmatmul.mubr.msk.bf16.vlgmr.msra.gmra.mrb[44].mxu0 %vm1502_vm13, %v1979_v36  ;;  %6197 = vmatmul.mubr.msk.bf16.vlgmr.msra.gmra.mrb[24].mxu1 %vm1502_vm13, %v1980_v1 }
 0x6cd   :  { %6201 = vmatpush3.bf16.msra.mxu0 %v2264_v16  ;;  %6207 = vmatpush3.bf16.msra.mxu1 %v2310_v26 }
 0x6ce   :  { %6208 = vmatprep.mubr.msk.bf16.mxu1 %vm6800_vm8, %v6798_v41  ;;  %6202 = vmatprep.mubr.msk.bf16.mxu0 %vm6800_vm8, %v6798_v41 }
 0x6cf   :  { %6212 = vmatprep.subr.bf16.mxu0 %v6798_v41  ;;  %6220 = vmatprep.subr.bf16.mxu1 %v6798_v41 }
 0x6e0   :  { %v1958_v8 = vpop.xlane.xlu1 %1957 }
 0x6e1   :  { %6572 = vrcp.f32 %v1958_v8 }
 0x6e4   :  { %v1955_v37 = vpop.xlane.xlu0 %1954 }
 0x6e5   :  { %6574 = vrcp.f32 %v1955_v37 }
 0x6eb   :  { %v6573_v40 = vpop.eup %6572 }
 0x6ec   :  { %v1974_v42 = vmul.f32 %v6573_v40, %v7331_v20 }
 0x6ee   :  { %v1982_v43 = vpack.c.bf16 %v1974_v42, %v1974_v42 }
 0x6ef   :  { %v6575_v44 = vpop.eup %6574 }
 0x6f0   :  { %v1973_v45 = vmul.f32 %v6575_v44, %v7335_v23  ;;  %6209 = vmatmul.mubr.msk.bf16.vlgmr.msra.gmra.mrb[28].mxu1 %vm1502_vm13, %v1982_v43 }
 0x6f1   :  { %6224 = vmatprep.mubr.msk.bf16.mxu1 %vm6800_vm8, %v6798_v41 }
 0x6f2   :  { %v1981_v46 = vpack.c.bf16 %v1973_v45, %v1973_v45 }
 0x6f4   :  { %6203 = vmatmul.mubr.msk.bf16.vlgmr.msra.gmra.mrb[48].mxu0 %vm1502_vm13, %v1981_v46 }
 0x6f5   :  { %6216 = vmatprep.mubr.msk.bf16.mxu0 %vm6800_vm8, %v6798_v41 }
 0x77a   :  { %v2024_v47 = vpop.f32.mrb[36].mxu0 }
 0x77b   :  { %v6168_v48 = vpop.f32.mrb[37].mxu0 }
 0x77c   :  { %v2027_v49 = vpop.f32.mrb[38].mxu0 }
 0x77d   :  { %v6169_v4 = vpop.f32.mrb[39].mxu0 }
 0x782   :  { %v2070_v20 = vpop.f32.mrb[16].mxu1 }
 0x783   :  { %v6174_v51 = vpop.f32.mrb[17].mxu1 }
 0x784   :  { %v2073_v9 = vpop.f32.mrb[18].mxu1 }
 0x785   :  { %v6175_v60 = vpop.f32.mrb[19].mxu1 }
 0x78a   :  { %v2116_v23 = vpop.f32.mrb[40].mxu0  ;;  %v2162_v52 = vpop.f32.mrb[20].mxu1 }
 0x78b   :  { %v2352_v58 = vcombine.low %v2024_v47, %v2116_v23  ;;  %v2353_v17 = vcombine.high %v2024_v47, %v2116_v23  ;;  %v2368_v54 = vcombine.low %v2070_v20, %v2162_v52  ;;  %v2369_v2 = vcombine.high %v2070_v20, %v2162_v52  ;;  %v6180_v50 = vpop.f32.mrb[41].mxu0  ;;  %v6186_v3 = vpop.f32.mrb[21].mxu1 }
 0x78c   :  { %v2119_v53 = vpop.f32.mrb[42].mxu0  ;;  %v2165_v6 = vpop.f32.mrb[22].mxu1 }
 0x78d   :  { %v2360_v10 = vrot.slane %v2352_v58, %v7096_v22  ;;  %v2367_v15 = vrot.slane %v2353_v17, %v7096_v22  ;;  %v2376_v18 = vrot.slane %v2368_v54, %v7096_v22  ;;  %v2383_v55 = vrot.slane %v2369_v2, %v7096_v22  ;;  %v6181_v63 = vpop.f32.mrb[43].mxu0  ;;  %v6187_v61 = vpop.f32.mrb[23].mxu1 }
 0x78f   :  { %v2384_v21 = vcombine.low %v2360_v10, %v2376_v18  ;;  %v2385_v59 = vcombine.high %v2360_v10, %v2376_v18  ;;  %v2400_v24 = vcombine.low %v2367_v15, %v2383_v55  ;;  %v2401_v25 = vcombine.high %v2367_v15, %v2383_v55 }
 0x791   :  { %v2392_v27 = vrot.slane %v2384_v21, %v7099_v29  ;;  %v2399_v19 = vrot.slane %v2385_v59, %v7099_v29  ;;  %v2408_v38 = vrot.slane %v2400_v24, %v7099_v29  ;;  %v2415_v62 = vrot.slane %v2401_v25, %v7099_v29 }
 0x793   :  { %v2488_v5 = vcombine.low %v2392_v27, %v2399_v19  ;;  %v5812_v28 = vcombine.high %v2392_v27, %v2399_v19  ;;  %v2504_v30 = vcombine.low %v2408_v38, %v2415_v62  ;;  %v5813_v57 = vcombine.high %v2408_v38, %v2415_v62  ;;  %v6500_v62 = vld [vmem:[#allocation10] sm:$0xff]  }
 0x794   :  { %6213 = vmatpush3.bf16.msra.mxu0 %v6500_v62  ;;  %v6503_v62 = vld [vmem:[%s8066_s13 + $0x8] sm:$0xff]  }
 0x795   :  { %v2495_v31 = vrot.slane %v2488_v5, %v7096_v22  ;;  %v2503_v32 = vrot.slane %v5812_v28, %v7096_v22  ;;  %v2511_v33 = vrot.slane %v2504_v30, %v7096_v22  ;;  %v2519_v34 = vrot.slane %v5813_v57, %v7096_v22  ;;  %6214 = vmatprep.subr.bf16.mxu0 %v6798_v41 }
 0x797   :  { %v2521_v56 = vcombine.high %v2495_v31, %v2503_v32  ;;  %v2537_v7 = vcombine.high %v2511_v33, %v2519_v34  ;;  %v2520_v35 = vcombine.low %v2495_v31, %v2503_v32  ;;  %v2536_v12 = vcombine.low %v2511_v33, %v2519_v34 }
 0x799   :  { %v7414_v14 = vrot.slane %v2521_v56, %v7099_v29  ;;  %v7417_v36 = vrot.slane %v2537_v7, %v7099_v29  ;;  %v7420_v1 = vrot.slane %v2520_v35, %v7099_v29  ;;  %v7423_v16 = vrot.slane %v2536_v12, %v7099_v29 }
 0x79b   :  { %v2554_v26 = vcombine.low %v7414_v14, %v7417_v36  ;;  %v2552_v8 = vcombine.low %v7420_v1, %v7423_v16  ;;  %v2553_v37 = vcombine.high %v7420_v1, %v7423_v16  ;;  %v2555_v40 = vcombine.high %v7414_v14, %v7417_v36  ;;  %v6501_v14 = vld [vmem:[#allocation10 + $0x8] sm:$0xff]   ;;  %v5816_v1 = vld [vmem:[%s8063_s10] ss:$0 sm:$0xff] }
 0x79c   :  { %6215 = vmatpush3.bf16.msra.mxu0 %v6501_v14 }
 0x79d   :  { %6228 = vmatprep.subr.bf16.mxu0 %v6798_v41 }
 0x79f   :  { %v2208_v42 = vpop.f32.mrb[44].mxu0  ;;  %v2254_v43 = vpop.f32.mrb[24].mxu1 }
 0x7a0   :  { %v6192_v44 = vpop.f32.mrb[45].mxu0  ;;  %v6198_v45 = vpop.f32.mrb[25].mxu1 }
 0x7a1   :  { %v2211_v46 = vpop.f32.mrb[46].mxu0  ;;  %v2257_v47 = vpop.f32.mrb[26].mxu1 }
 0x7a2   :  { %v6193_v48 = vpop.f32.mrb[47].mxu0  ;;  %v6199_v49 = vpop.f32.mrb[27].mxu1 }
 0x7c3   :  { %v2346_v4 = vpop.f32.mrb[28].mxu1 }
 0x7c4   :  { %v2436_v20 = vcombine.low %v2254_v43, %v2346_v4  ;;  %v2437_v51 = vcombine.high %v2254_v43, %v2346_v4  ;;  %v6210_v9 = vpop.f32.mrb[29].mxu1 }
 0x7c5   :  { %v2349_v60 = vpop.f32.mrb[30].mxu1 }
 0x7c6   :  { %v6211_v23 = vpop.f32.mrb[31].mxu1  ;;  %v2444_v50 = vrot.slane %v2436_v20, %v7096_v22  ;;  %v2451_v3 = vrot.slane %v2437_v51, %v7096_v22 }
 0x7c7   :  { %v2300_v52 = vpop.f32.mrb[48].mxu0 }
 0x7c8   :  { %v2420_v58 = vcombine.low %v2208_v42, %v2300_v52  ;;  %v2421_v17 = vcombine.high %v2208_v42, %v2300_v52  ;;  %v6204_v54 = vpop.f32.mrb[49].mxu0 }
 0x7c9   :  { %v2303_v2 = vpop.f32.mrb[50].mxu0 }
 0x7ca   :  { %v2428_v53 = vrot.slane %v2420_v58, %v7096_v22  ;;  %v2435_v6 = vrot.slane %v2421_v17, %v7096_v22  ;;  %v6205_v10 = vpop.f32.mrb[51].mxu0 }
 0x7cc   :  { %v2452_v15 = vcombine.low %v2428_v53, %v2444_v50  ;;  %v2453_v18 = vcombine.high %v2428_v53, %v2444_v50  ;;  %v2468_v55 = vcombine.low %v2435_v6, %v2451_v3  ;;  %v2469_v63 = vcombine.high %v2435_v6, %v2451_v3 }
 0x7ce   :  { %v2460_v61 = vrot.slane %v2452_v15, %v7099_v29  ;;  %v2467_v21 = vrot.slane %v2453_v18, %v7099_v29  ;;  %v2476_v59 = vrot.slane %v2468_v55, %v7099_v29  ;;  %v2483_v24 = vrot.slane %v2469_v63, %v7099_v29 }
 0x7d0   :  { %v2556_v25 = vcombine.low %v2460_v61, %v2467_v21  ;;  %v5814_v27 = vcombine.high %v2460_v61, %v2467_v21  ;;  %v2572_v19 = vcombine.low %v2476_v59, %v2483_v24  ;;  %v5815_v38 = vcombine.high %v2476_v59, %v2483_v24 }
 0x7d2   :  { %v2563_v5 = vrot.slane %v2556_v25, %v7096_v22  ;;  %v2571_v28 = vrot.slane %v5814_v27, %v7096_v22  ;;  %v2579_v30 = vrot.slane %v2572_v19, %v7096_v22  ;;  %v2587_v57 = vrot.slane %v5815_v38, %v7096_v22  ;;  %v6502_v38 = vld [vmem:[%s8066_s13] sm:$0xff]  }
 0x7d3   :  { %6221 = vmatpush3.bf16.msra.mxu1 %v6502_v38 }
 0x7d4   :  { %v2589_v31 = vcombine.high %v2563_v5, %v2571_v28  ;;  %v2605_v32 = vcombine.high %v2579_v30, %v2587_v57  ;;  %v2588_v33 = vcombine.low %v2563_v5, %v2571_v28  ;;  %v2604_v34 = vcombine.low %v2579_v30, %v2587_v57  ;;  %6222 = vmatprep.subr.bf16.mxu1 %v6798_v41 }
 0x7d6   :  { %v2603_v56 = vrot.slane %v2589_v31, %v7099_v29  ;;  %v2619_v7 = vrot.slane %v2605_v32, %v7099_v29  ;;  %v2596_v35 = vrot.slane %v2588_v33, %v7099_v29  ;;  %v2612_v12 = vrot.slane %v2604_v34, %v7099_v29 }
 0x7d7   :  { %6223 = vmatpush3.bf16.msra.mxu1 %v6503_v62 }
 0x7d8   :  { %v2622_v36 = vcombine.low %v2603_v56, %v2619_v7  ;;  %v2621_v42 = vcombine.high %v2596_v35, %v2612_v12  ;;  %v2620_v43 = vcombine.low %v2596_v35, %v2612_v12  ;;  %v2623_v44 = vcombine.high %v2603_v56, %v2619_v7  ;;  %6248 = vmatprep.subr.bf16.mxu1 %v6798_v41 }
 0x7da   :  { %v6469_v45 = vpack.i.bf16 %v2622_v36, %v2554_v26  ;;  %v6464_v46 = vpack.i.bf16 %v2621_v42, %v2553_v37  ;;  %v6474_v47 = vpack.i.bf16 %v2623_v44, %v2555_v40 }
 0x7dc   :  { %6470 = vrot.lane.b32.xlu1 %v6469_v45, %s6806_s28  ;;  %6465 = vrot.lane.b32.xlu0 %v6464_v46, %s6794_s1  ;;  %v5820_v45 = vld [vmem:[%s8064_s11] ss:$0 sm:$0xff] }
 0x7e0   :  { %6475 = vrot.lane.b32.xlu0 %v6474_v47, %s6807_s6 }
 0x84e   :  { %v6471_v48 = vpop.permute.xlu1 %6470  ;;  %v6466_v49 = vpop.permute.xlu0 %6465 }
 0x84f   :  { %v6468_v4 = vunpack.i.h.bf16 %v6466_v49  ;;  %v6467_v20 = vunpack.i.l.bf16 %v6466_v49  ;;  %v6473_v51 = vunpack.i.h.bf16 %v6471_v48  ;;  %v6472_v9 = vunpack.i.l.bf16 %v6471_v48 }
 0x851   :  { %v2648_v26 = vsel %vm1502_vm13, %v2552_v8, %v6467_v20  ;;  %v2649_v37 = vsel %vm1502_vm13, %v2620_v43, %v6468_v4  ;;  %v5821_v4 = vld [vmem:[%s8065_s12] ss:$0 sm:$0xff] }
 0x852   :  { %v6476_v40 = vpop.permute.xlu0 %6475  ;;  %v2650_v52 = vsel %vm206_vm0, %v2648_v26, %v6472_v9  ;;  %v2651_v58 = vsel %vm206_vm0, %v2649_v37, %v6473_v51  ;;  %v6504_v37 = vld [vmem:[%s8068_s15] sm:$0xff]  }
 0x853   :  { %v6478_v60 = vunpack.i.h.bf16 %v6476_v40  ;;  %v6477_v23 = vunpack.i.l.bf16 %v6476_v40  ;;  %v6505_v40 = vld [vmem:[%s8068_s15 + $0x8] sm:$0xff]  }
 0x855   :  { %v2653_v17 = vsel %vm2652_vm1, %v2650_v52, %v6477_v23  ;;  %v2654_v54 = vsel %vm2652_vm1, %v2651_v58, %v6478_v60  ;;  %v6506_v60 = vld [vmem:[%s8068_s15 + $0x10] sm:$0xff]   ;;  %v6507_v23 = vld [vmem:[%s8068_s15 + $0x18] sm:$0xff]   ;;  %v6508_v52 = vld [vmem:[%s8068_s15 + $0x20] sm:$0xff]  }
 0x856   :  { %v2655_v2 = vpack.c.bf16 %v2654_v54, %v2653_v17  ;;  %v6509_v58 = vld [vmem:[%s8068_s15 + $0x28] sm:$0xff]   ;;  %v6510_v17 = vld [vmem:[%s8068_s15 + $0x30] sm:$0xff]   ;;  %v6511_v54 = vld [vmem:[%s8068_s15 + $0x38] sm:$0xff]  }
 0x858   :  { %6217 = vmatmul.mubr.msk.bf16.vlgmr.msra.gmra.mrb[52].mxu0 %vm369_vm7, %v2655_v2  ;;  %v5822_v2 = vld [vmem:[%s8067_s14] ss:$0 sm:$0xff] }
 0x859   :  { %6244 = vmatprep.mubr.msk.bf16.mxu0 %vm6800_vm8, %v6798_v41  ;;  %6229 = vmatpush3.bf16.msra.mxu0 %v6504_v37 }
 0x85a   :  { %6230 = vmatprep.subr.bf16.mxu0 %v6798_v41 }
 0x85d   :  { %6231 = vmatpush3.bf16.msra.mxu0 %v6505_v40 }
 0x85e   :  { %6232 = vmatprep.subr.bf16.mxu0 %v6798_v41 }
 0x861   :  { %6233 = vmatpush3.bf16.msra.mxu0 %v6506_v60 }
 0x862   :  { %6234 = vmatprep.subr.bf16.mxu0 %v6798_v41 }
 0x865   :  { %6235 = vmatpush3.bf16.msra.mxu0 %v6507_v23 }
 0x866   :  { %6236 = vmatprep.subr.bf16.mxu0 %v6798_v41 }
 0x869   :  { %6237 = vmatpush3.bf16.msra.mxu0 %v6508_v52 }
 0x86a   :  { %6238 = vmatprep.subr.bf16.mxu0 %v6798_v41 }
 0x86d   :  { %6239 = vmatpush3.bf16.msra.mxu0 %v6509_v58 }
 0x86e   :  { %6240 = vmatprep.subr.bf16.mxu0 %v6798_v41 }
 0x871   :  { %6241 = vmatpush3.bf16.msra.mxu0 %v6510_v17 }
 0x872   :  { %6242 = vmatprep.subr.bf16.mxu0 %v6798_v41 }
 0x875   :  { %6243 = vmatpush3.bf16.msra.mxu0 %v6511_v54 }
 0x876   :  { %6278 = vmatprep.subr.bf16.mxu0 %v6798_v41 }
 0x92b   :  { %v2716_v16 = vpop.f32.mrb[52].mxu0 }
 0x92c   :  { %v2717_v8 = vadd.f32 %v5816_v1, %v2716_v16  ;;  %v6218_v50 = vpop.f32.mrb[53].mxu0 }
 0x92d   :  { %v2719_v3 = vpop.f32.mrb[54].mxu0 }
 0x92e   :  { %v7470_v53 = vadd.f32 %v2717_v8, %v7022_v11  ;;  %v2720_v6 = vadd.f32 %v5816_v1, %v2719_v3  ;;  %v6219_v10 = vpop.f32.mrb[55].mxu0 }
 0x930   :  { %v7473_v15 = vadd.f32 %v2720_v6, %v7024_v13  ;;  %v2727_v18 = vsel %vm369_vm7, %v7470_v53, 0.0 }
 0x931   :  { %2728 = vadd.xlane.f32.xlu1 %v2727_v18 }
 0x932   :  { %v2730_v55 = vsel %vm369_vm7, %v7473_v15, 0.0 }
 0x933   :  { %2731 = vadd.xlane.f32.xlu0 %v2730_v55 }
 0x9be   :  { %v2729_v63 = vpop.xlane.xlu1 %2728 }
 0x9bf   :  { %v2733_v61 = vmul.f32 0.03125, %v2729_v63 }
 0x9c0   :  { %v2732_v21 = vpop.xlane.xlu0 %2731 }
 0x9c1   :  { %v2735_v59 = vsub.f32 %v7470_v53, %v2733_v61  ;;  %v2734_v11 = vmul.f32 0.03125, %v2732_v21 }
 0x9c3   :  { %v2736_v24 = vsub.f32 %v7473_v15, %v2734_v11  ;;  %v2737_v25 = vmul.f32 %v2735_v59, %v2735_v59 }
 0x9c5   :  { %v2739_v13 = vsel %vm369_vm7, %v2737_v25, 0.0  ;;  %v2738_v27 = vmul.f32 %v2736_v24, %v2736_v24 }
 0x9c6   :  { %2740 = vadd.xlane.f32.xlu0 %v2739_v13 }
 0x9c7   :  { %v2742_v19 = vsel %vm369_vm7, %v2738_v27, 0.0 }
 0x9c8   :  { %2743 = vadd.xlane.f32.xlu1 %v2742_v19 }
 0xa53   :  { %v2741_v5 = vpop.xlane.xlu0 %2740 }
 0xa54   :  { %v2745_v28 = vmul.f32 0.03125, %v2741_v5 }
 0xa55   :  { %v2744_v30 = vpop.xlane.xlu1 %2743 }
 0xa56   :  { %v2747_v57 = vadd.f32 1e-05, %v2745_v28  ;;  %v2746_v31 = vmul.f32 0.03125, %v2744_v30 }
 0xa58   :  { %6576 = vrsqrt.f32 %v2747_v57  ;;  %v2748_v32 = vadd.f32 1e-05, %v2746_v31  ;;  %vm2751_vm2 = vcmp.eq.f32.partialorder %v2747_v57, inf  ;;  %v2754_v56 = vand.u32 2147483648, %v2747_v57  ;;  %v5826_v31 = vld [vmem:[%s8069_s16] ss:$0 sm:$0xff] }
 0xa59   :  { %vm2753_vm3 = vcmp.eq.f32.partialorder %v2747_v57, 0.0 }
 0xa5a   :  { %6578 = vrsqrt.f32 %v2748_v32  ;;  %vm2758_vm4 = vcmp.eq.f32.partialorder %v2748_v32, inf  ;;  %v2761_v36 = vand.u32 2147483648, %v2748_v32  ;;  %vm2760_vm5 = vcmp.eq.f32.partialorder %v2748_v32, 0.0 }
 0xa62   :  { %v6577_v33 = vpop.eup %6576 }
 0xa63   :  { %v2750_v34 = vmul.f32 %v6577_v33, %v2747_v57 }
 0xa64   :  { %v6579_v7 = vpop.eup %6578 }
 0xa65   :  { %v2752_v35 = vsel %vm2751_vm2, %v2747_v57, %v2750_v34  ;;  %v2757_v14 = vmul.f32 %v6579_v7, %v2748_v32 }
 0xa66   :  { %v2755_v12 = vsel %vm2753_vm3, %v2754_v56, %v2752_v35 }
 0xa67   :  { %6580 = vrcp.f32 %v2755_v12  ;;  %v2759_v42 = vsel %vm2758_vm4, %v2748_v32, %v2757_v14 }
 0xa68   :  { %v2762_v43 = vsel %vm2760_vm5, %v2761_v36, %v2759_v42 }
 0xa69   :  { %6582 = vrcp.f32 %v2762_v43 }
 0xa71   :  { %v6581_v44 = vpop.eup %6580 }
 0xa72   :  { %v2764_v46 = vmul.f32 %v6581_v44, %v2735_v59 }
 0xa73   :  { %v6583_v47 = vpop.eup %6582 }
 0xa74   :  { %v2766_v48 = vmul.f32 %v6583_v47, %v2736_v24  ;;  %v2773_v49 = vmul.f32 %v5820_v45, %v2764_v46 }
 0xa76   :  { %v2774_v20 = vmul.f32 %v5820_v45, %v2766_v48  ;;  %v2781_v51 = vadd.f32 %v5821_v4, %v2773_v49 }
 0xa78   :  { %v2782_v9 = vadd.f32 %v5821_v4, %v2774_v20  ;;  %v6512_v20 = vld [vmem:[#allocation5 + $0x10] sm:$0xff]  }
 0xa7a   :  { %v2783_v26 = vpack.c.bf16 %v2782_v9, %v2781_v51  ;;  %v6513_v51 = vld [vmem:[#allocation5 + $0x18] sm:$0xff]  }
 0xa7c   :  { %6225 = vmatmul.mubr.msk.bf16.vlgmr.msra.gmra.mrb[32].mxu1 %vm369_vm7, %v2783_v26 }
 0xa7d   :  { %6252 = vmatprep.mubr.msk.bf16.mxu1 %vm6800_vm8, %v6798_v41  ;;  %6249 = vmatpush3.bf16.msra.mxu1 %v6512_v20 }
 0xa7e   :  { %6250 = vmatprep.subr.bf16.mxu1 %v6798_v41 }
 0xa81   :  { %6251 = vmatpush3.bf16.msra.mxu1 %v6513_v51 }
 0xa82   :  { %6256 = vmatprep.subr.bf16.mxu1 %v6798_v41 }
 0xb4f   :  { %v2844_v1 = vpop.f32.mrb[32].mxu1 }
 0xb50   :  { %v2845_v16 = vadd.f32 %v5822_v2, %v2844_v1  ;;  %v6226_v8 = vpop.f32.mrb[33].mxu1 }
 0xb51   :  { %v2847_v50 = vpop.f32.mrb[34].mxu1 }
 0xb52   :  { %v2853_v3 = vmul.f32 0.044715, %v2845_v16  ;;  %v2848_v6 = vadd.f32 %v5822_v2, %v2847_v50  ;;  %v6227_v10 = vpop.f32.mrb[35].mxu1  ;;  %v2851_v38 = vmul.f32 0.5, %v2845_v16 }
 0xb53   :  { %v5837_v10 = vld [vmem:[%s8093_s7 + $0x1] ss:$0 sm:$0xff] }
 0xb54   :  { %v2855_v18 = vmul.f32 %v2853_v3, %v2845_v16  ;;  %v2854_v55 = vmul.f32 0.044715, %v2848_v6  ;;  %v2852_v62 = vmul.f32 0.5, %v2848_v6 }
 0xb56   :  { %v2857_v63 = vmul.f32 %v2855_v18, %v2845_v16  ;;  %v2856_v61 = vmul.f32 %v2854_v55, %v2848_v6 }
 0xb58   :  { %v2859_v21 = vadd.f32 %v2857_v63, %v2845_v16  ;;  %v2858_v59 = vmul.f32 %v2856_v61, %v2848_v6 }
 0xb5a   :  { %v2861_v11 = vmul.f32 0.7978845, %v2859_v21  ;;  %v2860_v24 = vadd.f32 %v2858_v59, %v2848_v6  ;;  %v5838_v21 = vld [vmem:[%s8058_s5 + $0x1] ss:$0 sm:$0xff] }
 0xb5c   :  { %6584 = vtanh.f32 %v2861_v11  ;;  %v2862_v25 = vmul.f32 0.7978845, %v2860_v24 }
 0xb5e   :  { %6586 = vtanh.f32 %v2862_v25  ;;  %v6514_v25 = vld [vmem:[#allocation7 + $0x10] sm:$0xff]  }
 0xb66   :  { %v6585_v13 = vpop.eup %6584 }
 0xb67   :  { %v2865_v27 = vadd.f32 1.0, %v6585_v13 }
 0xb68   :  { %v6587_v19 = vpop.eup %6586 }
 0xb69   :  { %v2866_v5 = vadd.f32 1.0, %v6587_v19  ;;  %v2867_v28 = vmul.f32 %v2865_v27, %v2851_v38  ;;  %v6515_v27 = vld [vmem:[#allocation7 + $0x18] sm:$0xff]   ;;  %v6516_v19 = vld [vmem:[#allocation8 + $0x10] sm:$0xff]  }
 0xb6a   :  { %v6517_v38 = vld [vmem:[#allocation8 + $0x18] sm:$0xff]  }
 0xb6b   :  { %v2868_v30 = vmul.f32 %v2866_v5, %v2852_v62 }
 0xb6d   :  { %v2869_v57 = vpack.c.bf16 %v2868_v30, %v2867_v28 }
 0xb6f   :  { %6245 = vmatmul.mubr.bf16.vlgmr.msra.gmra.mrb[56].mxu0 %v2869_v57 }
 0xb70   :  { %6280 = vmatprep.mubr.msk.bf16.mxu0 %vm6800_vm8, %v6798_v41 }
 0xc42   :  { %v2975_v32 = vpop.f32.mrb[56].mxu0 }
 0xc43   :  { %v2976_v33 = vadd.f32 %v5826_v31, %v2975_v32  ;;  %v6246_v34 = vpop.f32.mrb[57].mxu0 }
 0xc44   :  { %v2978_v56 = vpop.f32.mrb[58].mxu0 }
 0xc45   :  { %v7541_v7 = vadd.f32 %v2976_v33, %v7470_v53  ;;  %v2979_v35 = vadd.f32 %v5826_v31, %v2978_v56  ;;  %v6247_v12 = vpop.f32.mrb[59].mxu0 }
 0xc47   :  { %v7544_v14 = vadd.f32 %v2979_v35, %v7473_v15  ;;  %v2988_v36 = vsel %vm369_vm7, %v7541_v7, 0.0 }
 0xc48   :  { %2989 = vadd.xlane.f32.xlu0 %v2988_v36 }
 0xc49   :  { %v2991_v42 = vsel %vm369_vm7, %v7544_v14, 0.0 }
 0xc4a   :  { %2992 = vadd.xlane.f32.xlu1 %v2991_v42 }
 0xcd5   :  { %v2990_v43 = vpop.xlane.xlu0 %2989 }
 0xcd6   :  { %v2994_v44 = vmul.f32 0.03125, %v2990_v43 }
 0xcd7   :  { %v2993_v45 = vpop.xlane.xlu1 %2992 }
 0xcd8   :  { %v2996_v46 = vsub.f32 %v7541_v7, %v2994_v44  ;;  %v2995_v53 = vmul.f32 0.03125, %v2993_v45 }
 0xcda   :  { %v2997_v47 = vsub.f32 %v7544_v14, %v2995_v53  ;;  %v2998_v48 = vmul.f32 %v2996_v46, %v2996_v46 }
 0xcdc   :  { %v3000_v15 = vsel %vm369_vm7, %v2998_v48, 0.0  ;;  %v2999_v49 = vmul.f32 %v2997_v47, %v2997_v47 }
 0xcdd   :  { %3001 = vadd.xlane.f32.xlu0 %v3000_v15 }
 0xcde   :  { %v3003_v4 = vsel %vm369_vm7, %v2999_v49, 0.0 }
 0xcdf   :  { %3004 = vadd.xlane.f32.xlu1 %v3003_v4 }
 0xd6a   :  { %v3002_v9 = vpop.xlane.xlu0 %3001 }
 0xd6b   :  { %v3006_v26 = vmul.f32 0.03125, %v3002_v9 }
 0xd6c   :  { %v3005_v37 = vpop.xlane.xlu1 %3004 }
 0xd6d   :  { %v3008_v40 = vadd.f32 1e-05, %v3006_v26  ;;  %v3007_v60 = vmul.f32 0.03125, %v3005_v37 }
 0xd6f   :  { %6588 = vrsqrt.f32 %v3008_v40  ;;  %v3009_v23 = vadd.f32 1e-05, %v3007_v60  ;;  %vm3012_vm6 = vcmp.eq.f32.partialorder %v3008_v40, inf  ;;  %v3015_v17 = vand.u32 2147483648, %v3008_v40 }
 0xd70   :  { %vm3014_vm9 = vcmp.eq.f32.partialorder %v3008_v40, 0.0 }
 0xd71   :  { %6590 = vrsqrt.f32 %v3009_v23  ;;  %vm3019_vm10 = vcmp.eq.f32.partialorder %v3009_v23, inf  ;;  %v3022_v8 = vand.u32 2147483648, %v3009_v23  ;;  %vm3021_vm11 = vcmp.eq.f32.partialorder %v3009_v23, 0.0 }
 0xd79   :  { %v6589_v52 = vpop.eup %6588 }
 0xd7a   :  { %v3011_v58 = vmul.f32 %v6589_v52, %v3008_v40 }
 0xd7b   :  { %v6591_v54 = vpop.eup %6590 }
 0xd7c   :  { %v3013_v2 = vsel %vm3012_vm6, %v3008_v40, %v3011_v58  ;;  %v3018_v16 = vmul.f32 %v6591_v54, %v3009_v23 }
 0xd7d   :  { %v3016_v1 = vsel %vm3014_vm9, %v3015_v17, %v3013_v2 }
 0xd7e   :  { %6592 = vrcp.f32 %v3016_v1  ;;  %v3020_v50 = vsel %vm3019_vm10, %v3009_v23, %v3018_v16 }
 0xd7f   :  { %v3023_v3 = vsel %vm3021_vm11, %v3022_v8, %v3020_v50 }
 0xd80   :  { %6594 = vrcp.f32 %v3023_v3 }
 0xd88   :  { %v6593_v6 = vpop.eup %6592 }
 0xd89   :  { %v3025_v18 = vmul.f32 %v6593_v6, %v2996_v46 }
 0xd8a   :  { %v6595_v55 = vpop.eup %6594 }
 0xd8b   :  { %v3027_v63 = vmul.f32 %v6595_v55, %v2997_v47  ;;  %v3034_v61 = vmul.f32 %v5837_v10, %v3025_v18 }
 0xd8d   :  { %v3035_v59 = vmul.f32 %v5837_v10, %v3027_v63  ;;  %v3042_v11 = vadd.f32 %v5838_v21, %v3034_v61 }
 0xd8f   :  { %v3043_v24 = vadd.f32 %v5838_v21, %v3035_v59 }
 0xd91   :  { %v3044_v13 = vpack.c.bf16 %v3043_v24, %v3042_v11 }
 0xd93   :  { %6253 = vmatmul.mubr.msk.bf16.vlgmr.msra.gmra.mrb[36].mxu1 %vm369_vm7, %v3044_v13 }
 0xd94   :  { %6257 = vmatpush3.bf16.msra.mxu1 %v6514_v25  ;;  %6260 = vmatprep.mubr.msk.bf16.mxu1 %vm6800_vm8, %v6798_v41 }
 0xd95   :  { %6258 = vmatprep.subr.bf16.mxu1 %v6798_v41 }
 0xd98   :  { %6259 = vmatpush3.bf16.msra.mxu1 %v6515_v27 }
 0xd99   :  { %6264 = vmatprep.subr.bf16.mxu1 %v6798_v41 }
 0xd9b   :  { %6261 = vmatmul.mubr.msk.bf16.vlgmr.msra.gmra.mrb[40].mxu1 %vm369_vm7, %v3044_v13 }
 0xd9c   :  { %6265 = vmatpush3.bf16.msra.mxu1 %v6516_v19  ;;  %6268 = vmatprep.mubr.msk.bf16.mxu1 %vm6800_vm8, %v6798_v41 }
 0xd9d   :  { %6266 = vmatprep.subr.bf16.mxu1 %v6798_v41 }
 0xda0   :  { %6267 = vmatpush3.bf16.msra.mxu1 %v6517_v38 }
 0xda1   :  { %6272 = vmatprep.subr.bf16.mxu1 %v6798_v41 }
 0xda3   :  { %6269 = vmatmul.mubr.msk.bf16.vlgmr.msra.gmra.mrb[44].mxu1 %vm369_vm7, %v3044_v13 }
 0xda4   :  { %6274 = vmatprep.mubr.msk.bf16.mxu1 %vm6800_vm8, %v6798_v41 }
 0xe66   :  { %v3099_v62 = vpop.f32.mrb[36].mxu1 }
 0xe67   :  { %v6254_v5 = vpop.f32.mrb[37].mxu1 }
 0xe68   :  { %v7575_v28 = vpop.f32.mrb[38].mxu1 }
 0xe69   :  { %v6255_v30 = vpop.f32.mrb[39].mxu1 }
 0xe6e   :  { %v3157_v57 = vpop.f32.mrb[40].mxu1 }
 0xe6f   :  { %3530 = vrot.lane.b32.xlu1 %v3157_v57, %s6801_s27  ;;  %3524 = vrot.lane.b32.xlu0 %v3157_v57, %s6802_s24  ;;  %v6262_v31 = vpop.f32.mrb[41].mxu1 }
 0xe70   :  { %v7579_v32 = vpop.f32.mrb[42].mxu1 }
 0xe71   :  { %v6263_v33 = vpop.f32.mrb[43].mxu1 }
 0xe73   :  { %3536 = vrot.lane.b32.xlu1 %v3157_v57, %s6803_s8  ;;  %3224 = vrot.lane.b32.xlu0 %v3099_v62, %s6802_s24 }
 0xe76   :  { %v7583_v34 = vpop.f32.mrb[44].mxu1 }
 0xe77   :  { %3230 = vrot.lane.b32.xlu1 %v3099_v62, %s6801_s27  ;;  %3236 = vrot.lane.b32.xlu0 %v3099_v62, %s6803_s8  ;;  %v6270_v56 = vpop.f32.mrb[45].mxu1 }
 0xe78   :  { %v7587_v35 = vpop.f32.mrb[46].mxu1 }
 0xe79   :  { %v6271_v12 = vpop.f32.mrb[47].mxu1 }
 0xe7b   :  { %3532 = vrot.lane.b32.xlu0 %v7579_v32, %s6801_s27  ;;  %3526 = vrot.lane.b32.xlu1 %v7579_v32, %s6802_s24 }
 0xe7f   :  { %3226 = vrot.lane.b32.xlu0 %v7575_v28, %s6802_s24  ;;  %3538 = vrot.lane.b32.xlu1 %v7579_v32, %s6803_s8 }
 0xe83   :  { %3238 = vrot.lane.b32.xlu0 %v7575_v28, %s6803_s8  ;;  %3232 = vrot.lane.b32.xlu1 %v7575_v28, %s6801_s27 }
 0xee1   :  { %v3531_v36 = vpop.permute.xlu1 %3530  ;;  %v3525_v42 = vpop.permute.xlu0 %3524 }
 0xee2   :  { %v3542_v43 = vcombine.low %v3157_v57, %v3531_v36  ;;  %v3543_v44 = vcombine.high %v3157_v57, %v3531_v36 }
 0xee4   :  { %v3550_v48 = vrot.slane %v3542_v43, %v7096_v22  ;;  %v3557_v15 = vrot.slane %v3543_v44, %v7096_v22 }
 0xee5   :  { %v3537_v45 = vpop.permute.xlu1 %3536  ;;  %v3225_v46 = vpop.permute.xlu0 %3224 }
 0xee6   :  { %v3558_v53 = vcombine.low %v3525_v42, %v3537_v45  ;;  %v3559_v47 = vcombine.high %v3525_v42, %v3537_v45 }
 0xee8   :  { %v3566_v49 = vrot.slane %v3558_v53, %v7096_v22  ;;  %v3573_v4 = vrot.slane %v3559_v47, %v7096_v22 }
 0xee9   :  { %v3231_v20 = vpop.permute.xlu1 %3230  ;;  %v3237_v51 = vpop.permute.xlu0 %3236 }
 0xeea   :  { %v3574_v9 = vcombine.low %v3550_v48, %v3566_v49  ;;  %v3575_v26 = vcombine.high %v3550_v48, %v3566_v49  ;;  %v3590_v37 = vcombine.low %v3557_v15, %v3573_v4  ;;  %v3591_v40 = vcombine.high %v3557_v15, %v3573_v4 }
 0xeeb   :  { %v3242_v60 = vcombine.low %v3099_v62, %v3231_v20  ;;  %v3243_v23 = vcombine.high %v3099_v62, %v3231_v20  ;;  %v3258_v52 = vcombine.low %v3225_v46, %v3237_v51  ;;  %v3259_v58 = vcombine.high %v3225_v46, %v3237_v51 }
 0xeec   :  { %v3582_v17 = vrot.slane %v3574_v9, %v7099_v29  ;;  %v3589_v54 = vrot.slane %v3575_v26, %v7099_v29  ;;  %v3598_v2 = vrot.slane %v3590_v37, %v7099_v29  ;;  %v3605_v1 = vrot.slane %v3591_v40, %v7099_v29 }
 0xeed   :  { %v3250_v16 = vrot.slane %v3242_v60, %v7096_v22  ;;  %v3257_v8 = vrot.slane %v3243_v23, %v7096_v22  ;;  %v3266_v50 = vrot.slane %v3258_v52, %v7096_v22  ;;  %v3273_v3 = vrot.slane %v3259_v58, %v7096_v22  ;;  %v3533_v6 = vpop.permute.xlu0 %3532  ;;  %v3527_v10 = vpop.permute.xlu1 %3526 }
 0xeee   :  { %v3678_v21 = vcombine.low %v3582_v17, %v3589_v54  ;;  %v5852_v59 = vcombine.high %v3582_v17, %v3589_v54  ;;  %v3694_v11 = vcombine.low %v3598_v2, %v3605_v1  ;;  %v5853_v24 = vcombine.high %v3598_v2, %v3605_v1 }
 0xeef   :  { %v3274_v18 = vcombine.low %v3250_v16, %v3266_v50  ;;  %v3275_v55 = vcombine.high %v3250_v16, %v3266_v50  ;;  %v3290_v63 = vcombine.low %v3257_v8, %v3273_v3  ;;  %v3291_v61 = vcombine.high %v3257_v8, %v3273_v3 }
 0xef0   :  { %v3610_v5 = vcombine.low %v7579_v32, %v3533_v6  ;;  %v3611_v30 = vcombine.high %v7579_v32, %v3533_v6  ;;  %v3685_v49 = vrot.slane %v3678_v21, %v7096_v22  ;;  %v3693_v4 = vrot.slane %v5852_v59, %v7096_v22 }
 0xef1   :  { %v3282_v25 = vrot.slane %v3274_v18, %v7099_v29  ;;  %v3289_v13 = vrot.slane %v3275_v55, %v7099_v29  ;;  %v3298_v27 = vrot.slane %v3290_v63, %v7099_v29  ;;  %v3305_v19 = vrot.slane %v3291_v61, %v7099_v29  ;;  %v3227_v38 = vpop.permute.xlu0 %3226  ;;  %v3539_v62 = vpop.permute.xlu1 %3538 }
 0xef2   :  { %v3626_v57 = vcombine.low %v3527_v10, %v3539_v62  ;;  %v3627_v31 = vcombine.high %v3527_v10, %v3539_v62  ;;  %v3618_v42 = vrot.slane %v3610_v5, %v7096_v22  ;;  %v3625_v43 = vrot.slane %v3611_v30, %v7096_v22 }
 0xef3   :  { %v3378_v33 = vcombine.low %v3282_v25, %v3289_v13  ;;  %v5848_v56 = vcombine.high %v3282_v25, %v3289_v13  ;;  %v3394_v12 = vcombine.low %v3298_v27, %v3305_v19  ;;  %v5849_v36 = vcombine.high %v3298_v27, %v3305_v19 }
 0xef4   :  { %v3634_v44 = vrot.slane %v3626_v57, %v7096_v22  ;;  %v3641_v45 = vrot.slane %v3627_v31, %v7096_v22  ;;  %v3701_v20 = vrot.slane %v3694_v11, %v7096_v22  ;;  %v3709_v51 = vrot.slane %v5853_v24, %v7096_v22 }
 0xef5   :  { %v3239_v15 = vpop.permute.xlu0 %3238  ;;  %v3233_v32 = vpop.permute.xlu1 %3232  ;;  %v7628_v9 = vrot.slane %v3378_v33, %v7096_v22  ;;  %v7631_v26 = vrot.slane %v5848_v56, %v7096_v22  ;;  %v7634_v37 = vrot.slane %v3394_v12, %v7096_v22  ;;  %v7637_v40 = vrot.slane %v5849_v36, %v7096_v22 }
 0xef6   :  { %v3642_v46 = vcombine.low %v3618_v42, %v3634_v44  ;;  %v3643_v53 = vcombine.high %v3618_v42, %v3634_v44  ;;  %v3658_v47 = vcombine.low %v3625_v43, %v3641_v45  ;;  %v3659_v48 = vcombine.high %v3625_v43, %v3641_v45 }
 0xef7   :  { %v3326_v60 = vcombine.low %v3227_v38, %v3239_v15  ;;  %v3327_v23 = vcombine.high %v3227_v38, %v3239_v15  ;;  %v3310_v52 = vcombine.low %v7575_v28, %v3233_v32  ;;  %v3311_v58 = vcombine.high %v7575_v28, %v3233_v32 }
 0xef8   :  { %v3650_v17 = vrot.slane %v3642_v46, %v7099_v29  ;;  %v3657_v54 = vrot.slane %v3643_v53, %v7099_v29  ;;  %v3666_v2 = vrot.slane %v3658_v47, %v7099_v29  ;;  %v3673_v1 = vrot.slane %v3659_v48, %v7099_v29 }
 0xef9   :  { %v3334_v16 = vrot.slane %v3326_v60, %v7096_v22  ;;  %v3341_v8 = vrot.slane %v3327_v23, %v7096_v22  ;;  %v3318_v50 = vrot.slane %v3310_v52, %v7096_v22  ;;  %v3325_v3 = vrot.slane %v3311_v58, %v7096_v22 }
 0xefa   :  { %v3410_v6 = vcombine.low %v7628_v9, %v7631_v26  ;;  %v3426_v28 = vcombine.low %v7634_v37, %v7637_v40  ;;  %v3746_v55 = vcombine.low %v3650_v17, %v3657_v54  ;;  %v5854_v63 = vcombine.high %v3650_v17, %v3657_v54 }
 0xefb   :  { %v3342_v10 = vcombine.low %v3318_v50, %v3334_v16  ;;  %v3343_v18 = vcombine.high %v3318_v50, %v3334_v16  ;;  %v3710_v61 = vcombine.low %v3685_v49, %v3693_v4  ;;  %v3726_v21 = vcombine.low %v3701_v20, %v3709_v51 }
 0xefc   :  { %v3762_v59 = vcombine.low %v3666_v2, %v3673_v1  ;;  %v5855_v11 = vcombine.high %v3666_v2, %v3673_v1  ;;  %v3358_v24 = vcombine.low %v3325_v3, %v3341_v8  ;;  %v3359_v25 = vcombine.high %v3325_v3, %v3341_v8 }
 0xefd   :  { %v3411_v13 = vcombine.high %v7628_v9, %v7631_v26  ;;  %v3427_v27 = vcombine.high %v7634_v37, %v7637_v40  ;;  %v3718_v19 = vrot.slane %v3710_v61, %v7099_v29  ;;  %v3734_v38 = vrot.slane %v3726_v21, %v7099_v29 }
 0xefe   :  { %v3350_v62 = vrot.slane %v3342_v10, %v7099_v29  ;;  %v3357_v5 = vrot.slane %v3343_v18, %v7099_v29  ;;  %v3418_v30 = vrot.slane %v3410_v6, %v7099_v29  ;;  %v3434_v57 = vrot.slane %v3426_v28, %v7099_v29 }
 0xeff   :  { %v7664_v31 = vrot.slane %v3746_v55, %v7096_v22  ;;  %v3761_v33 = vrot.slane %v5854_v63, %v7096_v22  ;;  %v3742_v56 = vcombine.low %v3718_v19, %v3734_v38  ;;  %v3743_v12 = vcombine.high %v3718_v19, %v3734_v38 }
 0xf00   :  { %v3769_v36 = vrot.slane %v3762_v59, %v7096_v22  ;;  %v3777_v42 = vrot.slane %v5855_v11, %v7096_v22  ;;  %v3366_v43 = vrot.slane %v3358_v24, %v7099_v29  ;;  %v3373_v44 = vrot.slane %v3359_v25, %v7099_v29 }
 0xf01   :  { %v3814_v45 = vpack.c.bf16 %v3742_v56, %v3742_v56  ;;  %v3815_v46 = vpack.c.bf16 %v3743_v12, %v3743_v12  ;;  %v3711_v53 = vcombine.high %v3685_v49, %v3693_v4  ;;  %v3727_v47 = vcombine.high %v3701_v20, %v3709_v51 }
 0xf02   :  { %v3446_v48 = vcombine.low %v3350_v62, %v3357_v5  ;;  %v5850_v15 = vcombine.high %v3350_v62, %v3357_v5  ;;  %v3442_v32 = vcombine.low %v3418_v30, %v3434_v57  ;;  %v3443_v9 = vcombine.high %v3418_v30, %v3434_v57 }
 0xf03   :  { %v4126_v26 = vsel %vm1502_vm13, %v3814_v45, 0  ;;  %v4172_v37 = vsel %vm1502_vm13, %v3815_v46, 0  ;;  %v3725_v40 = vrot.slane %v3711_v53, %v7099_v29  ;;  %v3741_v60 = vrot.slane %v3727_v47, %v7099_v29 }
 0xf04   :  { %v3462_v23 = vcombine.low %v3366_v43, %v3373_v44  ;;  %v5851_v52 = vcombine.high %v3366_v43, %v3373_v44  ;;  %6273 = vmatpush3.bf16.xpose.msra.mxu1 %v4126_v26  ;;  %6279 = vmatpush3.bf16.xpose.msra.mxu0 %v4172_v37  ;;  %v3778_v58 = vcombine.low %v7664_v31, %v3761_v33 }
 0xf05   :  { %6284 = vmatprep.subr.bf16.mxu1 %v6798_v41  ;;  %6290 = vmatprep.subr.bf16.mxu0 %v6798_v41  ;;  %v3744_v49 = vcombine.low %v3725_v40, %v3741_v60  ;;  %v3745_v4 = vcombine.high %v3725_v40, %v3741_v60  ;;  %v3794_v20 = vcombine.low %v3769_v36, %v3777_v42 }
 0xf06   :  { %v3786_v54 = vrot.slane %v3778_v58, %v7099_v29  ;;  %v3453_v1 = vrot.slane %v3446_v48, %v7096_v22  ;;  %v3461_v16 = vrot.slane %v5850_v15, %v7096_v22  ;;  %v3514_v8 = vpack.c.bf16 %v3442_v32, %v3442_v32 }
 0xf07   :  { %v3816_v51 = vpack.c.bf16 %v3744_v49, %v3744_v49  ;;  %v3817_v17 = vpack.c.bf16 %v3745_v4, %v3745_v4  ;;  %v3802_v2 = vrot.slane %v3794_v20, %v7099_v29  ;;  %v3515_v50 = vpack.c.bf16 %v3443_v9, %v3443_v9 }
 0xf08   :  { %v3469_v3 = vrot.slane %v3462_v23, %v7096_v22  ;;  %v3477_v6 = vrot.slane %v5851_v52, %v7096_v22  ;;  %v3425_v28 = vrot.slane %v3411_v13, %v7099_v29  ;;  %v3441_v10 = vrot.slane %v3427_v27, %v7099_v29 }
 0xf09   :  { %v3779_v18 = vcombine.high %v7664_v31, %v3761_v33  ;;  %v3795_v55 = vcombine.high %v3769_v36, %v3777_v42  ;;  %v4218_v63 = vsel %vm1502_vm13, %v3816_v51, 0  ;;  %v4264_v61 = vsel %vm1502_vm13, %v3817_v17, 0 }
 0xf0a   :  { %v3810_v21 = vcombine.low %v3786_v54, %v3802_v2  ;;  %v3811_v59 = vcombine.high %v3786_v54, %v3802_v2  ;;  %v3478_v11 = vcombine.low %v3453_v1, %v3461_v16  ;;  %v3494_v24 = vcombine.low %v3469_v3, %v3477_v6 }
 0xf0b   :  { %6275 = vmatmul.mubr.msk.bf16.vlgmr.msra.gmra.mrb[48].mxu1 %vm1502_vm13, %v3514_v8  ;;  %6281 = vmatmul.mubr.msk.bf16.vlgmr.msra.gmra.mrb[60].mxu0 %vm1502_vm13, %v3515_v50  ;;  %v3444_v25 = vcombine.low %v3425_v28, %v3441_v10  ;;  %v3445_v13 = vcombine.high %v3425_v28, %v3441_v10  ;;  %v3793_v38 = vrot.slane %v3779_v18, %v7099_v29 }
 0xf0c   :  { %6285 = vmatpush3.bf16.xpose.msra.mxu1 %v4218_v63  ;;  %6291 = vmatpush3.bf16.xpose.msra.mxu0 %v4264_v61  ;;  %v3818_v27 = vpack.c.bf16 %v3810_v21, %v3810_v21  ;;  %v3819_v19 = vpack.c.bf16 %v3811_v59, %v3811_v59  ;;  %v3809_v62 = vrot.slane %v3795_v55, %v7099_v29 }
 0xf0d   :  { %6286 = vmatprep.mubr.msk.bf16.mxu1 %vm6800_vm8, %v6798_v41  ;;  %6292 = vmatprep.mubr.msk.bf16.mxu0 %vm6800_vm8, %v6798_v41  ;;  %v3516_v5 = vpack.c.bf16 %v3444_v25, %v3444_v25  ;;  %v3517_v30 = vpack.c.bf16 %v3445_v13, %v3445_v13  ;;  %v3486_v57 = vrot.slane %v3478_v11, %v7099_v29 }
 0xf0e   :  { %6296 = vmatprep.subr.bf16.mxu1 %v6798_v41  ;;  %6302 = vmatprep.subr.bf16.mxu0 %v6798_v41  ;;  %v3502_v31 = vrot.slane %v3494_v24, %v7099_v29  ;;  %v4310_v33 = vsel %vm1502_vm13, %v3818_v27, 0  ;;  %v4356_v56 = vsel %vm1502_vm13, %v3819_v19, 0  ;;  %v3812_v12 = vcombine.low %v3793_v38, %v3809_v62 }
 0xf0f   :  { %v3813_v36 = vcombine.high %v3793_v38, %v3809_v62  ;;  %v3479_v42 = vcombine.high %v3453_v1, %v3461_v16  ;;  %v3495_v43 = vcombine.high %v3469_v3, %v3477_v6 }
 0xf10   :  { %v3510_v44 = vcombine.low %v3486_v57, %v3502_v31  ;;  %v3511_v45 = vcombine.high %v3486_v57, %v3502_v31  ;;  %v3820_v46 = vpack.c.bf16 %v3812_v12, %v3812_v12 }
 0xf11   :  { %v3821_v53 = vpack.c.bf16 %v3813_v36, %v3813_v36  ;;  %v3493_v15 = vrot.slane %v3479_v42, %v7099_v29  ;;  %v3509_v32 = vrot.slane %v3495_v43, %v7099_v29 }
 0xf12   :  { %v3518_v47 = vpack.c.bf16 %v3510_v44, %v3510_v44  ;;  %v3519_v48 = vpack.c.bf16 %v3511_v45, %v3511_v45  ;;  %v4402_v9 = vsel %vm1502_vm13, %v3820_v46, 0 }
 0xf13   :  { %6287 = vmatmul.mubr.msk.bf16.vlgmr.msra.gmra.mrb[52].mxu1 %vm1502_vm13, %v3516_v5  ;;  %6293 = vmatmul.mubr.msk.bf16.vlgmr.msra.gmra.mrb[64].mxu0 %vm1502_vm13, %v3517_v30  ;;  %v4448_v26 = vsel %vm1502_vm13, %v3821_v53, 0  ;;  %v3512_v37 = vcombine.low %v3493_v15, %v3509_v32  ;;  %v3513_v40 = vcombine.high %v3493_v15, %v3509_v32 }
 0xf14   :  { %6297 = vmatpush3.bf16.xpose.msra.mxu1 %v4310_v33  ;;  %6303 = vmatpush3.bf16.xpose.msra.mxu0 %v4356_v56 }
 0xf15   :  { %6298 = vmatprep.mubr.msk.bf16.mxu1 %vm6800_vm8, %v6798_v41  ;;  %6304 = vmatprep.mubr.msk.bf16.mxu0 %vm6800_vm8, %v6798_v41  ;;  %v3520_v60 = vpack.c.bf16 %v3512_v37, %v3512_v37  ;;  %v3521_v23 = vpack.c.bf16 %v3513_v40, %v3513_v40 }
 0xf16   :  { %6308 = vmatprep.subr.bf16.mxu1 %v6798_v41  ;;  %6314 = vmatprep.subr.bf16.mxu0 %v6798_v41 }
 0xf1b   :  { %6299 = vmatmul.mubr.msk.bf16.vlgmr.msra.gmra.mrb[56].mxu1 %vm1502_vm13, %v3518_v47  ;;  %6305 = vmatmul.mubr.msk.bf16.vlgmr.msra.gmra.mrb[68].mxu0 %vm1502_vm13, %v3519_v48 }
 0xf1c   :  { %6309 = vmatpush3.bf16.xpose.msra.mxu1 %v4402_v9  ;;  %6315 = vmatpush3.bf16.xpose.msra.mxu0 %v4448_v26 }
 0xf1d   :  { %6310 = vmatprep.mubr.msk.bf16.mxu1 %vm6800_vm8, %v6798_v41  ;;  %6316 = vmatprep.mubr.msk.bf16.mxu0 %vm6800_vm8, %v6798_v41 }
 0xf1e   :  { %6320 = vmatprep.subr.bf16.mxu1 %v6798_v41  ;;  %6326 = vmatprep.subr.bf16.mxu0 %v6798_v41 }
 0xf23   :  { %6311 = vmatmul.mubr.msk.bf16.vlgmr.msra.gmra.mrb[60].mxu1 %vm1502_vm13, %v3520_v60  ;;  %6317 = vmatmul.mubr.msk.bf16.vlgmr.msra.gmra.mrb[72].mxu0 %vm1502_vm13, %v3521_v23 }
 0xf24   :  { %6322 = vmatprep.mubr.msk.bf16.mxu1 %vm6800_vm8, %v6798_v41  ;;  %6328 = vmatprep.mubr.msk.bf16.mxu0 %vm6800_vm8, %v6798_v41 }
 0xfde   :  { %v4162_v52 = vpop.f32.mrb[48].mxu1  ;;  %v4208_v58 = vpop.f32.mrb[60].mxu0 }
 0xfdf   :  { %v4490_v49 = vmul.f32 0.35355338, %v4162_v52  ;;  %v4491_v4 = vmul.f32 0.35355338, %v4208_v58  ;;  %v6276_v20 = vpop.f32.mrb[49].mxu1  ;;  %v6282_v51 = vpop.f32.mrb[61].mxu0 }
 0xfe0   :  { %v4165_v17 = vpop.f32.mrb[50].mxu1  ;;  %v4211_v54 = vpop.f32.mrb[62].mxu0 }
 0xfe1   :  { %v6277_v2 = vpop.f32.mrb[51].mxu1  ;;  %v6283_v1 = vpop.f32.mrb[63].mxu0  ;;  %v4498_v16 = vadd.f32 %v4490_v49, %v7246_v39  ;;  %v4499_v8 = vadd.f32 %v4491_v4, %v7246_v39 }
 0xfe3   :  { %v4506_v50 = vsel %vm1502_vm13, %v4498_v16, -inf  ;;  %v4509_v3 = vsel %vm1502_vm13, %v4499_v8, -inf }
 0xfe4   :  { %4507 = vmax.xlane.f32.xlu1 %v4506_v50  ;;  %4510 = vmax.xlane.f32.xlu0 %v4509_v3 }
 0xfe6   :  { %v4254_v6 = vpop.f32.mrb[52].mxu1  ;;  %v4300_v28 = vpop.f32.mrb[64].mxu0 }
 0xfe7   :  { %v4492_v10 = vmul.f32 0.35355338, %v4254_v6  ;;  %v4493_v18 = vmul.f32 0.35355338, %v4300_v28  ;;  %v6288_v55 = vpop.f32.mrb[53].mxu1  ;;  %v6294_v63 = vpop.f32.mrb[65].mxu0 }
 0xfe8   :  { %v4257_v61 = vpop.f32.mrb[54].mxu1  ;;  %v4303_v21 = vpop.f32.mrb[66].mxu0 }
 0xfe9   :  { %v6289_v59 = vpop.f32.mrb[55].mxu1  ;;  %v6295_v11 = vpop.f32.mrb[67].mxu0  ;;  %v4500_v24 = vadd.f32 %v4492_v10, %v7246_v39  ;;  %v4501_v25 = vadd.f32 %v4493_v18, %v7246_v39 }
 0xfeb   :  { %v4512_v13 = vsel %vm1502_vm13, %v4500_v24, -inf  ;;  %v4515_v27 = vsel %vm1502_vm13, %v4501_v25, -inf }
 0xfec   :  { %4513 = vmax.xlane.f32.xlu0 %v4512_v13  ;;  %4516 = vmax.xlane.f32.xlu1 %v4515_v27 }
 0xfee   :  { %v4346_v19 = vpop.f32.mrb[56].mxu1  ;;  %v4392_v38 = vpop.f32.mrb[68].mxu0 }
 0xfef   :  { %v4494_v62 = vmul.f32 0.35355338, %v4346_v19  ;;  %v4495_v5 = vmul.f32 0.35355338, %v4392_v38  ;;  %v6300_v30 = vpop.f32.mrb[57].mxu1  ;;  %v6306_v57 = vpop.f32.mrb[69].mxu0 }
 0xff0   :  { %v4349_v31 = vpop.f32.mrb[58].mxu1  ;;  %v4395_v33 = vpop.f32.mrb[70].mxu0 }
 0xff1   :  { %v6301_v56 = vpop.f32.mrb[59].mxu1  ;;  %v6307_v12 = vpop.f32.mrb[71].mxu0  ;;  %v4502_v36 = vadd.f32 %v4494_v62, %v7246_v39  ;;  %v4503_v42 = vadd.f32 %v4495_v5, %v7246_v39 }
 0xff3   :  { %v4518_v43 = vsel %vm1502_vm13, %v4502_v36, -inf  ;;  %v4521_v44 = vsel %vm1502_vm13, %v4503_v42, -inf }
 0xff4   :  { %4519 = vmax.xlane.f32.xlu0 %v4518_v43  ;;  %4522 = vmax.xlane.f32.xlu1 %v4521_v44 }
 0xff6   :  { %v4438_v45 = vpop.f32.mrb[60].mxu1  ;;  %v4484_v46 = vpop.f32.mrb[72].mxu0 }
 0xff7   :  { %v4496_v53 = vmul.f32 0.35355338, %v4438_v45  ;;  %v6312_v47 = vpop.f32.mrb[61].mxu1  ;;  %v6318_v48 = vpop.f32.mrb[73].mxu0  ;;  %v4497_v60 = vmul.f32 0.35355338, %v4484_v46 }
 0xff8   :  { %v4441_v15 = vpop.f32.mrb[62].mxu1  ;;  %v4487_v32 = vpop.f32.mrb[74].mxu0 }
 0xff9   :  { %v6313_v9 = vpop.f32.mrb[63].mxu1  ;;  %v6319_v26 = vpop.f32.mrb[75].mxu0  ;;  %v7742_v37 = vadd.f32 %v4496_v53, %v7246_v39  ;;  %v7753_v23 = vadd.f32 %v4497_v60, %v7246_v39 }
 0xffb   :  { %v4524_v40 = vsel %vm1502_vm13, %v7742_v37, -inf  ;;  %v4527_v52 = vsel %vm1502_vm13, %v7753_v23, -inf }
 0xffc   :  { %4525 = vmax.xlane.f32.xlu0 %v4524_v40 }
0x1005   :  { %3830 = vrot.lane.b32.xlu1 %v7583_v34, %s6801_s27 }
0x1009   :  { %3836 = vrot.lane.b32.xlu1 %v7583_v34, %s6803_s8 }
0x1012   :  { %3824 = vrot.lane.b32.xlu0 %v7583_v34, %s6802_s24 }
0x102d   :  { %4528 = vmax.xlane.f32.xlu1 %v4527_v52 }
0x103e   :  { %3826 = vrot.lane.b32.xlu1 %v7587_v35, %s6802_s24 }
0x1071   :  { %v4508_v58 = vpop.xlane.xlu1 %4507  ;;  %v4511_v49 = vpop.xlane.xlu0 %4510 }
0x1072   :  { %v4530_v4 = vsub.f32 %v4498_v16, %v4508_v58  ;;  %v4531_v20 = vsub.f32 %v4499_v8, %v4511_v49 }
0x1074   :  { %v4538_v51 = vmul.f32 1.442695, %v4530_v4  ;;  %v4540_v17 = vmul.f32 1.442695, %v4531_v20 }
0x1076   :  { %6596 = vpow2.f32 %v4538_v51 }
0x1077   :  { %6598 = vpow2.f32 %v4540_v17 }
0x1079   :  { %v4514_v54 = vpop.xlane.xlu0 %4513  ;;  %v4517_v2 = vpop.xlane.xlu1 %4516 }
0x107a   :  { %v4532_v1 = vsub.f32 %v4500_v24, %v4514_v54  ;;  %v4533_v39 = vsub.f32 %v4501_v25, %v4517_v2 }
0x107c   :  { %v4542_v50 = vmul.f32 1.442695, %v4532_v1  ;;  %v4544_v3 = vmul.f32 1.442695, %v4533_v39 }
0x107e   :  { %6600 = vpow2.f32 %v4542_v50 }
0x107f   :  { %6602 = vpow2.f32 %v4544_v3 }
0x1080   :  { %v7759_v6 = vpop.eup %6596 }
0x1081   :  { %v7761_v28 = vpop.eup %6598  ;;  %v4520_v10 = vpop.xlane.xlu0 %4519  ;;  %v4554_v16 = vsel %vm1502_vm13, %v7759_v6, 0.0 }
0x1082   :  { %v4523_v18 = vpop.xlane.xlu1 %4522  ;;  %v4534_v8 = vsub.f32 %v4502_v36, %v4520_v10  ;;  %4555 = vadd.xlane.f32.xlu0 %v4554_v16  ;;  %v4557_v63 = vsel %vm1502_vm13, %v7761_v28, 0.0 }
0x1083   :  { %v4535_v55 = vsub.f32 %v4503_v42, %v4523_v18  ;;  %4558 = vadd.xlane.f32.xlu1 %v4557_v63 }
0x1084   :  { %v4546_v61 = vmul.f32 1.442695, %v4534_v8 }
0x1085   :  { %v4548_v21 = vmul.f32 1.442695, %v4535_v55 }
0x1086   :  { %6604 = vpow2.f32 %v4546_v61  ;;  %v3831_v59 = vpop.permute.xlu1 %3830 }
0x1087   :  { %6606 = vpow2.f32 %v4548_v21  ;;  %v3842_v19 = vcombine.low %v7583_v34, %v3831_v59  ;;  %v3843_v38 = vcombine.high %v7583_v34, %v3831_v59 }
0x1088   :  { %v7767_v11 = vpop.eup %6600 }
0x1089   :  { %v7769_v24 = vpop.eup %6602  ;;  %v4526_v25 = vpop.xlane.xlu0 %4525  ;;  %v4560_v13 = vsel %vm1502_vm13, %v7767_v11, 0.0  ;;  %v3850_v33 = vrot.slane %v3842_v19, %v7096_v22  ;;  %v3857_v56 = vrot.slane %v3843_v38, %v7096_v22 }
0x108a   :  { %4561 = vadd.xlane.f32.xlu0 %v4560_v13  ;;  %v4563_v27 = vsel %vm1502_vm13, %v7769_v24, 0.0  ;;  %v3837_v62 = vpop.permute.xlu1 %3836  ;;  %v4536_v21 = vsub.f32 %v7742_v37, %v4526_v25 }
0x108b   :  { %4564 = vadd.xlane.f32.xlu1 %v4563_v27 }
0x108c   :  { %v4550_v59 = vmul.f32 1.442695, %v4536_v21 }
0x108d   :  { %v3825_v5 = vpop.permute.xlu0 %3824 }
0x108e   :  { %v3858_v30 = vcombine.low %v3825_v5, %v3837_v62  ;;  %v3859_v57 = vcombine.high %v3825_v5, %v3837_v62  ;;  %6608 = vpow2.f32 %v4550_v59 }
0x1090   :  { %v7777_v31 = vpop.eup %6604  ;;  %v3866_v12 = vrot.slane %v3858_v30, %v7096_v22  ;;  %v3873_v36 = vrot.slane %v3859_v57, %v7096_v22 }
0x1091   :  { %v4566_v42 = vsel %vm1502_vm13, %v7777_v31, 0.0  ;;  %v7785_v43 = vpop.eup %6606 }
0x1092   :  { %v3874_v34 = vcombine.low %v3850_v33, %v3866_v12  ;;  %v3875_v44 = vcombine.high %v3850_v33, %v3866_v12  ;;  %v3890_v45 = vcombine.low %v3857_v56, %v3873_v36  ;;  %v3891_v46 = vcombine.high %v3857_v56, %v3873_v36  ;;  %4567 = vadd.xlane.f32.xlu0 %v4566_v42 }
0x1093   :  { %v4569_v32 = vsel %vm1502_vm13, %v7785_v43, 0.0 }
0x1094   :  { %v3882_v53 = vrot.slane %v3874_v34, %v7099_v29  ;;  %v3889_v47 = vrot.slane %v3875_v44, %v7099_v29  ;;  %v3898_v48 = vrot.slane %v3890_v45, %v7099_v29  ;;  %v3905_v15 = vrot.slane %v3891_v46, %v7099_v29 }
0x1096   :  { %v3978_v9 = vcombine.low %v3882_v53, %v3889_v47  ;;  %v5856_v26 = vcombine.high %v3882_v53, %v3889_v47  ;;  %v3994_v40 = vcombine.low %v3898_v48, %v3905_v15  ;;  %v5857_v60 = vcombine.high %v3898_v48, %v3905_v15  ;;  %4570 = vadd.xlane.f32.xlu0 %v4569_v32 }
0x1098   :  { %v3985_v52 = vrot.slane %v3978_v9, %v7096_v22  ;;  %v3993_v58 = vrot.slane %v5856_v26, %v7096_v22  ;;  %v4001_v49 = vrot.slane %v3994_v40, %v7096_v22  ;;  %v4009_v4 = vrot.slane %v5857_v60, %v7096_v22  ;;  %v7811_v19 = vpop.eup %6608 }
0x1099   :  { %v4572_v62 = vsel %vm1502_vm13, %v7811_v19, 0.0 }
0x109a   :  { %v4010_v20 = vcombine.low %v3985_v52, %v3993_v58  ;;  %v4026_v51 = vcombine.low %v4001_v49, %v4009_v4  ;;  %v4011_v17 = vcombine.high %v3985_v52, %v3993_v58  ;;  %v4027_v54 = vcombine.high %v4001_v49, %v4009_v4 }
0x109c   :  { %3838 = vrot.lane.b32.xlu1 %v7587_v35, %s6803_s8  ;;  %v4018_v2 = vrot.slane %v4010_v20, %v7099_v29  ;;  %v4034_v1 = vrot.slane %v4026_v51, %v7099_v29  ;;  %v4025_v39 = vrot.slane %v4011_v17, %v7099_v29  ;;  %v4041_v50 = vrot.slane %v4027_v54, %v7099_v29 }
0x109e   :  { %v4042_v3 = vcombine.low %v4018_v2, %v4034_v1  ;;  %v4043_v10 = vcombine.high %v4018_v2, %v4034_v1  ;;  %v4044_v18 = vcombine.low %v4025_v39, %v4041_v50  ;;  %v4045_v16 = vcombine.high %v4025_v39, %v4041_v50 }
0x10a0   :  { %v4114_v8 = vpack.c.bf16 %v4042_v3, %v4042_v3  ;;  %v4115_v55 = vpack.c.bf16 %v4043_v10, %v4043_v10  ;;  %v4116_v42 = vpack.c.bf16 %v4044_v18, %v4044_v18  ;;  %v4117_v44 = vpack.c.bf16 %v4045_v16, %v4045_v16 }
0x10a2   :  { %v4606_v63 = vsel %vm1986_vm15, %v4114_v8, 0  ;;  %v4652_v61 = vsel %vm1986_vm15, %v4115_v55, 0  ;;  %v4698_v47 = vsel %vm1986_vm15, %v4116_v42, 0  ;;  %v4744_v48 = vsel %vm1986_vm15, %v4117_v44, 0 }
0x10a3   :  { %6321 = vmatpush3.bf16.msra.mxu1 %v4606_v63  ;;  %6327 = vmatpush3.bf16.msra.mxu0 %v4652_v61 }
0x10a4   :  { %6332 = vmatprep.subr.bf16.mxu1 %v6798_v41  ;;  %6338 = vmatprep.subr.bf16.mxu0 %v6798_v41 }
0x10ac   :  { %3832 = vrot.lane.b32.xlu0 %v7587_v35, %s6801_s27 }
0x10ba   :  { %v4529_v13 = vpop.xlane.xlu1 %4528 }
0x10bb   :  { %v4537_v27 = vsub.f32 %v7753_v23, %v4529_v13 }
0x10bd   :  { %v4552_v38 = vmul.f32 1.442695, %v4537_v27 }
0x10be   :  { %v3827_v25 = vpop.permute.xlu1 %3826 }
0x10bf   :  { %6610 = vpow2.f32 %v4552_v38 }
0x10c0   :  { %4573 = vadd.xlane.f32.xlu1 %v4572_v62 }
0x10c9   :  { %v7815_v5 = vpop.eup %6610 }
0x10ca   :  { %v4575_v37 = vsel %vm1502_vm13, %v7815_v5, 0.0 }
0x10cb   :  { %4576 = vadd.xlane.f32.xlu0 %v4575_v37 }
0x110f   :  { %v4556_v30 = vpop.xlane.xlu0 %4555 }
0x1110   :  { %6612 = vrcp.f32 %v4556_v30  ;;  %v4559_v57 = vpop.xlane.xlu1 %4558 }
0x1111   :  { %6614 = vrcp.f32 %v4559_v57 }
0x1117   :  { %v4562_v23 = vpop.xlane.xlu0 %4561 }
0x1118   :  { %6616 = vrcp.f32 %v4562_v23  ;;  %v4565_v33 = vpop.xlane.xlu1 %4564 }
0x1119   :  { %6618 = vrcp.f32 %v4565_v33 }
0x111a   :  { %v6613_v56 = vpop.eup %6612 }
0x111b   :  { %v6615_v12 = vpop.eup %6614  ;;  %v4586_v36 = vmul.f32 %v6613_v56, %v7759_v6 }
0x111c   :  { %v4587_v34 = vmul.f32 %v6615_v12, %v7761_v28  ;;  %v3839_v32 = vpop.permute.xlu1 %3838 }
0x111d   :  { %v4594_v45 = vpack.c.bf16 %v4586_v36, %v4586_v36  ;;  %v3926_v60 = vcombine.low %v3827_v25, %v3839_v32  ;;  %v3927_v52 = vcombine.high %v3827_v25, %v3839_v32 }
0x111e   :  { %v4595_v46 = vpack.c.bf16 %v4587_v34, %v4587_v34 }
0x111f   :  { %v4568_v53 = vpop.xlane.xlu0 %4567  ;;  %6323 = vmatmul.mubr.msk.bf16.vlgmr.msra.gmra.mrb[64].mxu1 %vm1502_vm13, %v4594_v45 }
0x1120   :  { %6329 = vmatmul.mubr.msk.bf16.vlgmr.msra.gmra.mrb[76].mxu0 %vm1502_vm13, %v4595_v46  ;;  %6333 = vmatpush3.bf16.msra.mxu1 %v4698_v47  ;;  %6620 = vrcp.f32 %v4568_v53 }
0x1121   :  { %6339 = vmatpush3.bf16.msra.mxu0 %v4744_v48  ;;  %6334 = vmatprep.mubr.msk.bf16.mxu1 %vm6800_vm8, %v6798_v41 }
0x1122   :  { %v6617_v6 = vpop.eup %6616  ;;  %6340 = vmatprep.mubr.msk.bf16.mxu0 %vm6800_vm8, %v6798_v41  ;;  %6344 = vmatprep.subr.bf16.mxu1 %v6798_v41 }
0x1123   :  { %v6619_v28 = vpop.eup %6618  ;;  %v4588_v15 = vmul.f32 %v6617_v6, %v7767_v11  ;;  %v4571_v9 = vpop.xlane.xlu0 %4570  ;;  %6350 = vmatprep.subr.bf16.mxu0 %v6798_v41  ;;  %v3934_v11 = vrot.slane %v3926_v60, %v7096_v22 }
0x1124   :  { %v4589_v26 = vmul.f32 %v6619_v28, %v7769_v24  ;;  %v3941_v24 = vrot.slane %v3927_v52, %v7096_v22  ;;  %6622 = vrcp.f32 %v4571_v9 }
0x1125   :  { %v4596_v40 = vpack.c.bf16 %v4588_v15, %v4588_v15 }
0x1126   :  { %v4597_v58 = vpack.c.bf16 %v4589_v26, %v4589_v26 }
0x1127   :  { %v3833_v49 = vpop.permute.xlu0 %3832  ;;  %6335 = vmatmul.mubr.msk.bf16.vlgmr.msra.gmra.mrb[68].mxu1 %vm1502_vm13, %v4596_v40 }
0x1128   :  { %v3910_v4 = vcombine.low %v7587_v35, %v3833_v49  ;;  %v3911_v20 = vcombine.high %v7587_v35, %v3833_v49  ;;  %6341 = vmatmul.mubr.msk.bf16.vlgmr.msra.gmra.mrb[80].mxu0 %vm1502_vm13, %v4597_v58  ;;  %6346 = vmatprep.mubr.msk.bf16.mxu1 %vm6800_vm8, %v6798_v41 }
0x1129   :  { %6352 = vmatprep.mubr.msk.bf16.mxu0 %vm6800_vm8, %v6798_v41 }
0x112a   :  { %v3918_v51 = vrot.slane %v3910_v4, %v7096_v22  ;;  %v3925_v17 = vrot.slane %v3911_v20, %v7096_v22  ;;  %v6621_v37 = vpop.eup %6620 }
0x112b   :  { %v4590_v34 = vmul.f32 %v6621_v37, %v7777_v31 }
0x112c   :  { %v3942_v54 = vcombine.low %v3918_v51, %v3934_v11  ;;  %v3943_v2 = vcombine.high %v3918_v51, %v3934_v11  ;;  %v3958_v35 = vcombine.low %v3925_v17, %v3941_v24  ;;  %v3959_v1 = vcombine.high %v3925_v17, %v3941_v24 }
0x112d   :  { %v4598_v28 = vpack.c.bf16 %v4590_v34, %v4590_v34 }
0x112e   :  { %v3950_v39 = vrot.slane %v3942_v54, %v7099_v29  ;;  %v3957_v50 = vrot.slane %v3943_v2, %v7099_v29  ;;  %v3966_v3 = vrot.slane %v3958_v35, %v7099_v29  ;;  %v3973_v10 = vrot.slane %v3959_v1, %v7099_v29  ;;  %v6623_v33 = vpop.eup %6622 }
0x112f   :  { %v4591_v44 = vmul.f32 %v6623_v33, %v7785_v43 }
0x1130   :  { %v4046_v18 = vcombine.low %v3950_v39, %v3957_v50  ;;  %v5858_v16 = vcombine.high %v3950_v39, %v3957_v50  ;;  %v4062_v8 = vcombine.low %v3966_v3, %v3973_v10  ;;  %v5859_v55 = vcombine.high %v3966_v3, %v3973_v10 }
0x1131   :  { %v4599_v15 = vpack.c.bf16 %v4591_v44, %v4591_v44 }
0x1132   :  { %v4053_v63 = vrot.slane %v4046_v18, %v7096_v22  ;;  %v4061_v61 = vrot.slane %v5858_v16, %v7096_v22  ;;  %v4069_v21 = vrot.slane %v4062_v8, %v7096_v22  ;;  %v4077_v59 = vrot.slane %v5859_v55, %v7096_v22 }
0x1134   :  { %v4078_v13 = vcombine.low %v4053_v63, %v4061_v61  ;;  %v4094_v27 = vcombine.low %v4069_v21, %v4077_v59  ;;  %v4079_v38 = vcombine.high %v4053_v63, %v4061_v61  ;;  %v4095_v62 = vcombine.high %v4069_v21, %v4077_v59 }
0x1136   :  { %v4086_v25 = vrot.slane %v4078_v13, %v7099_v29  ;;  %v4102_v30 = vrot.slane %v4094_v27, %v7099_v29  ;;  %v4093_v57 = vrot.slane %v4079_v38, %v7099_v29  ;;  %v4109_v23 = vrot.slane %v4095_v62, %v7099_v29 }
0x1138   :  { %v4110_v56 = vcombine.low %v4086_v25, %v4102_v30  ;;  %v4111_v12 = vcombine.high %v4086_v25, %v4102_v30  ;;  %v4112_v36 = vcombine.low %v4093_v57, %v4109_v23  ;;  %v4113_v42 = vcombine.high %v4093_v57, %v4109_v23 }
0x113a   :  { %v4118_v45 = vpack.c.bf16 %v4110_v56, %v4110_v56  ;;  %v4119_v46 = vpack.c.bf16 %v4111_v12, %v4111_v12  ;;  %v4120_v48 = vpack.c.bf16 %v4112_v36, %v4112_v36  ;;  %v4121_v6 = vpack.c.bf16 %v4113_v42, %v4113_v42 }
0x113c   :  { %v4790_v53 = vsel %vm1986_vm15, %v4118_v45, 0  ;;  %v4836_v47 = vsel %vm1986_vm15, %v4119_v46, 0  ;;  %v4882_v31 = vsel %vm1986_vm15, %v4120_v48, 0  ;;  %v4928_v43 = vsel %vm1986_vm15, %v4121_v6, 0 }
0x113d   :  { %6345 = vmatpush3.bf16.msra.mxu1 %v4790_v53  ;;  %6351 = vmatpush3.bf16.msra.mxu0 %v4836_v47 }
0x113e   :  { %6356 = vmatprep.subr.bf16.mxu1 %v6798_v41  ;;  %6362 = vmatprep.subr.bf16.mxu0 %v6798_v41 }
0x1140   :  { %6347 = vmatmul.mubr.msk.bf16.vlgmr.msra.gmra.mrb[72].mxu1 %vm1502_vm13, %v4598_v28  ;;  %6353 = vmatmul.mubr.msk.bf16.vlgmr.msra.gmra.mrb[84].mxu0 %vm1502_vm13, %v4599_v15 }
0x1141   :  { %6357 = vmatpush3.bf16.msra.mxu1 %v4882_v31  ;;  %6363 = vmatpush3.bf16.msra.mxu0 %v4928_v43 }
0x1142   :  { %6358 = vmatprep.mubr.msk.bf16.mxu1 %vm6800_vm8, %v6798_v41  ;;  %6364 = vmatprep.mubr.msk.bf16.mxu0 %vm6800_vm8, %v6798_v41 }
0x1143   :  { %6368 = vmatprep.subr.bf16.mxu1 %v6798_v41  ;;  %6376 = vmatprep.subr.bf16.mxu0 %v6798_v41 }
0x114d   :  { %v4574_v32 = vpop.xlane.xlu1 %4573 }
0x114e   :  { %6624 = vrcp.f32 %v4574_v32 }
0x1158   :  { %v6625_v9 = vpop.eup %6624  ;;  %v4577_v26 = vpop.xlane.xlu0 %4576 }
0x1159   :  { %v4592_v40 = vmul.f32 %v6625_v9, %v7811_v19  ;;  %6626 = vrcp.f32 %v4577_v26 }
0x115b   :  { %v4600_v60 = vpack.c.bf16 %v4592_v40, %v4592_v40 }
0x115d   :  { %6359 = vmatmul.mubr.msk.bf16.vlgmr.msra.gmra.mrb[76].mxu1 %vm1502_vm13, %v4600_v60 }
0x115e   :  { %6372 = vmatprep.mubr.msk.bf16.mxu1 %vm6800_vm8, %v6798_v41 }
0x1163   :  { %v6627_v52 = vpop.eup %6626 }
0x1164   :  { %v4593_v58 = vmul.f32 %v6627_v52, %v7815_v5 }
0x1166   :  { %v4601_v49 = vpack.c.bf16 %v4593_v58, %v4593_v58 }
0x1168   :  { %6365 = vmatmul.mubr.msk.bf16.vlgmr.msra.gmra.mrb[88].mxu0 %vm1502_vm13, %v4601_v49 }
0x1169   :  { %6380 = vmatprep.mubr.msk.bf16.mxu0 %vm6800_vm8, %v6798_v41 }
0x11f2   :  { %v4642_v4 = vpop.f32.mrb[64].mxu1 }
0x11f3   :  { %v4688_v20 = vpop.f32.mrb[76].mxu0  ;;  %v6324_v11 = vpop.f32.mrb[65].mxu1 }
0x11f4   :  { %v6330_v19 = vpop.f32.mrb[77].mxu0  ;;  %v4645_v24 = vpop.f32.mrb[66].mxu1 }
0x11f5   :  { %v4691_v51 = vpop.f32.mrb[78].mxu0  ;;  %v6325_v17 = vpop.f32.mrb[67].mxu1 }
0x11f6   :  { %v6331_v54 = vpop.f32.mrb[79].mxu0 }
0x11fa   :  { %v4734_v2 = vpop.f32.mrb[68].mxu1 }
0x11fb   :  { %v4970_v35 = vcombine.low %v4642_v4, %v4734_v2  ;;  %v4971_v1 = vcombine.high %v4642_v4, %v4734_v2  ;;  %v4780_v39 = vpop.f32.mrb[80].mxu0  ;;  %v6336_v50 = vpop.f32.mrb[69].mxu1 }
0x11fc   :  { %v4986_v5 = vcombine.low %v4688_v20, %v4780_v39  ;;  %v4987_v3 = vcombine.high %v4688_v20, %v4780_v39  ;;  %v6342_v10 = vpop.f32.mrb[81].mxu0  ;;  %v4737_v18 = vpop.f32.mrb[70].mxu1 }
0x11fd   :  { %v4978_v16 = vrot.slane %v4970_v35, %v7096_v22  ;;  %v4985_v8 = vrot.slane %v4971_v1, %v7096_v22  ;;  %v4783_v55 = vpop.f32.mrb[82].mxu0  ;;  %v6337_v63 = vpop.f32.mrb[71].mxu1 }
0x11fe   :  { %v4994_v61 = vrot.slane %v4986_v5, %v7096_v22  ;;  %v5001_v21 = vrot.slane %v4987_v3, %v7096_v22  ;;  %v6343_v59 = vpop.f32.mrb[83].mxu0 }
0x1200   :  { %v5002_v13 = vcombine.low %v4978_v16, %v4994_v61  ;;  %v5003_v27 = vcombine.high %v4978_v16, %v4994_v61  ;;  %v5018_v38 = vcombine.low %v4985_v8, %v5001_v21  ;;  %v5019_v62 = vcombine.high %v4985_v8, %v5001_v21 }
0x1202   :  { %v5010_v37 = vrot.slane %v5002_v13, %v7099_v29  ;;  %v5017_v25 = vrot.slane %v5003_v27, %v7099_v29  ;;  %v5026_v30 = vrot.slane %v5018_v38, %v7099_v29  ;;  %v5033_v57 = vrot.slane %v5019_v62, %v7099_v29 }
0x1204   :  { %v5106_v23 = vcombine.low %v5010_v37, %v5017_v25  ;;  %v5876_v33 = vcombine.high %v5010_v37, %v5017_v25  ;;  %v5122_v56 = vcombine.low %v5026_v30, %v5033_v57  ;;  %v5877_v12 = vcombine.high %v5026_v30, %v5033_v57  ;;  %v6518_v30 = vld [vmem:[#allocation10 + $0x10] sm:$0xff]  }
0x1205   :  { %6369 = vmatpush3.bf16.msra.mxu1 %v6518_v30 }
0x1206   :  { %v5113_v36 = vrot.slane %v5106_v23, %v7096_v22  ;;  %v5121_v42 = vrot.slane %v5876_v33, %v7096_v22  ;;  %v5129_v34 = vrot.slane %v5122_v56, %v7096_v22  ;;  %v5137_v44 = vrot.slane %v5877_v12, %v7096_v22  ;;  %6370 = vmatprep.subr.bf16.mxu1 %v6798_v41 }
0x1208   :  { %v5139_v45 = vcombine.high %v5113_v36, %v5121_v42  ;;  %v5155_v46 = vcombine.high %v5129_v34, %v5137_v44  ;;  %v5138_v53 = vcombine.low %v5113_v36, %v5121_v42  ;;  %v5154_v47 = vcombine.low %v5129_v34, %v5137_v44 }
0x120a   :  { %v7894_v48 = vrot.slane %v5139_v45, %v7099_v29  ;;  %v7897_v6 = vrot.slane %v5155_v46, %v7099_v29  ;;  %v7900_v28 = vrot.slane %v5138_v53, %v7099_v29  ;;  %v7903_v15 = vrot.slane %v5154_v47, %v7099_v29  ;;  %v6519_v47 = vld [vmem:[#allocation10 + $0x18] sm:$0xff]  }
0x120b   :  { %6371 = vmatpush3.bf16.msra.mxu1 %v6519_v47 }
0x120c   :  { %v5172_v31 = vcombine.low %v7894_v48, %v7897_v6  ;;  %v5170_v43 = vcombine.low %v7900_v28, %v7903_v15  ;;  %v5171_v32 = vcombine.high %v7900_v28, %v7903_v15  ;;  %v5173_v9 = vcombine.high %v7894_v48, %v7897_v6  ;;  %6384 = vmatprep.subr.bf16.mxu1 %v6798_v41  ;;  %v5881_v28 = vld [vmem:[%s8063_s10 + $0x1] ss:$0 sm:$0xff] }
0x1213   :  { %v4826_v26 = vpop.f32.mrb[72].mxu1  ;;  %v4872_v40 = vpop.f32.mrb[84].mxu0 }
0x1214   :  { %v6348_v60 = vpop.f32.mrb[73].mxu1  ;;  %v6354_v52 = vpop.f32.mrb[85].mxu0 }
0x1215   :  { %v4829_v58 = vpop.f32.mrb[74].mxu1  ;;  %v4875_v49 = vpop.f32.mrb[86].mxu0 }
0x1216   :  { %v6349_v4 = vpop.f32.mrb[75].mxu1  ;;  %v6355_v20 = vpop.f32.mrb[87].mxu0 }
0x1230   :  { %v4918_v11 = vpop.f32.mrb[76].mxu1 }
0x1231   :  { %v5038_v19 = vcombine.low %v4826_v26, %v4918_v11  ;;  %v5039_v24 = vcombine.high %v4826_v26, %v4918_v11  ;;  %v6360_v51 = vpop.f32.mrb[77].mxu1 }
0x1232   :  { %v4921_v17 = vpop.f32.mrb[78].mxu1 }
0x1233   :  { %v6361_v54 = vpop.f32.mrb[79].mxu1  ;;  %v5046_v5 = vrot.slane %v5038_v19, %v7096_v22  ;;  %v5053_v3 = vrot.slane %v5039_v24, %v7096_v22 }
0x123b   :  { %v4964_v2 = vpop.f32.mrb[88].mxu0 }
0x123c   :  { %v5054_v35 = vcombine.low %v4872_v40, %v4964_v2  ;;  %v5055_v1 = vcombine.high %v4872_v40, %v4964_v2  ;;  %v6366_v39 = vpop.f32.mrb[89].mxu0 }
0x123d   :  { %v4967_v50 = vpop.f32.mrb[90].mxu0 }
0x123e   :  { %v5062_v10 = vrot.slane %v5054_v35, %v7096_v22  ;;  %v5069_v18 = vrot.slane %v5055_v1, %v7096_v22  ;;  %v6367_v16 = vpop.f32.mrb[91].mxu0 }
0x1240   :  { %v5070_v8 = vcombine.low %v5046_v5, %v5062_v10  ;;  %v5071_v55 = vcombine.high %v5046_v5, %v5062_v10  ;;  %v5086_v63 = vcombine.low %v5053_v3, %v5069_v18  ;;  %v5087_v61 = vcombine.high %v5053_v3, %v5069_v18 }
0x1242   :  { %v5078_v21 = vrot.slane %v5070_v8, %v7099_v29  ;;  %v5085_v59 = vrot.slane %v5071_v55, %v7099_v29  ;;  %v5094_v13 = vrot.slane %v5086_v63, %v7099_v29  ;;  %v5101_v27 = vrot.slane %v5087_v61, %v7099_v29 }
0x1244   :  { %v5174_v38 = vcombine.low %v5078_v21, %v5085_v59  ;;  %v5878_v62 = vcombine.high %v5078_v21, %v5085_v59  ;;  %v5190_v37 = vcombine.low %v5094_v13, %v5101_v27  ;;  %v5879_v25 = vcombine.high %v5094_v13, %v5101_v27 }
0x1246   :  { %v5181_v57 = vrot.slane %v5174_v38, %v7096_v22  ;;  %v5189_v23 = vrot.slane %v5878_v62, %v7096_v22  ;;  %v5197_v33 = vrot.slane %v5190_v37, %v7096_v22  ;;  %v5205_v56 = vrot.slane %v5879_v25, %v7096_v22  ;;  %v6520_v38 = vld [vmem:[%s8066_s13 + $0x10] sm:$0xff]   ;;  %v6521_v62 = vld [vmem:[%s8066_s13 + $0x18] sm:$0xff]  }
0x1247   :  { %6377 = vmatpush3.bf16.msra.mxu0 %v6520_v38 }
0x1248   :  { %v5207_v12 = vcombine.high %v5181_v57, %v5189_v23  ;;  %v5223_v36 = vcombine.high %v5197_v33, %v5205_v56  ;;  %v5206_v42 = vcombine.low %v5181_v57, %v5189_v23  ;;  %v5222_v34 = vcombine.low %v5197_v33, %v5205_v56  ;;  %6378 = vmatprep.subr.bf16.mxu0 %v6798_v41 }
0x124a   :  { %v5221_v44 = vrot.slane %v5207_v12, %v7099_v29  ;;  %v5237_v45 = vrot.slane %v5223_v36, %v7099_v29  ;;  %v5214_v46 = vrot.slane %v5206_v42, %v7099_v29  ;;  %v5230_v53 = vrot.slane %v5222_v34, %v7099_v29 }
0x124b   :  { %6379 = vmatpush3.bf16.msra.mxu0 %v6521_v62  ;;  %v5915_v62 = vld [vmem:[%s8069_s16 + $0x1] ss:$0 sm:$0xff] }
0x124c   :  { %v5240_v48 = vcombine.low %v5221_v44, %v5237_v45  ;;  %v5239_v6 = vcombine.high %v5214_v46, %v5230_v53  ;;  %v5238_v26 = vcombine.low %v5214_v46, %v5230_v53  ;;  %v5241_v22 = vcombine.high %v5221_v44, %v5237_v45 }
0x124e   :  { %v6484_v40 = vpack.i.bf16 %v5240_v48, %v5172_v31  ;;  %v6479_v60 = vpack.i.bf16 %v5239_v6, %v5171_v32  ;;  %v6489_v52 = vpack.i.bf16 %v5241_v22, %v5173_v9 }
0x1250   :  { %6485 = vrot.lane.b32.xlu1 %v6484_v40, %s6806_s28  ;;  %6480 = vrot.lane.b32.xlu0 %v6479_v60, %s6794_s1 }
0x1254   :  { %6490 = vrot.lane.b32.xlu1 %v6489_v52, %s6807_s6  ;;  %v5888_v52 = vld [vmem:[%s8065_s12 + $0x1] ss:$0 sm:$0xff]  ;;  %s6808_s12 = smov [#allocation11]  }
0x1255   :  { %s5747_s26 = sshll.u32 %s6808_s12, 4  ;;  %s5748_s26 = int_to_ptr.vmem [resolvable:$true] %s5747_s26 }
0x1256   :  { %p6763_p13 = scmp.lt.s32.totalorder %s5748_s26, %s5748_s26 }
0x12c2   :  { %v6486_v58 = vpop.permute.xlu1 %6485  ;;  %v6481_v49 = vpop.permute.xlu0 %6480 }
0x12c3   :  { %v6483_v29 = vunpack.i.h.bf16 %v6481_v49  ;;  %v6482_v4 = vunpack.i.l.bf16 %v6481_v49  ;;  %v6488_v20 = vunpack.i.h.bf16 %v6486_v58  ;;  %v6487_v11 = vunpack.i.l.bf16 %v6486_v58 }
0x12c5   :  { %v5266_v19 = vsel %vm1502_vm13, %v5170_v43, %v6482_v4  ;;  %v5267_v31 = vsel %vm1502_vm13, %v5238_v26, %v6483_v29  ;;  %v5887_v26 = vld [vmem:[%s8064_s11 + $0x1] ss:$0 sm:$0xff] }
0x12c6   :  { %v6491_v32 = vpop.permute.xlu1 %6490  ;;  %v5268_v51 = vsel %vm206_vm0, %v5266_v19, %v6487_v11  ;;  %v5269_v17 = vsel %vm206_vm0, %v5267_v31, %v6488_v20  ;;  %v6522_v20 = vld [vmem:[%s8068_s15 + $0x40] sm:$0xff]   ;;  %v6523_v11 = vld [vmem:[%s8068_s15 + $0x48] sm:$0xff]   ;;  %v6524_v19 = vld [vmem:[%s8068_s15 + $0x50] sm:$0xff]  }
0x12c7   :  { %v6493_v9 = vunpack.i.h.bf16 %v6491_v32  ;;  %v6492_v24 = vunpack.i.l.bf16 %v6491_v32  ;;  %v6526_v31 = vld [vmem:[%s8068_s15 + $0x60] sm:$0xff]   ;;  %v6527_v32 = vld [vmem:[%s8068_s15 + $0x68] sm:$0xff]  }
0x12c9   :  { %v5270_v54 = vsel %vm2652_vm1, %v5268_v51, %v6492_v24  ;;  %v5271_v2 = vsel %vm2652_vm1, %v5269_v17, %v6493_v9  ;;  %v6528_v9 = vld [vmem:[%s8068_s15 + $0x70] sm:$0xff]   ;;  %v6529_v24 = vld [vmem:[%s8068_s15 + $0x78] sm:$0xff]   ;;  %v5894_v51 = vld [vmem:[%s8067_s14 + $0x1] ss:$0 sm:$0xff] }
0x12ca   :  { %v5272_v35 = vpack.c.bf16 %v5271_v2, %v5270_v54 }
0x12cc   :  { %6373 = vmatmul.mubr.msk.bf16.vlgmr.msra.gmra.mrb[80].mxu1 %vm369_vm7, %v5272_v35 }
0x12cd   :  { %6400 = vmatprep.mubr.msk.bf16.mxu1 %vm6800_vm8, %v6798_v41  ;;  %6385 = vmatpush3.bf16.msra.mxu1 %v6522_v20 }
0x12ce   :  { %6386 = vmatprep.subr.bf16.mxu1 %v6798_v41 }
0x12d1   :  { %6387 = vmatpush3.bf16.msra.mxu1 %v6523_v11 }
0x12d2   :  { %6388 = vmatprep.subr.bf16.mxu1 %v6798_v41 }
0x12d5   :  { %6389 = vmatpush3.bf16.msra.mxu1 %v6524_v19 }
0x12d6   :  { %6390 = vmatprep.subr.bf16.mxu1 %v6798_v41 }
0x139f   :  { %v5335_v15 = vpop.f32.mrb[80].mxu1 }
0x13a0   :  { %v5336_v43 = vadd.f32 %v5881_v28, %v5335_v15  ;;  %v6374_v1 = vpop.f32.mrb[81].mxu1 }
0x13a1   :  { %v5338_v39 = vpop.f32.mrb[82].mxu1 }
0x13a2   :  { %v7950_v50 = vadd.f32 %v5336_v43, %v7541_v7  ;;  %v5339_v5 = vadd.f32 %v5881_v28, %v5338_v39  ;;  %v6375_v3 = vpop.f32.mrb[83].mxu1 }
0x13a4   :  { %v7953_v10 = vadd.f32 %v5339_v5, %v7544_v14  ;;  %v5348_v18 = vsel %vm369_vm7, %v7950_v50, 0.0 }
0x13a5   :  { %5349 = vadd.xlane.f32.xlu0 %v5348_v18 }
0x13a6   :  { %v5351_v16 = vsel %vm369_vm7, %v7953_v10, 0.0 }
0x13a7   :  { %5352 = vadd.xlane.f32.xlu1 %v5351_v16 }
0x1432   :  { %v5350_v8 = vpop.xlane.xlu0 %5349 }
0x1433   :  { %v5354_v55 = vmul.f32 0.03125, %v5350_v8 }
0x1434   :  { %v5353_v63 = vpop.xlane.xlu1 %5352 }
0x1435   :  { %v5356_v61 = vsub.f32 %v7950_v50, %v5354_v55  ;;  %v5355_v7 = vmul.f32 0.03125, %v5353_v63 }
0x1437   :  { %v5357_v21 = vsub.f32 %v7953_v10, %v5355_v7  ;;  %v5358_v59 = vmul.f32 %v5356_v61, %v5356_v61 }
0x1439   :  { %v5360_v14 = vsel %vm369_vm7, %v5358_v59, 0.0  ;;  %v5359_v13 = vmul.f32 %v5357_v21, %v5357_v21 }
0x143a   :  { %5361 = vadd.xlane.f32.xlu0 %v5360_v14 }
0x143b   :  { %v5363_v27 = vsel %vm369_vm7, %v5359_v13, 0.0 }
0x143e   :  { %5364 = vadd.xlane.f32.xlu0 %v5363_v27 }
0x14c7   :  { %v5362_v37 = vpop.xlane.xlu0 %5361 }
0x14c8   :  { %v5366_v25 = vmul.f32 0.03125, %v5362_v37 }
0x14ca   :  { %v5368_v30 = vadd.f32 1e-05, %v5366_v25 }
0x14cb   :  { %v5365_v57 = vpop.xlane.xlu0 %5364 }
0x14cc   :  { %6628 = vrsqrt.f32 %v5368_v30  ;;  %v5367_v23 = vmul.f32 0.03125, %v5365_v57  ;;  %vm5372_vm0 = vcmp.eq.f32.partialorder %v5368_v30, inf  ;;  %v5375_v36 = vand.u32 2147483648, %v5368_v30 }
0x14cd   :  { %vm5374_vm8 = vcmp.eq.f32.partialorder %v5368_v30, 0.0 }
0x14ce   :  { %v5369_v33 = vadd.f32 1e-05, %v5367_v23 }
0x14d0   :  { %6630 = vrsqrt.f32 %v5369_v33  ;;  %vm5379_vm12 = vcmp.eq.f32.partialorder %v5369_v33, inf  ;;  %v5382_v46 = vand.u32 2147483648, %v5369_v33  ;;  %vm5381_vm13 = vcmp.eq.f32.partialorder %v5369_v33, 0.0 }
0x14d6   :  { %v6629_v56 = vpop.eup %6628 }
0x14d7   :  { %v5371_v12 = vmul.f32 %v6629_v56, %v5368_v30 }
0x14d9   :  { %v5373_v42 = vsel %vm5372_vm0, %v5368_v30, %v5371_v12 }
0x14da   :  { %v5376_v34 = vsel %vm5374_vm8, %v5375_v36, %v5373_v42  ;;  %v6631_v44 = vpop.eup %6630 }
0x14db   :  { %6632 = vrcp.f32 %v5376_v34  ;;  %v5378_v45 = vmul.f32 %v6631_v44, %v5369_v33 }
0x14dd   :  { %v5380_v53 = vsel %vm5379_vm12, %v5369_v33, %v5378_v45 }
0x14de   :  { %v5383_v47 = vsel %vm5381_vm13, %v5382_v46, %v5380_v53 }
0x14df   :  { %6634 = vrcp.f32 %v5383_v47 }
0x14e5   :  { %v6633_v48 = vpop.eup %6632 }
0x14e6   :  { %v5385_v6 = vmul.f32 %v6633_v48, %v5356_v61 }
0x14e8   :  { %v5394_v60 = vmul.f32 %v5887_v26, %v5385_v6 }
0x14e9   :  { %v6635_v22 = vpop.eup %6634 }
0x14ea   :  { %v5387_v40 = vmul.f32 %v6635_v22, %v5357_v21  ;;  %v5402_v49 = vadd.f32 %v5888_v52, %v5394_v60  ;;  %v6532_v22 = vld [vmem:[%s8072_s19 + $0x4] ss:$8 sps:$4 sm:$0xff]   ;;  %v6533_v60 = vld [vmem:[%s8072_s19 + $0x10] ss:$8 sps:$4 sm:$0xff]  }
0x14eb   :  { %5695 = vmatprep.subr.bf16.mxu0 %v6532_v22 }
0x14ec   :  { %v5395_v58 = vmul.f32 %v5887_v26, %v5387_v40  ;;  %v6535_v40 = vld [vmem:[%s8072_s19 + $0x14] ss:$8 sps:$4 sm:$0xff]  }
0x14ee   :  { %v5403_v29 = vadd.f32 %v5888_v52, %v5395_v58 }
0x14f0   :  { %v5404_v4 = vpack.c.bf16 %v5403_v29, %v5402_v49 }
0x14f2   :  { %6381 = vmatmul.mubr.msk.bf16.vlgmr.msra.gmra.mrb[92].mxu0 %vm369_vm7, %v5404_v4 }
0x14f3   :  { %5727 = vmatprep.mubr.bf16.mxu0 %v6797_v0  ;;  %v6525_v0 = vld [vmem:[%s8068_s15 + $0x58] sm:$0xff]  }
0x14f4   :  { %6391 = vmatpush3.bf16.msra.mxu1 %v6525_v0 }
0x14f5   :  { %6392 = vmatprep.subr.bf16.mxu1 %v6798_v41 }
0x14f8   :  { %6393 = vmatpush3.bf16.msra.mxu1 %v6526_v31 }
0x14f9   :  { %6394 = vmatprep.subr.bf16.mxu1 %v6798_v41 }
0x14fc   :  { %6395 = vmatpush3.bf16.msra.mxu1 %v6527_v32 }
0x14fd   :  { %6396 = vmatprep.subr.bf16.mxu1 %v6798_v41 }
0x1500   :  { %6397 = vmatpush3.bf16.msra.mxu1 %v6528_v9 }
0x1501   :  { %6398 = vmatprep.subr.bf16.mxu1 %v6798_v41 }
0x1504   :  { %6399 = vmatpush3.bf16.msra.mxu1 %v6529_v24 }
0x15c5   :  { %v5467_v17 = vpop.f32.mrb[92].mxu0 }
0x15c6   :  { %v5468_v54 = vadd.f32 %v5894_v51, %v5467_v17  ;;  %v6382_v2 = vpop.f32.mrb[93].mxu0 }
0x15c7   :  { %v5470_v35 = vpop.f32.mrb[94].mxu0 }
0x15c8   :  { %v5476_v28 = vmul.f32 0.044715, %v5468_v54  ;;  %v5471_v15 = vadd.f32 %v5894_v51, %v5470_v35  ;;  %v6383_v43 = vpop.f32.mrb[95].mxu0  ;;  %v5474_v21 = vmul.f32 0.5, %v5468_v54  ;;  %v5924_v35 = vld [vmem:[%s8070_s17] ss:$0 sm:$0xff] }
0x15c9   :  { %s6758_s17 = scalar_lea.vmem %s5748_s26, 512 }
0x15ca   :  { %v5478_v1 = vmul.f32 %v5476_v28, %v5468_v54  ;;  %v5477_v39 = vmul.f32 0.044715, %v5471_v15  ;;  %v5475_v59 = vmul.f32 0.5, %v5471_v15  ;;  %p6759_p12 = scmp.ne.s32.totalorder %s5748_s26, %s6758_s17  ;;  %p6764_p0 = scmp.lt.s32.totalorder %s6758_s17, %s6758_s17 }
0x15cc   :  { %v5480_v5 = vmul.f32 %v5478_v1, %v5468_v54  ;;  %v5479_v3 = vmul.f32 %v5477_v39, %v5471_v15  ;;  %v5925_v39 = vld [vmem:[%s8071_s18] ss:$0 sm:$0xff]  ;;  %p6765_p1 = por %p6764_p0, %p6763_p13 }
0x15ce   :  { %v5482_v18 = vadd.f32 %v5480_v5, %v5468_v54  ;;  %v5481_v16 = vmul.f32 %v5479_v3, %v5471_v15  ;;  %p6766_p2 = pnand %p6765_p1, %p6759_p12 }
0x15d0   :  { %v5484_v8 = vmul.f32 0.7978845, %v5482_v18  ;;  %v5483_v41 = vadd.f32 %v5481_v16, %v5471_v15 }
0x15d2   :  { %6636 = vtanh.f32 %v5484_v8  ;;  %v5485_v55 = vmul.f32 0.7978845, %v5483_v41 }
0x15d4   :  { %6638 = vtanh.f32 %v5485_v55 }
0x15dc   :  { %v6637_v63 = vpop.eup %6636 }
0x15dd   :  { %v5488_v61 = vadd.f32 1.0, %v6637_v63 }
0x15de   :  { %v6639_v7 = vpop.eup %6638 }
0x15df   :  { %v5489_v14 = vadd.f32 1.0, %v6639_v7  ;;  %v5490_v13 = vmul.f32 %v5488_v61, %v5474_v21 }
0x15e1   :  { %v5491_v27 = vmul.f32 %v5489_v14, %v5475_v59 }
0x15e3   :  { %v5492_v38 = vpack.c.bf16 %v5491_v27, %v5490_v13 }
0x15e5   :  { %6401 = vmatmul.mubr.bf16.vlgmr.msra.gmra.mrb[84].mxu1 %v5492_v38 }
0x16b8   :  { %v5600_v37 = vpop.f32.mrb[84].mxu1 }
0x16b9   :  { %v5601_v25 = vadd.f32 %v5915_v62, %v5600_v37  ;;  %v6402_v30 = vpop.f32.mrb[85].mxu1 }
0x16ba   :  { %v5603_v57 = vpop.f32.mrb[86].mxu1 }
0x16bb   :  { %v5604_v23 = vadd.f32 %v5915_v62, %v5603_v57  ;;  %v6403_v33 = vpop.f32.mrb[87].mxu1  ;;  %v5607_v56 = vadd.f32 %v5601_v25, %v7950_v50 }
0x16bd   :  { %v5611_v12 = vsel %vm369_vm7, %v5607_v56, 0.0  ;;  %v5608_v36 = vadd.f32 %v5604_v23, %v7953_v10  ;;  %v6530_v10 = vld [vmem:[%s8072_s19] ss:$8 sps:$4 sm:$0xff]  }
0x16be   :  { %5612 = vadd.xlane.f32.xlu1 %v5611_v12  ;;  %5696 = vmatpush1.bf16.msra.mxu0 %v6530_v10 }
0x16bf   :  { %v5614_v42 = vsel %vm369_vm7, %v5608_v36, 0.0  ;;  %5697 = vmatprep.subr.bf16.mxu0 %v6535_v40 }
0x16c0   :  { %5615 = vadd.xlane.f32.xlu0 %v5614_v42 }
0x16c2   :  { %5698 = vmatpush1.bf16.msra.mxu0 %v6533_v60 }
0x174b   :  { %v5613_v34 = vpop.xlane.xlu1 %5612 }
0x174c   :  { %v5617_v44 = vmul.f32 0.03125, %v5613_v34 }
0x174d   :  { %v5616_v45 = vpop.xlane.xlu0 %5615 }
0x174e   :  { %v5619_v46 = vsub.f32 %v5607_v56, %v5617_v44  ;;  %v5618_v53 = vmul.f32 0.03125, %v5616_v45 }
0x1750   :  { %v5620_v47 = vsub.f32 %v5608_v36, %v5618_v53  ;;  %v5621_v48 = vmul.f32 %v5619_v46, %v5619_v46 }
0x1752   :  { %v5623_v6 = vsel %vm369_vm7, %v5621_v48, 0.0  ;;  %v5622_v26 = vmul.f32 %v5620_v47, %v5620_v47 }
0x1753   :  { %5624 = vadd.xlane.f32.xlu1 %v5623_v6 }
0x1754   :  { %v5626_v50 = vsel %vm369_vm7, %v5622_v26, 0.0 }
0x1755   :  { %5627 = vadd.xlane.f32.xlu0 %v5626_v50 }
0x17e0   :  { %v5625_v52 = vpop.xlane.xlu1 %5624 }
0x17e1   :  { %v5629_v58 = vmul.f32 0.03125, %v5625_v52 }
0x17e2   :  { %v5628_v49 = vpop.xlane.xlu0 %5627 }
0x17e3   :  { %v5631_v29 = vadd.f32 1e-05, %v5629_v58  ;;  %v5630_v4 = vmul.f32 0.03125, %v5628_v49 }
0x17e5   :  { %6640 = vrsqrt.f32 %v5631_v29  ;;  %v5632_v20 = vadd.f32 1e-05, %v5630_v4  ;;  %vm5635_vm14 = vcmp.eq.f32.partialorder %v5631_v29, inf  ;;  %v5638_v0 = vand.u32 2147483648, %v5631_v29 }
0x17e6   :  { %vm5637_vm15 = vcmp.eq.f32.partialorder %v5631_v29, 0.0 }
0x17e7   :  { %6642 = vrsqrt.f32 %v5632_v20  ;;  %vm5642_vm1 = vcmp.eq.f32.partialorder %v5632_v20, inf  ;;  %v5645_v51 = vand.u32 2147483648, %v5632_v20  ;;  %vm5644_vm2 = vcmp.eq.f32.partialorder %v5632_v20, 0.0 }
0x17ef   :  { %v6641_v11 = vpop.eup %6640 }
0x17f0   :  { %v5634_v19 = vmul.f32 %v6641_v11, %v5631_v29 }
0x17f1   :  { %v6643_v31 = vpop.eup %6642 }
0x17f2   :  { %v5636_v32 = vsel %vm5635_vm14, %v5631_v29, %v5634_v19  ;;  %v5641_v24 = vmul.f32 %v6643_v31, %v5632_v20 }
0x17f3   :  { %v5639_v9 = vsel %vm5637_vm15, %v5638_v0, %v5636_v32 }
0x17f4   :  { %6644 = vrcp.f32 %v5639_v9  ;;  %v5643_v17 = vsel %vm5642_vm1, %v5632_v20, %v5641_v24 }
0x17f5   :  { %v5646_v54 = vsel %vm5644_vm2, %v5645_v51, %v5643_v17 }
0x17f6   :  { %6646 = vrcp.f32 %v5646_v54 }
0x17fe   :  { %v6645_v2 = vpop.eup %6644 }
0x17ff   :  { %v5648_v28 = vmul.f32 %v6645_v2, %v5619_v46 }
0x1800   :  { %v6647_v15 = vpop.eup %6646 }
0x1801   :  { %v5650_v43 = vmul.f32 %v6647_v15, %v5620_v47  ;;  %v5657_v1 = vmul.f32 %v5924_v35, %v5648_v28 }
0x1803   :  { %v5658_v5 = vmul.f32 %v5924_v35, %v5650_v43  ;;  %v5665_v3 = vadd.f32 %v5925_v39, %v5657_v1 }
0x1805   :  { %v5666_v18 = vadd.f32 %v5925_v39, %v5658_v5 }
0x1807   :  { %v5667_v16 = vpack.c.bf16 %v5666_v18, %v5665_v3 }
0x1809   :  { %5930 = vmatmul.mubr.msk.bf16.vlgmr.msra.gmra.mrb[96].mxu0 %vm369_vm7, %v5667_v16 }
0x18dc   :  { %v5729_v8 = vpop.f32.mrb[96].mxu0 }
0x18dd   :  { %5738 = vst [vmem:[#allocation11] sm:$0xff] %v5729_v8  ;;  %v5731_v41 = vpop.f32.mrb[97].mxu0 }
0x18de   :  { %5739 = vst [vmem:[#allocation11 + $0x8] sm:$0xff] %v5731_v41  ;;  %v5733_v55 = vpop.f32.mrb[98].mxu0 }
0x18df   :  { %5740 = vst [vmem:[#allocation11 + $0x10] sm:$0xff] %v5733_v55  ;;  %v5735_v63 = vpop.f32.mrb[99].mxu0 }
0x18e0   :  { %5741 = vst [vmem:[#allocation11 + $0x18] sm:$0xff] %v5735_v63 }
0x18e1   :  { %6769 = shalt.err (!%p6766_p2)
}
0x18e2   :  { %s8094_s29 = sld [smem:[#allocation21_spill]] }
0x18e8   :  { %s6770_s20 = scalar_lea.hbm %s8094_s29, 512 }
0x18e9   :  { %p6771_p3 = scmp.ne.s32.totalorder %s8094_s29, %s6770_s20  ;;  %p6774_p4 = scmp.lt.u32.totalorder %s6770_s20, %s8094_s29 }
0x18eb   :  { %p6776_p5 = pnand %p6774_p4, %p6771_p3 }
0x18ed   :  { %6779 = shalt.err (!%p6776_p5)
}
0x18ee   :  { %s6809_s23 = smov 256  }
0x18ef   :  { %5753 = dma.vmem_to_hbm [thread:$0]  %s5748_s26, 512, %s8094_s29, [#allocation4], %s6809_s23, %s6809_s23, %s6806_s28  }
0x18f0   :  { %6786 = dma.done.wait [#allocation4], 512  }
0x18f1   :  { %6787 = vsyncadd [#allocation4], 4294966784 }
0x18f2   :  { %5757 = vsyncpa [#allocation3], 1 }
0x18f3   :  { %5758 = vsyncpa [#allocation6], 1 }
0x18f4   :  { %5759 = vsyncpa [#allocation9], 1 }
0x18f5   :  { %5760 = vsyncpa [#allocation4], 1 }

</bundles_post_ra>
